<compile_context>
chip_gen: v5e
topology: v5e:2x2
jax: 0.10.0
libtpu: 0.0.40
codegen_flags: <defaults>
</compile_context>

<pallas_src>
from functools import partial

import jax
import jax.numpy as jnp
from jax import lax
from jax.experimental import pallas as pl
from jax.experimental.pallas import tpu as pltpu


# ----------------------------- small static helpers ------------------------------
def _round_up(x, m):
    return (x + m - 1) // m * m


def _row_tile(rows, max_tile=512):
    """Largest multiple-of-8 divisor of `rows` that is <= max_tile.

    Rows are always padded to a multiple of 64 by the caller, so this never
    degrades below 64 (and never to a pathological tm=8) for rows > max_tile.
    """
    max_tile = max(8, (max_tile // 8) * 8)
    if rows <= max_tile:
        return rows
    for d in range(max_tile, 7, -8):
        if rows % d == 0:
            return d
    return 8


def _logits_row_tile(rows, hp, vp, budget=40 << 20):
    """Row tile for the logits kernel, capped so the blocks fit a VMEM budget."""
    fixed = 2 * (hp * vp * 2 + vp * 4)          # lin_w (bf16) + bias (f32), 2 buffers
    per_row = 2 * (vp * 4 + hp * 2)             # logp out (f32) + hs in (bf16), 2 bufs
    cap = (budget - fixed) // per_row if budget > fixed else 8
    return _row_tile(rows, min(512, max(8, cap)))


def _vmem_limit(block_bytes):
    """Explicit scoped-VMEM limit: 2x computed block bytes + margin, HW-safe clamp."""
    return int(min(max(2 * block_bytes + (4 << 20), 16 << 20), 64 << 20))


# --------------------------- kernel 1: x @ W_i + bias -----------------------------
def matmul_bias_kernel(x_ref, w_ref, b_ref, o_ref):
    # bf16 operands -> MXU, f32 accumulate, bf16 store (halves xproj HBM traffic).
    acc = jnp.dot(x_ref[...], w_ref[...], preferred_element_type=jnp.float32)
    o_ref[...] = (acc + b_ref[...]).astype(o_ref.dtype)


# --------------------------- kernel 2: GRU recurrence ------------------------------
def gru_kernel(xp_ref, h0_ref, wh_ref, bhn_ref, hs_ref, hT_ref, buf_ref,
               *, valid_len, padded_len):
    # xp_ref : (ts, Bb, 3*Hp) bf16  precomputed x @ W_i + fused biases for this chunk
    # h0_ref : (Bb, Hp)       f32   initial hidden state (this batch block)
    # wh_ref : (Hp, 3*Hp)     bf16  fused hidden->gates weights
    # bhn_ref: (1, Hp)        f32   b_hn (must stay inside r * (...))
    # hs_ref : (Bb, ts, Hp)   bf16  chunk slice of the (Bp, S_pad, Hp) output (B-major)
    # hT_ref : (Bb, Hp)       f32   resident block -> carries h across seq chunks
    # buf_ref: (ts, Bb, Hp)   f32   time-major scratch: dense per-step stores
    ts = xp_ref.shape[0]
    bb = h0_ref.shape[0]
    hd = wh_ref.shape[0]
    need_mask = padded_len > valid_len

    @pl.when(pl.program_id(1) == 0)
    def _():
        hT_ref[...] = h0_ref[...]

    bhn = jnp.broadcast_to(bhn_ref[...], (bb, hd))          # hoisted broadcast
    t0 = pl.program_id(1) * ts                              # global chunk offset

    def step(t, h):
        xp = xp_ref[t]                                      # (Bb, 3*Hp) bf16
        # W_h stays a ref-load fed straight into the dot (no 48-vreg live value).
        hp = jnp.dot(h.astype(jnp.bfloat16), wh_ref[...],
                     preferred_element_type=jnp.float32)
        r = jax.nn.sigmoid(xp[:, :hd] + hp[:, :hd])
        z = jax.nn.sigmoid(xp[:, hd:2 * hd] + hp[:, hd:2 * hd])
        n = jnp.tanh(xp[:, 2 * hd:] + r * (hp[:, 2 * hd:] + bhn))
        h_new = (1.0 - z) * n + z * h
        buf_ref[t] = h_new                                  # dense (8,128)-aligned store
        if need_mask:                                       # static python bool
            h_new = jnp.where(t0 + t < valid_len, h_new, h)
        return h_new

    h = hT_ref[...]
    if ts <= 8:
        for t in range(ts):                                 # short chunk: static unroll
            h = step(t, h)
    else:
        h = lax.fori_loop(0, ts, step, h)
    hT_ref[...] = h

    # One bulk relayout per chunk: time-major scratch -> B-major hs block
    # (amortized over ts steps; off the per-step store critical path).
    for b in range(bb):
        hs_ref[b] = buf_ref[:, b, :].astype(hs_ref.dtype)


# ----------------------- kernel 3: Linear + log_softmax ---------------------------
def logits_kernel(x_ref, w_ref, b_ref, o_ref):
    # TODO(synk): for very large vocabularies, tile the vocab axis with a two-pass
    # (flash-style) log_softmax instead of holding a full (tl, Vp) block.
    logits = (jnp.dot(x_ref[...], w_ref[...], preferred_element_type=jnp.float32)
              + b_ref[...])                                 # (tl, Vp) f32
    m = jnp.max(logits, axis=-1, keepdims=True)
    e = jnp.exp(logits - m)
    lse = jnp.log(jnp.sum(e, axis=-1, keepdims=True))
    o_ref[...] = logits - m - lse


# --------------------------------- parameters -------------------------------------
def init_params(key, vocab_size, embed_dim, hidden_dim):
    keys = jax.random.split(key, 16)
    k = 1.0 / jnp.sqrt(hidden_dim)

    def u(kk, shape):
        return jax.random.uniform(kk, shape, jnp.float32, -k, k)

    # PyTorch gate order (r, z, n); stored pre-transposed for (B,E)@(E,H) dots.
    return {
        "embedding": jax.random.normal(keys[0], (vocab_size, embed_dim), jnp.float32),
        "wir": u(keys[1], (embed_dim, hidden_dim)),
        "wiz": u(keys[2], (embed_dim, hidden_dim)),
        "win": u(keys[3], (embed_dim, hidden_dim)),
        "whr": u(keys[4], (hidden_dim, hidden_dim)),
        "whz": u(keys[5], (hidden_dim, hidden_dim)),
        "whn": u(keys[6], (hidden_dim, hidden_dim)),
        # b_ir + b_hr and b_iz + b_hz fuse; b_in / b_hn stay separate because
        # b_hn sits inside r * (...).
        "br":  u(keys[7], (1, hidden_dim)) + u(keys[8], (1, hidden_dim)),
        "bz":  u(keys[9], (1, hidden_dim)) + u(keys[10], (1, hidden_dim)),
        "bin": u(keys[11], (1, hidden_dim)),
        "bhn": u(keys[12], (1, hidden_dim)),
        "lin_w": u(keys[13], (hidden_dim, vocab_size)),
        "lin_b": u(keys[14], (1, vocab_size)),
    }


def prepare_params(params):
    """Fuse the 3 GRU gates, pad H / V to 128 lanes, cast MXU operands to bf16."""
    emb = params["embedding"]
    E, H = params["wir"].shape
    V = emb.shape[0]
    Hp = _round_up(H, 128)
    Vp = _round_up(V, 128)

    def pad(a, rows, cols):
        return jnp.pad(a, ((0, rows - a.shape[0]), (0, cols - a.shape[1])))

    w_i = jnp.concatenate([pad(params["wir"], E, Hp), pad(params["wiz"], E, Hp),
                           pad(params["win"], E, Hp)], axis=1)          # (E, 3Hp)
    w_h = jnp.concatenate([pad(params["whr"], H, Hp), pad(params["whz"], H, Hp),
                           pad(params["whn"], H, Hp)], axis=1)
    w_h = jnp.pad(w_h, ((0, Hp - H), (0, 0)))                           # (Hp, 3Hp)
    # r/z/n input-side biases (with hidden-side r/z biases folded in) ride along
    # with the hoisted x-projection; biases stay f32 (added post-accumulation).
    b_i = jnp.concatenate([pad(params["br"], 1, Hp), pad(params["bz"], 1, Hp),
                           pad(params["bin"], 1, Hp)], axis=1)          # (1, 3Hp) f32
    b_hn = pad(params["bhn"], 1, Hp)                                    # (1, Hp)  f32
    lin_w = pad(params["lin_w"], Hp, Vp)                                # (Hp, Vp)
    # Padded vocab columns get a huge negative bias -> exp() == 0 under softmax.
    lin_b = jnp.concatenate(
        [params["lin_b"], jnp.full((1, Vp - V), -1e30, jnp.float32)], axis=1)

    return dict(embedding=emb.astype(jnp.bfloat16),
                w_i=w_i.astype(jnp.bfloat16), w_h=w_h.astype(jnp.bfloat16),
                b_i=b_i, b_hn=b_hn,
                lin_w=lin_w.astype(jnp.bfloat16), lin_b=lin_b,
                E=E, H=H, V=V, Hp=Hp, Vp=Vp)


# ----------------------------------- forward ---------------------------------------
def gru_model_forward(sequence, hidden, fused):
    """Mirrors GRUModel.forward(sequence, hidden)."""
    E, H, V = fused["E"], fused["H"], fused["V"]
    Hp, Vp = fused["Hp"], fused["Vp"]
    B, S = sequence.shape

    # Batch padding: sublane-multiple; split into 2 "parallel" blocks when possible
    # so v7x's two TensorCores each run an independent half-batch recurrence.
    Bp = _round_up(B, 8)
    NB = 2 if Bp >= 16 else 1
    if NB == 2:
        Bp = _round_up(Bp, 16)
    Bb = Bp // NB

    # Sequence chunking: cap the per-grid-step chunk at 64 timesteps and pad the
    # sequence to a chunk multiple (padded steps are masked out of the carry).
    s8 = _round_up(S, 8)
    if s8 <= 64:
        ts, S_pad = s8, s8
    else:
        ts, S_pad = 64, _round_up(S, 64)

    # ---- glue: embedding gather directly in time-major row order ----
    # TODO(synk): optionally fuse the gather into kernel 1 (embedding table as a VMEM
    # block + in-kernel take) to drop the (S*Bp, E) HBM materialization entirely.
    seq_p = jnp.pad(sequence, ((0, Bp - B), (0, S_pad - S)))            # (Bp, S_pad)
    ids_tm = jnp.transpose(seq_p, (1, 0)).reshape(S_pad * Bp)           # time-major ids
    x_tm = jnp.take(fused["embedding"], ids_tm, axis=0)                 # (S_pad*Bp, E) bf16
    h0 = jnp.pad(hidden[0], ((0, Bp - B), (0, Hp - H)))                 # (Bp, Hp) f32

    # ---- 1) hoisted input projection: one big row-tiled MXU matmul (bf16 in/out) ----
    rows = S_pad * Bp
    tm = _row_tile(rows)
    b1 = 2 * (tm * E * 2 + E * 3 * Hp * 2 + 3 * Hp * 4 + tm * 3 * Hp * 2)
    xproj = pl.pallas_call(
        matmul_bias_kernel,
        out_shape=jax.ShapeDtypeStruct((rows, 3 * Hp), jnp.bfloat16),
        grid=(rows // tm,),
        in_specs=[pl.BlockSpec((tm, E), lambda i: (i, 0)),
                  pl.BlockSpec((E, 3 * Hp), lambda i: (0, 0)),
                  pl.BlockSpec((1, 3 * Hp), lambda i: (0, 0))],
        out_specs=pl.BlockSpec((tm, 3 * Hp), lambda i: (i, 0)),
        compiler_params=pltpu.CompilerParams(
            dimension_semantics=("parallel",),
            vmem_limit_bytes=_vmem_limit(b1)),
        cost_estimate=pl.CostEstimate(
            flops=2 * rows * E * 3 * Hp, transcendentals=0,
            bytes_accessed=2 * (rows * E + E * 3 * Hp + rows * 3 * Hp) + 4 * 3 * Hp),
    )(x_tm, fused["w_i"], fused["b_i"])
    xproj = xproj.reshape(S_pad, Bp, 3 * Hp)                            # time-major

    # ---- 2) sequential GRU recurrence, batch-parallel x seq-chunk grid ----
    b2 = (2 * (ts * Bb * 3 * Hp * 2) + 2 * (Bb * Hp * 4) + 2 * (Hp * 3 * Hp * 2)
          + 2 * (Hp * 4) + 2 * (Bb * ts * Hp * 2) + 2 * (Bb * Hp * 4)
          + ts * Bb * Hp * 4)
    hs, hT = pl.pallas_call(
        partial(gru_kernel, valid_len=S, padded_len=S_pad),
        out_shape=(jax.ShapeDtypeStruct((Bp, S_pad, Hp), jnp.bfloat16),  # B-major
                   jax.ShapeDtypeStruct((Bp, Hp), jnp.float32)),
        grid=(NB, S_pad // ts),
        in_specs=[pl.BlockSpec((ts, Bb, 3 * Hp), lambda b, s: (s, b, 0)),
                  pl.BlockSpec((Bb, Hp), lambda b, s: (b, 0)),
                  pl.BlockSpec((Hp, 3 * Hp), lambda b, s: (0, 0)),
                  pl.BlockSpec((1, Hp), lambda b, s: (0, 0))],
        out_specs=(pl.BlockSpec((Bb, ts, Hp), lambda b, s: (b, s, 0)),
                   pl.BlockSpec((Bb, Hp), lambda b, s: (b, 0))),
        scratch_shapes=[pltpu.VMEM((ts, Bb, Hp), jnp.float32)],
        compiler_params=pltpu.CompilerParams(
            dimension_semantics=("parallel", "arbitrary"),
            vmem_limit_bytes=_vmem_limit(b2)),
        cost_estimate=pl.CostEstimate(
            flops=2 * S_pad * Bp * Hp * 3 * Hp + 12 * S_pad * Bp * Hp,
            transcendentals=3 * S_pad * Bp * Hp,
            bytes_accessed=2 * (S_pad * Bp * 3 * Hp + Hp * 3 * Hp + S_pad * Bp * Hp)
                           + 4 * 2 * Bp * Hp),
    )(xproj, h0, fused["w_h"], fused["b_hn"])

    # ---- 3) output Linear + log_softmax (hs already (B, S, H): no transpose) ----
    rows_l = Bp * S_pad
    tl = _logits_row_tile(rows_l, Hp, Vp)
    pred = hs.reshape(rows_l, Hp)                                       # bf16
    b3 = 2 * (tl * Hp * 2 + Hp * Vp * 2 + Vp * 4 + tl * Vp * 4)
    logp = pl.pallas_call(
        logits_kernel,
        out_shape=jax.ShapeDtypeStruct((rows_l, Vp), jnp.float32),
        grid=(rows_l // tl,),
        in_specs=[pl.BlockSpec((tl, Hp), lambda i: (i, 0)),
                  pl.BlockSpec((Hp, Vp), lambda i: (0, 0)),
                  pl.BlockSpec((1, Vp), lambda i: (0, 0))],
        out_specs=pl.BlockSpec((tl, Vp), lambda i: (i, 0)),
        compiler_params=pltpu.CompilerParams(
            dimension_semantics=("parallel",),
            vmem_limit_bytes=_vmem_limit(b3)),
        cost_estimate=pl.CostEstimate(
            flops=2 * rows_l * Hp * Vp, transcendentals=2 * rows_l * Vp,
            bytes_accessed=2 * (rows_l * Hp + Hp * Vp) + 4 * (rows_l * Vp + Vp)),
    )(pred, fused["lin_w"], fused["lin_b"])

    logp = logp.reshape(Bp, S_pad, Vp)[:B, :S, :V]                      # (B, S, V)
    hT = hT[:B, :H][None]                                               # (1, B, H)
    return logp, hT


# ------------------------------- pure-JAX reference --------------------------------
def _ref_forward(sequence, hidden, params):
    x = jnp.take(params["embedding"], sequence, axis=0)                 # (B, S, E)
    h = hidden[0]
    hs = []
    for t in range(sequence.shape[1]):
        x_t = x[:, t, :]
        r = jax.nn.sigmoid(x_t @ params["wir"] + h @ params["whr"] + params["br"])
        z = jax.nn.sigmoid(x_t @ params["wiz"] + h @ params["whz"] + params["bz"])
        n = jnp.tanh(x_t @ params["win"] + params["bin"]
                     + r * (h @ params["whn"] + params["bhn"]))
        h = (1.0 - z) * n + z * h
        hs.append(h)
    hs = jnp.stack(hs, axis=1)                                          # (B, S, H)
    logits = hs @ params["lin_w"] + params["lin_b"]
    return jax.nn.log_softmax(logits, axis=-1), h[None]


if __name__ == "__main__":
    VOCAB, EMBED, HIDDEN = 64, 16, 32
    BATCH, SEQ = 2, 8

    key = jax.random.PRNGKey(0)
    k_param, k_seq, k_h = jax.random.split(key, 3)

    params = init_params(k_param, VOCAB, EMBED, HIDDEN)
    fused = prepare_params(params)
    sequence = jax.random.randint(k_seq, (BATCH, SEQ), 0, VOCAB, dtype=jnp.int32)
    hidden = jax.random.normal(k_h, (1, BATCH, HIDDEN), jnp.float32)

    fwd = jax.jit(lambda s, h: gru_model_forward(s, h, fused))
    log_probs, h_out = fwd(sequence, hidden)
    jax.block_until_ready((log_probs, h_out))

    assert log_probs.shape == (BATCH, SEQ, VOCAB)
    assert h_out.shape == (1, BATCH, HIDDEN)
    # log_softmax sanity: probabilities sum to 1 along the vocab axis (f32 softmax math).
    assert bool(jnp.allclose(jnp.sum(jnp.exp(log_probs), axis=-1), 1.0, atol=1e-3))

    # Cross-check against a pure-f32 JAX reference; bf16 MXU feeds -> looser tolerance.
    ref_lp, ref_h = _ref_forward(sequence, hidden, params)
    assert bool(jnp.allclose(log_probs, ref_lp, atol=1e-1, rtol=5e-2))
    assert bool(jnp.allclose(h_out, ref_h, atol=1e-1, rtol=5e-2))

    print("KERNEL_OK")
</pallas_src>

<mosaic_0001>
module attributes {stable_mosaic.version = 11 : i64} {
  func.func @matmul_bias_kernel(%arg0: i32, %arg1: memref<64x16xbf16, #tpu.memory_space<vmem>>, %arg2: memref<16x384xbf16, #tpu.memory_space<vmem>>, %arg3: memref<1x384xf32, #tpu.memory_space<vmem>>, %arg4: memref<64x384xbf16, #tpu.memory_space<vmem>>) attributes {dimension_semantics = [#tpu.dimension_semantics<parallel>], iteration_bounds = array<i64: 1>, scalar_prefetch = 0 : i64, scratch_operands = 0 : i64, tpu.core_type = #tpu.core_type<tc>, window_params = [{transform_indices = @transform_0, window_bounds = array<i64: 64, 16>}, {pipeline_mode = #tpu.pipeline_mode<synchronous>, transform_indices = @transform_1, window_bounds = array<i64: 16, 384>}, {pipeline_mode = #tpu.pipeline_mode<synchronous>, transform_indices = @transform_2, window_bounds = array<i64: 1, 384>}, {transform_indices = @transform_3, window_bounds = array<i64: 64, 384>}]} {
    %c0 = arith.constant 0 : index
    %c0_0 = arith.constant 0 : index
    %0 = vector.load %arg1[%c0, %c0_0] : memref<64x16xbf16, #tpu.memory_space<vmem>>, vector<64x16xbf16>
    %c0_1 = arith.constant 0 : index
    %c0_2 = arith.constant 0 : index
    %1 = vector.load %arg2[%c0_1, %c0_2] : memref<16x384xbf16, #tpu.memory_space<vmem>>, vector<16x384xbf16>
    %cst = arith.constant dense<0.000000e+00> : vector<64x384xf32>
    %2 = tpu.matmul %0, %1, %cst {dimension_numbers = #tpu.dot_dimension_numbers<[1], [0], [0], [1], [0, 0, 1, 1], [], []>} : vector<64x16xbf16>, vector<16x384xbf16>, vector<64x384xf32> -> vector<64x384xf32>
    %c0_3 = arith.constant 0 : index
    %c0_4 = arith.constant 0 : index
    %3 = vector.load %arg3[%c0_3, %c0_4] : memref<1x384xf32, #tpu.memory_space<vmem>>, vector<1x384xf32>
    %4 = vector.broadcast %3 : vector<1x384xf32> to vector<64x384xf32>
    %5 = arith.addf %2, %4 : vector<64x384xf32>
    %6 = arith.truncf %5 : vector<64x384xf32> to vector<64x384xbf16>
    %c0_5 = arith.constant 0 : index
    %c0_6 = arith.constant 0 : index
    %7 = vector.load %arg4[%c0_5, %c0_6] : memref<64x384xbf16, #tpu.memory_space<vmem>>, vector<64x384xbf16>
    tpu.vector_store %arg4[%c0_5, %c0_6], %6 {strides = array<i32>} : memref<64x384xbf16, #tpu.memory_space<vmem>>, vector<64x384xbf16>,
    return
  }
  func.func @transform_0(%arg0: i32) -> (i32, i32) {
    %c0_i32 = arith.constant 0 : i32
    %c0_i32_0 = arith.constant 0 : i32
    return %arg0, %c0_i32 : i32, i32
  }
  func.func @transform_1(%arg0: i32) -> (i32, i32) {
    %c0_i32 = arith.constant 0 : i32
    %c0_i32_0 = arith.constant 0 : i32
    %c0_i32_1 = arith.constant 0 : i32
    return %c0_i32, %c0_i32_0 : i32, i32
  }
  func.func @transform_2(%arg0: i32) -> (i32, i32) {
    %c0_i32 = arith.constant 0 : i32
    %c0_i32_0 = arith.constant 0 : i32
    %c0_i32_1 = arith.constant 0 : i32
    return %c0_i32, %c0_i32_0 : i32, i32
  }
  func.func @transform_3(%arg0: i32) -> (i32, i32) {
    %c0_i32 = arith.constant 0 : i32
    %c0_i32_0 = arith.constant 0 : i32
    return %arg0, %c0_i32 : i32, i32
  }
}

module attributes {stable_mosaic.version = 11 : i64} {
  func.func @logits_kernel(%arg0: i32, %arg1: memref<64x128xbf16, #tpu.memory_space<vmem>>, %arg2: memref<128x128xbf16, #tpu.memory_space<vmem>>, %arg3: memref<1x128xf32, #tpu.memory_space<vmem>>, %arg4: memref<64x128xf32, #tpu.memory_space<vmem>>) attributes {dimension_semantics = [#tpu.dimension_semantics<parallel>], iteration_bounds = array<i64: 1>, scalar_prefetch = 0 : i64, scratch_operands = 0 : i64, tpu.core_type = #tpu.core_type<tc>, window_params = [{transform_indices = @transform_0, window_bounds = array<i64: 64, 128>}, {pipeline_mode = #tpu.pipeline_mode<synchronous>, transform_indices = @transform_1, window_bounds = array<i64: 128, 128>}, {pipeline_mode = #tpu.pipeline_mode<synchronous>, transform_indices = @transform_2, window_bounds = array<i64: 1, 128>}, {transform_indices = @transform_3, window_bounds = array<i64: 64, 128>}]} {
    %c0 = arith.constant 0 : index
    %c0_0 = arith.constant 0 : index
    %0 = vector.load %arg1[%c0, %c0_0] : memref<64x128xbf16, #tpu.memory_space<vmem>>, vector<64x128xbf16>
    %c0_1 = arith.constant 0 : index
    %c0_2 = arith.constant 0 : index
    %1 = vector.load %arg2[%c0_1, %c0_2] : memref<128x128xbf16, #tpu.memory_space<vmem>>, vector<128x128xbf16>
    %cst = arith.constant dense<0.000000e+00> : vector<64x128xf32>
    %2 = tpu.matmul %0, %1, %cst {dimension_numbers = #tpu.dot_dimension_numbers<[1], [0], [0], [1], [0, 0, 1, 1], [], []>} : vector<64x128xbf16>, vector<128x128xbf16>, vector<64x128xf32> -> vector<64x128xf32>
    %c0_3 = arith.constant 0 : index
    %c0_4 = arith.constant 0 : index
    %3 = vector.load %arg3[%c0_3, %c0_4] : memref<1x128xf32, #tpu.memory_space<vmem>>, vector<1x128xf32>
    %4 = vector.broadcast %3 : vector<1x128xf32> to vector<64x128xf32>
    %5 = arith.addf %2, %4 : vector<64x128xf32>
    %cst_5 = arith.constant dense<0xFF800000> : vector<64xf32>
    %6 = vector.multi_reduction <maximumf>, %5, %cst_5 [1] : vector<64x128xf32> to vector<64xf32>
    %7 = vector.shape_cast %6 : vector<64xf32> to vector<64x1xf32>
    %8 = vector.broadcast %7 : vector<64x1xf32> to vector<64x128xf32>
    %9 = arith.subf %5, %8 : vector<64x128xf32>
    %10 = math.exp %9 : vector<64x128xf32>
    %cst_6 = arith.constant dense<0.000000e+00> : vector<64xf32>
    %11 = vector.multi_reduction <add>, %10, %cst_6 [1] : vector<64x128xf32> to vector<64xf32>
    %12 = vector.shape_cast %11 : vector<64xf32> to vector<64x1xf32>
    %13 = math.log %12 : vector<64x1xf32>
    %14 = vector.broadcast %7 : vector<64x1xf32> to vector<64x128xf32>
    %15 = arith.subf %5, %14 : vector<64x128xf32>
    %16 = vector.broadcast %13 : vector<64x1xf32> to vector<64x128xf32>
    %17 = arith.subf %15, %16 : vector<64x128xf32>
    %c0_7 = arith.constant 0 : index
    %c0_8 = arith.constant 0 : index
    %18 = vector.load %arg4[%c0_7, %c0_8] : memref<64x128xf32, #tpu.memory_space<vmem>>, vector<64x128xf32>
    tpu.vector_store %arg4[%c0_7, %c0_8], %17 {strides = array<i32>} : memref<64x128xf32, #tpu.memory_space<vmem>>, vector<64x128xf32>,
    return
  }
  func.func @transform_0(%arg0: i32) -> (i32, i32) {
    %c0_i32 = arith.constant 0 : i32
    %c0_i32_0 = arith.constant 0 : i32
    return %arg0, %c0_i32 : i32, i32
  }
  func.func @transform_1(%arg0: i32) -> (i32, i32) {
    %c0_i32 = arith.constant 0 : i32
    %c0_i32_0 = arith.constant 0 : i32
    %c0_i32_1 = arith.constant 0 : i32
    return %c0_i32, %c0_i32_0 : i32, i32
  }
  func.func @transform_2(%arg0: i32) -> (i32, i32) {
    %c0_i32 = arith.constant 0 : i32
    %c0_i32_0 = arith.constant 0 : i32
    %c0_i32_1 = arith.constant 0 : i32
    return %c0_i32, %c0_i32_0 : i32, i32
  }
  func.func @transform_3(%arg0: i32) -> (i32, i32) {
    %c0_i32 = arith.constant 0 : i32
    %c0_i32_0 = arith.constant 0 : i32
    return %arg0, %c0_i32 : i32, i32
  }
}

module attributes {stable_mosaic.version = 11 : i64} {
  func.func @gru_kernel(%arg0: i32, %arg1: i32, %arg2: memref<8x8x384xbf16, #tpu.memory_space<vmem>>, %arg3: memref<8x128xf32, #tpu.memory_space<vmem>>, %arg4: memref<128x384xbf16, #tpu.memory_space<vmem>>, %arg5: memref<1x128xf32, #tpu.memory_space<vmem>>, %arg6: memref<8x8x128xbf16, #tpu.memory_space<vmem>>, %arg7: memref<8x128xf32, #tpu.memory_space<vmem>>, %arg8: memref<8x8x128xf32, #tpu.memory_space<vmem>>) attributes {dimension_semantics = [#tpu.dimension_semantics<parallel>, #tpu.dimension_semantics<arbitrary>], iteration_bounds = array<i64: 1, 1>, scalar_prefetch = 0 : i64, scratch_operands = 1 : i64, tpu.core_type = #tpu.core_type<tc>, window_params = [{transform_indices = @transform_0, window_bounds = array<i64: 8, 8, 384>}, {transform_indices = @transform_1, window_bounds = array<i64: 8, 128>}, {pipeline_mode = #tpu.pipeline_mode<synchronous>, transform_indices = @transform_2, window_bounds = array<i64: 128, 384>}, {pipeline_mode = #tpu.pipeline_mode<synchronous>, transform_indices = @transform_3, window_bounds = array<i64: 1, 128>}, {transform_indices = @transform_4, window_bounds = array<i64: 8, 8, 128>}, {transform_indices = @transform_5, window_bounds = array<i64: 8, 128>}]} {
    %c0_i32 = arith.constant 0 : i32
    %0 = arith.cmpi eq, %arg1, %c0_i32 : i32
    %1 = arith.extui %0 : i1 to i32
    %c0_i32_0 = arith.constant 0 : i32
    %2 = arith.cmpi ne, %1, %c0_i32_0 : i32
    scf.if %2 {
      %c0_142 = arith.constant 0 : index
      %c0_143 = arith.constant 0 : index
      %360 = vector.load %arg3[%c0_142, %c0_143] : memref<8x128xf32, #tpu.memory_space<vmem>>, vector<8x128xf32>
      %c0_144 = arith.constant 0 : index
      %c0_145 = arith.constant 0 : index
      %361 = vector.load %arg7[%c0_144, %c0_145] : memref<8x128xf32, #tpu.memory_space<vmem>>, vector<8x128xf32>
      tpu.vector_store %arg7[%c0_144, %c0_145], %360 {strides = array<i32>} : memref<8x128xf32, #tpu.memory_space<vmem>>, vector<8x128xf32>,
    } else {
    }
    %c0 = arith.constant 0 : index
    %c0_1 = arith.constant 0 : index
    %3 = vector.load %arg5[%c0, %c0_1] : memref<1x128xf32, #tpu.memory_space<vmem>>, vector<1x128xf32>
    %4 = vector.shape_cast %3 : vector<1x128xf32> to vector<1x128xf32>
    %5 = vector.broadcast %4 : vector<1x128xf32> to vector<8x128xf32>
    %c0_2 = arith.constant 0 : index
    %c0_3 = arith.constant 0 : index
    %6 = vector.load %arg7[%c0_2, %c0_3] : memref<8x128xf32, #tpu.memory_space<vmem>>, vector<8x128xf32>
    %c0_4 = arith.constant 0 : index
    %c0_5 = arith.constant 0 : index
    %c0_6 = arith.constant 0 : index
    %7 = vector.load %arg2[%c0_4, %c0_5, %c0_6] : memref<8x8x384xbf16, #tpu.memory_space<vmem>>, vector<1x8x384xbf16>
    %8 = vector.shape_cast %7 : vector<1x8x384xbf16> to vector<8x384xbf16>
    %9 = arith.truncf %6 : vector<8x128xf32> to vector<8x128xbf16>
    %c0_7 = arith.constant 0 : index
    %c0_8 = arith.constant 0 : index
    %10 = vector.load %arg4[%c0_7, %c0_8] : memref<128x384xbf16, #tpu.memory_space<vmem>>, vector<128x384xbf16>
    %cst = arith.constant dense<0.000000e+00> : vector<8x384xf32>
    %11 = tpu.matmul %9, %10, %cst {dimension_numbers = #tpu.dot_dimension_numbers<[1], [0], [0], [1], [0, 0, 1, 1], [], []>} : vector<8x128xbf16>, vector<128x384xbf16>, vector<8x384xf32> -> vector<8x384xf32>
    %12 = vector.extract_strided_slice %8 {offsets = [0, 0], sizes = [8, 128], strides = [1, 1]} : vector<8x384xbf16> to vector<8x128xbf16>
    %13 = vector.extract_strided_slice %11 {offsets = [0, 0], sizes = [8, 128], strides = [1, 1]} : vector<8x384xf32> to vector<8x128xf32>
    %14 = arith.extf %12 : vector<8x128xbf16> to vector<8x128xf32>
    %15 = arith.addf %14, %13 : vector<8x128xf32>
    %16 = arith.negf %15 : vector<8x128xf32>
    %17 = math.exp %16 : vector<8x128xf32>
    %cst_9 = arith.constant 1.000000e+00 : f32
    %18 = vector.broadcast %cst_9 : f32 to vector<8x128xf32>
    %19 = arith.addf %18, %17 : vector<8x128xf32>
    %20 = arith.divf %18, %19 : vector<8x128xf32>
    %21 = vector.extract_strided_slice %8 {offsets = [0, 128], sizes = [8, 128], strides = [1, 1]} : vector<8x384xbf16> to vector<8x128xbf16>
    %22 = vector.extract_strided_slice %11 {offsets = [0, 128], sizes = [8, 128], strides = [1, 1]} : vector<8x384xf32> to vector<8x128xf32>
    %23 = arith.extf %21 : vector<8x128xbf16> to vector<8x128xf32>
    %24 = arith.addf %23, %22 : vector<8x128xf32>
    %25 = arith.negf %24 : vector<8x128xf32>
    %26 = math.exp %25 : vector<8x128xf32>
    %cst_10 = arith.constant 1.000000e+00 : f32
    %27 = vector.broadcast %cst_10 : f32 to vector<8x128xf32>
    %28 = arith.addf %27, %26 : vector<8x128xf32>
    %29 = arith.divf %27, %28 : vector<8x128xf32>
    %30 = vector.extract_strided_slice %8 {offsets = [0, 256], sizes = [8, 128], strides = [1, 1]} : vector<8x384xbf16> to vector<8x128xbf16>
    %31 = vector.extract_strided_slice %11 {offsets = [0, 256], sizes = [8, 128], strides = [1, 1]} : vector<8x384xf32> to vector<8x128xf32>
    %32 = arith.addf %31, %5 : vector<8x128xf32>
    %33 = arith.mulf %20, %32 : vector<8x128xf32>
    %34 = arith.extf %30 : vector<8x128xbf16> to vector<8x128xf32>
    %35 = arith.addf %34, %33 : vector<8x128xf32>
    %36 = math.tanh %35 : vector<8x128xf32>
    %cst_11 = arith.constant 1.000000e+00 : f32
    %37 = vector.broadcast %cst_11 : f32 to vector<8x128xf32>
    %38 = arith.subf %37, %29 : vector<8x128xf32>
    %39 = arith.mulf %38, %36 : vector<8x128xf32>
    %40 = arith.mulf %29, %6 : vector<8x128xf32>
    %41 = arith.addf %39, %40 : vector<8x128xf32>
    %c0_12 = arith.constant 0 : index
    %c0_13 = arith.constant 0 : index
    %c0_14 = arith.constant 0 : index
    %42 = vector.load %arg8[%c0_12, %c0_13, %c0_14] : memref<8x8x128xf32, #tpu.memory_space<vmem>>, vector<1x8x128xf32>
    %43 = vector.shape_cast %42 : vector<1x8x128xf32> to vector<8x128xf32>
    %44 = vector.shape_cast %41 : vector<8x128xf32> to vector<1x8x128xf32>
    tpu.vector_store %arg8[%c0_12, %c0_13, %c0_14], %44 {strides = array<i32>} : memref<8x8x128xf32, #tpu.memory_space<vmem>>, vector<1x8x128xf32>,
    %c1 = arith.constant 1 : index
    %c0_15 = arith.constant 0 : index
    %c0_16 = arith.constant 0 : index
    %45 = vector.load %arg2[%c1, %c0_15, %c0_16] : memref<8x8x384xbf16, #tpu.memory_space<vmem>>, vector<1x8x384xbf16>
    %46 = vector.shape_cast %45 : vector<1x8x384xbf16> to vector<8x384xbf16>
    %47 = arith.truncf %41 : vector<8x128xf32> to vector<8x128xbf16>
    %c0_17 = arith.constant 0 : index
    %c0_18 = arith.constant 0 : index
    %48 = vector.load %arg4[%c0_17, %c0_18] : memref<128x384xbf16, #tpu.memory_space<vmem>>, vector<128x384xbf16>
    %cst_19 = arith.constant dense<0.000000e+00> : vector<8x384xf32>
    %49 = tpu.matmul %47, %48, %cst_19 {dimension_numbers = #tpu.dot_dimension_numbers<[1], [0], [0], [1], [0, 0, 1, 1], [], []>} : vector<8x128xbf16>, vector<128x384xbf16>, vector<8x384xf32> -> vector<8x384xf32>
    %50 = vector.extract_strided_slice %46 {offsets = [0, 0], sizes = [8, 128], strides = [1, 1]} : vector<8x384xbf16> to vector<8x128xbf16>
    %51 = vector.extract_strided_slice %49 {offsets = [0, 0], sizes = [8, 128], strides = [1, 1]} : vector<8x384xf32> to vector<8x128xf32>
    %52 = arith.extf %50 : vector<8x128xbf16> to vector<8x128xf32>
    %53 = arith.addf %52, %51 : vector<8x128xf32>
    %54 = arith.negf %53 : vector<8x128xf32>
    %55 = math.exp %54 : vector<8x128xf32>
    %cst_20 = arith.constant 1.000000e+00 : f32
    %56 = vector.broadcast %cst_20 : f32 to vector<8x128xf32>
    %57 = arith.addf %56, %55 : vector<8x128xf32>
    %58 = arith.divf %56, %57 : vector<8x128xf32>
    %59 = vector.extract_strided_slice %46 {offsets = [0, 128], sizes = [8, 128], strides = [1, 1]} : vector<8x384xbf16> to vector<8x128xbf16>
    %60 = vector.extract_strided_slice %49 {offsets = [0, 128], sizes = [8, 128], strides = [1, 1]} : vector<8x384xf32> to vector<8x128xf32>
    %61 = arith.extf %59 : vector<8x128xbf16> to vector<8x128xf32>
    %62 = arith.addf %61, %60 : vector<8x128xf32>
    %63 = arith.negf %62 : vector<8x128xf32>
    %64 = math.exp %63 : vector<8x128xf32>
    %cst_21 = arith.constant 1.000000e+00 : f32
    %65 = vector.broadcast %cst_21 : f32 to vector<8x128xf32>
    %66 = arith.addf %65, %64 : vector<8x128xf32>
    %67 = arith.divf %65, %66 : vector<8x128xf32>
    %68 = vector.extract_strided_slice %46 {offsets = [0, 256], sizes = [8, 128], strides = [1, 1]} : vector<8x384xbf16> to vector<8x128xbf16>
    %69 = vector.extract_strided_slice %49 {offsets = [0, 256], sizes = [8, 128], strides = [1, 1]} : vector<8x384xf32> to vector<8x128xf32>
    %70 = arith.addf %69, %5 : vector<8x128xf32>
    %71 = arith.mulf %58, %70 : vector<8x128xf32>
    %72 = arith.extf %68 : vector<8x128xbf16> to vector<8x128xf32>
    %73 = arith.addf %72, %71 : vector<8x128xf32>
    %74 = math.tanh %73 : vector<8x128xf32>
    %cst_22 = arith.constant 1.000000e+00 : f32
    %75 = vector.broadcast %cst_22 : f32 to vector<8x128xf32>
    %76 = arith.subf %75, %67 : vector<8x128xf32>
    %77 = arith.mulf %76, %74 : vector<8x128xf32>
    %78 = arith.mulf %67, %41 : vector<8x128xf32>
    %79 = arith.addf %77, %78 : vector<8x128xf32>
    %c1_23 = arith.constant 1 : index
    %c0_24 = arith.constant 0 : index
    %c0_25 = arith.constant 0 : index
    %80 = vector.load %arg8[%c1_23, %c0_24, %c0_25] : memref<8x8x128xf32, #tpu.memory_space<vmem>>, vector<1x8x128xf32>
    %81 = vector.shape_cast %80 : vector<1x8x128xf32> to vector<8x128xf32>
    %82 = vector.shape_cast %79 : vector<8x128xf32> to vector<1x8x128xf32>
    tpu.vector_store %arg8[%c1_23, %c0_24, %c0_25], %82 {strides = array<i32>} : memref<8x8x128xf32, #tpu.memory_space<vmem>>, vector<1x8x128xf32>,
    %c2 = arith.constant 2 : index
    %c0_26 = arith.constant 0 : index
    %c0_27 = arith.constant 0 : index
    %83 = vector.load %arg2[%c2, %c0_26, %c0_27] : memref<8x8x384xbf16, #tpu.memory_space<vmem>>, vector<1x8x384xbf16>
    %84 = vector.shape_cast %83 : vector<1x8x384xbf16> to vector<8x384xbf16>
    %85 = arith.truncf %79 : vector<8x128xf32> to vector<8x128xbf16>
    %c0_28 = arith.constant 0 : index
    %c0_29 = arith.constant 0 : index
    %86 = vector.load %arg4[%c0_28, %c0_29] : memref<128x384xbf16, #tpu.memory_space<vmem>>, vector<128x384xbf16>
    %cst_30 = arith.constant dense<0.000000e+00> : vector<8x384xf32>
    %87 = tpu.matmul %85, %86, %cst_30 {dimension_numbers = #tpu.dot_dimension_numbers<[1], [0], [0], [1], [0, 0, 1, 1], [], []>} : vector<8x128xbf16>, vector<128x384xbf16>, vector<8x384xf32> -> vector<8x384xf32>
    %88 = vector.extract_strided_slice %84 {offsets = [0, 0], sizes = [8, 128], strides = [1, 1]} : vector<8x384xbf16> to vector<8x128xbf16>
    %89 = vector.extract_strided_slice %87 {offsets = [0, 0], sizes = [8, 128], strides = [1, 1]} : vector<8x384xf32> to vector<8x128xf32>
    %90 = arith.extf %88 : vector<8x128xbf16> to vector<8x128xf32>
    %91 = arith.addf %90, %89 : vector<8x128xf32>
    %92 = arith.negf %91 : vector<8x128xf32>
    %93 = math.exp %92 : vector<8x128xf32>
    %cst_31 = arith.constant 1.000000e+00 : f32
    %94 = vector.broadcast %cst_31 : f32 to vector<8x128xf32>
    %95 = arith.addf %94, %93 : vector<8x128xf32>
    %96 = arith.divf %94, %95 : vector<8x128xf32>
    %97 = vector.extract_strided_slice %84 {offsets = [0, 128], sizes = [8, 128], strides = [1, 1]} : vector<8x384xbf16> to vector<8x128xbf16>
    %98 = vector.extract_strided_slice %87 {offsets = [0, 128], sizes = [8, 128], strides = [1, 1]} : vector<8x384xf32> to vector<8x128xf32>
    %99 = arith.extf %97 : vector<8x128xbf16> to vector<8x128xf32>
    %100 = arith.addf %99, %98 : vector<8x128xf32>
    %101 = arith.negf %100 : vector<8x128xf32>
    %102 = math.exp %101 : vector<8x128xf32>
    %cst_32 = arith.constant 1.000000e+00 : f32
    %103 = vector.broadcast %cst_32 : f32 to vector<8x128xf32>
    %104 = arith.addf %103, %102 : vector<8x128xf32>
    %105 = arith.divf %103, %104 : vector<8x128xf32>
    %106 = vector.extract_strided_slice %84 {offsets = [0, 256], sizes = [8, 128], strides = [1, 1]} : vector<8x384xbf16> to vector<8x128xbf16>
    %107 = vector.extract_strided_slice %87 {offsets = [0, 256], sizes = [8, 128], strides = [1, 1]} : vector<8x384xf32> to vector<8x128xf32>
    %108 = arith.addf %107, %5 : vector<8x128xf32>
    %109 = arith.mulf %96, %108 : vector<8x128xf32>
    %110 = arith.extf %106 : vector<8x128xbf16> to vector<8x128xf32>
    %111 = arith.addf %110, %109 : vector<8x128xf32>
    %112 = math.tanh %111 : vector<8x128xf32>
    %cst_33 = arith.constant 1.000000e+00 : f32
    %113 = vector.broadcast %cst_33 : f32 to vector<8x128xf32>
    %114 = arith.subf %113, %105 : vector<8x128xf32>
    %115 = arith.mulf %114, %112 : vector<8x128xf32>
    %116 = arith.mulf %105, %79 : vector<8x128xf32>
    %117 = arith.addf %115, %116 : vector<8x128xf32>
    %c2_34 = arith.constant 2 : index
    %c0_35 = arith.constant 0 : index
    %c0_36 = arith.constant 0 : index
    %118 = vector.load %arg8[%c2_34, %c0_35, %c0_36] : memref<8x8x128xf32, #tpu.memory_space<vmem>>, vector<1x8x128xf32>
    %119 = vector.shape_cast %118 : vector<1x8x128xf32> to vector<8x128xf32>
    %120 = vector.shape_cast %117 : vector<8x128xf32> to vector<1x8x128xf32>
    tpu.vector_store %arg8[%c2_34, %c0_35, %c0_36], %120 {strides = array<i32>} : memref<8x8x128xf32, #tpu.memory_space<vmem>>, vector<1x8x128xf32>,
    %c3 = arith.constant 3 : index
    %c0_37 = arith.constant 0 : index
    %c0_38 = arith.constant 0 : index
    %121 = vector.load %arg2[%c3, %c0_37, %c0_38] : memref<8x8x384xbf16, #tpu.memory_space<vmem>>, vector<1x8x384xbf16>
    %122 = vector.shape_cast %121 : vector<1x8x384xbf16> to vector<8x384xbf16>
    %123 = arith.truncf %117 : vector<8x128xf32> to vector<8x128xbf16>
    %c0_39 = arith.constant 0 : index
    %c0_40 = arith.constant 0 : index
    %124 = vector.load %arg4[%c0_39, %c0_40] : memref<128x384xbf16, #tpu.memory_space<vmem>>, vector<128x384xbf16>
    %cst_41 = arith.constant dense<0.000000e+00> : vector<8x384xf32>
    %125 = tpu.matmul %123, %124, %cst_41 {dimension_numbers = #tpu.dot_dimension_numbers<[1], [0], [0], [1], [0, 0, 1, 1], [], []>} : vector<8x128xbf16>, vector<128x384xbf16>, vector<8x384xf32> -> vector<8x384xf32>
    %126 = vector.extract_strided_slice %122 {offsets = [0, 0], sizes = [8, 128], strides = [1, 1]} : vector<8x384xbf16> to vector<8x128xbf16>
    %127 = vector.extract_strided_slice %125 {offsets = [0, 0], sizes = [8, 128], strides = [1, 1]} : vector<8x384xf32> to vector<8x128xf32>
    %128 = arith.extf %126 : vector<8x128xbf16> to vector<8x128xf32>
    %129 = arith.addf %128, %127 : vector<8x128xf32>
    %130 = arith.negf %129 : vector<8x128xf32>
    %131 = math.exp %130 : vector<8x128xf32>
    %cst_42 = arith.constant 1.000000e+00 : f32
    %132 = vector.broadcast %cst_42 : f32 to vector<8x128xf32>
    %133 = arith.addf %132, %131 : vector<8x128xf32>
    %134 = arith.divf %132, %133 : vector<8x128xf32>
    %135 = vector.extract_strided_slice %122 {offsets = [0, 128], sizes = [8, 128], strides = [1, 1]} : vector<8x384xbf16> to vector<8x128xbf16>
    %136 = vector.extract_strided_slice %125 {offsets = [0, 128], sizes = [8, 128], strides = [1, 1]} : vector<8x384xf32> to vector<8x128xf32>
    %137 = arith.extf %135 : vector<8x128xbf16> to vector<8x128xf32>
    %138 = arith.addf %137, %136 : vector<8x128xf32>
    %139 = arith.negf %138 : vector<8x128xf32>
    %140 = math.exp %139 : vector<8x128xf32>
    %cst_43 = arith.constant 1.000000e+00 : f32
    %141 = vector.broadcast %cst_43 : f32 to vector<8x128xf32>
    %142 = arith.addf %141, %140 : vector<8x128xf32>
    %143 = arith.divf %141, %142 : vector<8x128xf32>
    %144 = vector.extract_strided_slice %122 {offsets = [0, 256], sizes = [8, 128], strides = [1, 1]} : vector<8x384xbf16> to vector<8x128xbf16>
    %145 = vector.extract_strided_slice %125 {offsets = [0, 256], sizes = [8, 128], strides = [1, 1]} : vector<8x384xf32> to vector<8x128xf32>
    %146 = arith.addf %145, %5 : vector<8x128xf32>
    %147 = arith.mulf %134, %146 : vector<8x128xf32>
    %148 = arith.extf %144 : vector<8x128xbf16> to vector<8x128xf32>
    %149 = arith.addf %148, %147 : vector<8x128xf32>
    %150 = math.tanh %149 : vector<8x128xf32>
    %cst_44 = arith.constant 1.000000e+00 : f32
    %151 = vector.broadcast %cst_44 : f32 to vector<8x128xf32>
    %152 = arith.subf %151, %143 : vector<8x128xf32>
    %153 = arith.mulf %152, %150 : vector<8x128xf32>
    %154 = arith.mulf %143, %117 : vector<8x128xf32>
    %155 = arith.addf %153, %154 : vector<8x128xf32>
    %c3_45 = arith.constant 3 : index
    %c0_46 = arith.constant 0 : index
    %c0_47 = arith.constant 0 : index
    %156 = vector.load %arg8[%c3_45, %c0_46, %c0_47] : memref<8x8x128xf32, #tpu.memory_space<vmem>>, vector<1x8x128xf32>
    %157 = vector.shape_cast %156 : vector<1x8x128xf32> to vector<8x128xf32>
    %158 = vector.shape_cast %155 : vector<8x128xf32> to vector<1x8x128xf32>
    tpu.vector_store %arg8[%c3_45, %c0_46, %c0_47], %158 {strides = array<i32>} : memref<8x8x128xf32, #tpu.memory_space<vmem>>, vector<1x8x128xf32>,
    %c4 = arith.constant 4 : index
    %c0_48 = arith.constant 0 : index
    %c0_49 = arith.constant 0 : index
    %159 = vector.load %arg2[%c4, %c0_48, %c0_49] : memref<8x8x384xbf16, #tpu.memory_space<vmem>>, vector<1x8x384xbf16>
    %160 = vector.shape_cast %159 : vector<1x8x384xbf16> to vector<8x384xbf16>
    %161 = arith.truncf %155 : vector<8x128xf32> to vector<8x128xbf16>
    %c0_50 = arith.constant 0 : index
    %c0_51 = arith.constant 0 : index
    %162 = vector.load %arg4[%c0_50, %c0_51] : memref<128x384xbf16, #tpu.memory_space<vmem>>, vector<128x384xbf16>
    %cst_52 = arith.constant dense<0.000000e+00> : vector<8x384xf32>
    %163 = tpu.matmul %161, %162, %cst_52 {dimension_numbers = #tpu.dot_dimension_numbers<[1], [0], [0], [1], [0, 0, 1, 1], [], []>} : vector<8x128xbf16>, vector<128x384xbf16>, vector<8x384xf32> -> vector<8x384xf32>
    %164 = vector.extract_strided_slice %160 {offsets = [0, 0], sizes = [8, 128], strides = [1, 1]} : vector<8x384xbf16> to vector<8x128xbf16>
    %165 = vector.extract_strided_slice %163 {offsets = [0, 0], sizes = [8, 128], strides = [1, 1]} : vector<8x384xf32> to vector<8x128xf32>
    %166 = arith.extf %164 : vector<8x128xbf16> to vector<8x128xf32>
    %167 = arith.addf %166, %165 : vector<8x128xf32>
    %168 = arith.negf %167 : vector<8x128xf32>
    %169 = math.exp %168 : vector<8x128xf32>
    %cst_53 = arith.constant 1.000000e+00 : f32
    %170 = vector.broadcast %cst_53 : f32 to vector<8x128xf32>
    %171 = arith.addf %170, %169 : vector<8x128xf32>
    %172 = arith.divf %170, %171 : vector<8x128xf32>
    %173 = vector.extract_strided_slice %160 {offsets = [0, 128], sizes = [8, 128], strides = [1, 1]} : vector<8x384xbf16> to vector<8x128xbf16>
    %174 = vector.extract_strided_slice %163 {offsets = [0, 128], sizes = [8, 128], strides = [1, 1]} : vector<8x384xf32> to vector<8x128xf32>
    %175 = arith.extf %173 : vector<8x128xbf16> to vector<8x128xf32>
    %176 = arith.addf %175, %174 : vector<8x128xf32>
    %177 = arith.negf %176 : vector<8x128xf32>
    %178 = math.exp %177 : vector<8x128xf32>
    %cst_54 = arith.constant 1.000000e+00 : f32
    %179 = vector.broadcast %cst_54 : f32 to vector<8x128xf32>
    %180 = arith.addf %179, %178 : vector<8x128xf32>
    %181 = arith.divf %179, %180 : vector<8x128xf32>
    %182 = vector.extract_strided_slice %160 {offsets = [0, 256], sizes = [8, 128], strides = [1, 1]} : vector<8x384xbf16> to vector<8x128xbf16>
    %183 = vector.extract_strided_slice %163 {offsets = [0, 256], sizes = [8, 128], strides = [1, 1]} : vector<8x384xf32> to vector<8x128xf32>
    %184 = arith.addf %183, %5 : vector<8x128xf32>
    %185 = arith.mulf %172, %184 : vector<8x128xf32>
    %186 = arith.extf %182 : vector<8x128xbf16> to vector<8x128xf32>
    %187 = arith.addf %186, %185 : vector<8x128xf32>
    %188 = math.tanh %187 : vector<8x128xf32>
    %cst_55 = arith.constant 1.000000e+00 : f32
    %189 = vector.broadcast %cst_55 : f32 to vector<8x128xf32>
    %190 = arith.subf %189, %181 : vector<8x128xf32>
    %191 = arith.mulf %190, %188 : vector<8x128xf32>
    %192 = arith.mulf %181, %155 : vector<8x128xf32>
    %193 = arith.addf %191, %192 : vector<8x128xf32>
    %c4_56 = arith.constant 4 : index
    %c0_57 = arith.constant 0 : index
    %c0_58 = arith.constant 0 : index
    %194 = vector.load %arg8[%c4_56, %c0_57, %c0_58] : memref<8x8x128xf32, #tpu.memory_space<vmem>>, vector<1x8x128xf32>
    %195 = vector.shape_cast %194 : vector<1x8x128xf32> to vector<8x128xf32>
    %196 = vector.shape_cast %193 : vector<8x128xf32> to vector<1x8x128xf32>
    tpu.vector_store %arg8[%c4_56, %c0_57, %c0_58], %196 {strides = array<i32>} : memref<8x8x128xf32, #tpu.memory_space<vmem>>, vector<1x8x128xf32>,
    %c5 = arith.constant 5 : index
    %c0_59 = arith.constant 0 : index
    %c0_60 = arith.constant 0 : index
    %197 = vector.load %arg2[%c5, %c0_59, %c0_60] : memref<8x8x384xbf16, #tpu.memory_space<vmem>>, vector<1x8x384xbf16>
    %198 = vector.shape_cast %197 : vector<1x8x384xbf16> to vector<8x384xbf16>
    %199 = arith.truncf %193 : vector<8x128xf32> to vector<8x128xbf16>
    %c0_61 = arith.constant 0 : index
    %c0_62 = arith.constant 0 : index
    %200 = vector.load %arg4[%c0_61, %c0_62] : memref<128x384xbf16, #tpu.memory_space<vmem>>, vector<128x384xbf16>
    %cst_63 = arith.constant dense<0.000000e+00> : vector<8x384xf32>
    %201 = tpu.matmul %199, %200, %cst_63 {dimension_numbers = #tpu.dot_dimension_numbers<[1], [0], [0], [1], [0, 0, 1, 1], [], []>} : vector<8x128xbf16>, vector<128x384xbf16>, vector<8x384xf32> -> vector<8x384xf32>
    %202 = vector.extract_strided_slice %198 {offsets = [0, 0], sizes = [8, 128], strides = [1, 1]} : vector<8x384xbf16> to vector<8x128xbf16>
    %203 = vector.extract_strided_slice %201 {offsets = [0, 0], sizes = [8, 128], strides = [1, 1]} : vector<8x384xf32> to vector<8x128xf32>
    %204 = arith.extf %202 : vector<8x128xbf16> to vector<8x128xf32>
    %205 = arith.addf %204, %203 : vector<8x128xf32>
    %206 = arith.negf %205 : vector<8x128xf32>
    %207 = math.exp %206 : vector<8x128xf32>
    %cst_64 = arith.constant 1.000000e+00 : f32
    %208 = vector.broadcast %cst_64 : f32 to vector<8x128xf32>
    %209 = arith.addf %208, %207 : vector<8x128xf32>
    %210 = arith.divf %208, %209 : vector<8x128xf32>
    %211 = vector.extract_strided_slice %198 {offsets = [0, 128], sizes = [8, 128], strides = [1, 1]} : vector<8x384xbf16> to vector<8x128xbf16>
    %212 = vector.extract_strided_slice %201 {offsets = [0, 128], sizes = [8, 128], strides = [1, 1]} : vector<8x384xf32> to vector<8x128xf32>
    %213 = arith.extf %211 : vector<8x128xbf16> to vector<8x128xf32>
    %214 = arith.addf %213, %212 : vector<8x128xf32>
    %215 = arith.negf %214 : vector<8x128xf32>
    %216 = math.exp %215 : vector<8x128xf32>
    %cst_65 = arith.constant 1.000000e+00 : f32
    %217 = vector.broadcast %cst_65 : f32 to vector<8x128xf32>
    %218 = arith.addf %217, %216 : vector<8x128xf32>
    %219 = arith.divf %217, %218 : vector<8x128xf32>
    %220 = vector.extract_strided_slice %198 {offsets = [0, 256], sizes = [8, 128], strides = [1, 1]} : vector<8x384xbf16> to vector<8x128xbf16>
    %221 = vector.extract_strided_slice %201 {offsets = [0, 256], sizes = [8, 128], strides = [1, 1]} : vector<8x384xf32> to vector<8x128xf32>
    %222 = arith.addf %221, %5 : vector<8x128xf32>
    %223 = arith.mulf %210, %222 : vector<8x128xf32>
    %224 = arith.extf %220 : vector<8x128xbf16> to vector<8x128xf32>
    %225 = arith.addf %224, %223 : vector<8x128xf32>
    %226 = math.tanh %225 : vector<8x128xf32>
    %cst_66 = arith.constant 1.000000e+00 : f32
    %227 = vector.broadcast %cst_66 : f32 to vector<8x128xf32>
    %228 = arith.subf %227, %219 : vector<8x128xf32>
    %229 = arith.mulf %228, %226 : vector<8x128xf32>
    %230 = arith.mulf %219, %193 : vector<8x128xf32>
    %231 = arith.addf %229, %230 : vector<8x128xf32>
    %c5_67 = arith.constant 5 : index
    %c0_68 = arith.constant 0 : index
    %c0_69 = arith.constant 0 : index
    %232 = vector.load %arg8[%c5_67, %c0_68, %c0_69] : memref<8x8x128xf32, #tpu.memory_space<vmem>>, vector<1x8x128xf32>
    %233 = vector.shape_cast %232 : vector<1x8x128xf32> to vector<8x128xf32>
    %234 = vector.shape_cast %231 : vector<8x128xf32> to vector<1x8x128xf32>
    tpu.vector_store %arg8[%c5_67, %c0_68, %c0_69], %234 {strides = array<i32>} : memref<8x8x128xf32, #tpu.memory_space<vmem>>, vector<1x8x128xf32>,
    %c6 = arith.constant 6 : index
    %c0_70 = arith.constant 0 : index
    %c0_71 = arith.constant 0 : index
    %235 = vector.load %arg2[%c6, %c0_70, %c0_71] : memref<8x8x384xbf16, #tpu.memory_space<vmem>>, vector<1x8x384xbf16>
    %236 = vector.shape_cast %235 : vector<1x8x384xbf16> to vector<8x384xbf16>
    %237 = arith.truncf %231 : vector<8x128xf32> to vector<8x128xbf16>
    %c0_72 = arith.constant 0 : index
    %c0_73 = arith.constant 0 : index
    %238 = vector.load %arg4[%c0_72, %c0_73] : memref<128x384xbf16, #tpu.memory_space<vmem>>, vector<128x384xbf16>
    %cst_74 = arith.constant dense<0.000000e+00> : vector<8x384xf32>
    %239 = tpu.matmul %237, %238, %cst_74 {dimension_numbers = #tpu.dot_dimension_numbers<[1], [0], [0], [1], [0, 0, 1, 1], [], []>} : vector<8x128xbf16>, vector<128x384xbf16>, vector<8x384xf32> -> vector<8x384xf32>
    %240 = vector.extract_strided_slice %236 {offsets = [0, 0], sizes = [8, 128], strides = [1, 1]} : vector<8x384xbf16> to vector<8x128xbf16>
    %241 = vector.extract_strided_slice %239 {offsets = [0, 0], sizes = [8, 128], strides = [1, 1]} : vector<8x384xf32> to vector<8x128xf32>
    %242 = arith.extf %240 : vector<8x128xbf16> to vector<8x128xf32>
    %243 = arith.addf %242, %241 : vector<8x128xf32>
    %244 = arith.negf %243 : vector<8x128xf32>
    %245 = math.exp %244 : vector<8x128xf32>
    %cst_75 = arith.constant 1.000000e+00 : f32
    %246 = vector.broadcast %cst_75 : f32 to vector<8x128xf32>
    %247 = arith.addf %246, %245 : vector<8x128xf32>
    %248 = arith.divf %246, %247 : vector<8x128xf32>
    %249 = vector.extract_strided_slice %236 {offsets = [0, 128], sizes = [8, 128], strides = [1, 1]} : vector<8x384xbf16> to vector<8x128xbf16>
    %250 = vector.extract_strided_slice %239 {offsets = [0, 128], sizes = [8, 128], strides = [1, 1]} : vector<8x384xf32> to vector<8x128xf32>
    %251 = arith.extf %249 : vector<8x128xbf16> to vector<8x128xf32>
    %252 = arith.addf %251, %250 : vector<8x128xf32>
    %253 = arith.negf %252 : vector<8x128xf32>
    %254 = math.exp %253 : vector<8x128xf32>
    %cst_76 = arith.constant 1.000000e+00 : f32
    %255 = vector.broadcast %cst_76 : f32 to vector<8x128xf32>
    %256 = arith.addf %255, %254 : vector<8x128xf32>
    %257 = arith.divf %255, %256 : vector<8x128xf32>
    %258 = vector.extract_strided_slice %236 {offsets = [0, 256], sizes = [8, 128], strides = [1, 1]} : vector<8x384xbf16> to vector<8x128xbf16>
    %259 = vector.extract_strided_slice %239 {offsets = [0, 256], sizes = [8, 128], strides = [1, 1]} : vector<8x384xf32> to vector<8x128xf32>
    %260 = arith.addf %259, %5 : vector<8x128xf32>
    %261 = arith.mulf %248, %260 : vector<8x128xf32>
    %262 = arith.extf %258 : vector<8x128xbf16> to vector<8x128xf32>
    %263 = arith.addf %262, %261 : vector<8x128xf32>
    %264 = math.tanh %263 : vector<8x128xf32>
    %cst_77 = arith.constant 1.000000e+00 : f32
    %265 = vector.broadcast %cst_77 : f32 to vector<8x128xf32>
    %266 = arith.subf %265, %257 : vector<8x128xf32>
    %267 = arith.mulf %266, %264 : vector<8x128xf32>
    %268 = arith.mulf %257, %231 : vector<8x128xf32>
    %269 = arith.addf %267, %268 : vector<8x128xf32>
    %c6_78 = arith.constant 6 : index
    %c0_79 = arith.constant 0 : index
    %c0_80 = arith.constant 0 : index
    %270 = vector.load %arg8[%c6_78, %c0_79, %c0_80] : memref<8x8x128xf32, #tpu.memory_space<vmem>>, vector<1x8x128xf32>
    %271 = vector.shape_cast %270 : vector<1x8x128xf32> to vector<8x128xf32>
    %272 = vector.shape_cast %269 : vector<8x128xf32> to vector<1x8x128xf32>
    tpu.vector_store %arg8[%c6_78, %c0_79, %c0_80], %272 {strides = array<i32>} : memref<8x8x128xf32, #tpu.memory_space<vmem>>, vector<1x8x128xf32>,
    %c7 = arith.constant 7 : index
    %c0_81 = arith.constant 0 : index
    %c0_82 = arith.constant 0 : index
    %273 = vector.load %arg2[%c7, %c0_81, %c0_82] : memref<8x8x384xbf16, #tpu.memory_space<vmem>>, vector<1x8x384xbf16>
    %274 = vector.shape_cast %273 : vector<1x8x384xbf16> to vector<8x384xbf16>
    %275 = arith.truncf %269 : vector<8x128xf32> to vector<8x128xbf16>
    %c0_83 = arith.constant 0 : index
    %c0_84 = arith.constant 0 : index
    %276 = vector.load %arg4[%c0_83, %c0_84] : memref<128x384xbf16, #tpu.memory_space<vmem>>, vector<128x384xbf16>
    %cst_85 = arith.constant dense<0.000000e+00> : vector<8x384xf32>
    %277 = tpu.matmul %275, %276, %cst_85 {dimension_numbers = #tpu.dot_dimension_numbers<[1], [0], [0], [1], [0, 0, 1, 1], [], []>} : vector<8x128xbf16>, vector<128x384xbf16>, vector<8x384xf32> -> vector<8x384xf32>
    %278 = vector.extract_strided_slice %274 {offsets = [0, 0], sizes = [8, 128], strides = [1, 1]} : vector<8x384xbf16> to vector<8x128xbf16>
    %279 = vector.extract_strided_slice %277 {offsets = [0, 0], sizes = [8, 128], strides = [1, 1]} : vector<8x384xf32> to vector<8x128xf32>
    %280 = arith.extf %278 : vector<8x128xbf16> to vector<8x128xf32>
    %281 = arith.addf %280, %279 : vector<8x128xf32>
    %282 = arith.negf %281 : vector<8x128xf32>
    %283 = math.exp %282 : vector<8x128xf32>
    %cst_86 = arith.constant 1.000000e+00 : f32
    %284 = vector.broadcast %cst_86 : f32 to vector<8x128xf32>
    %285 = arith.addf %284, %283 : vector<8x128xf32>
    %286 = arith.divf %284, %285 : vector<8x128xf32>
    %287 = vector.extract_strided_slice %274 {offsets = [0, 128], sizes = [8, 128], strides = [1, 1]} : vector<8x384xbf16> to vector<8x128xbf16>
    %288 = vector.extract_strided_slice %277 {offsets = [0, 128], sizes = [8, 128], strides = [1, 1]} : vector<8x384xf32> to vector<8x128xf32>
    %289 = arith.extf %287 : vector<8x128xbf16> to vector<8x128xf32>
    %290 = arith.addf %289, %288 : vector<8x128xf32>
    %291 = arith.negf %290 : vector<8x128xf32>
    %292 = math.exp %291 : vector<8x128xf32>
    %cst_87 = arith.constant 1.000000e+00 : f32
    %293 = vector.broadcast %cst_87 : f32 to vector<8x128xf32>
    %294 = arith.addf %293, %292 : vector<8x128xf32>
    %295 = arith.divf %293, %294 : vector<8x128xf32>
    %296 = vector.extract_strided_slice %274 {offsets = [0, 256], sizes = [8, 128], strides = [1, 1]} : vector<8x384xbf16> to vector<8x128xbf16>
    %297 = vector.extract_strided_slice %277 {offsets = [0, 256], sizes = [8, 128], strides = [1, 1]} : vector<8x384xf32> to vector<8x128xf32>
    %298 = arith.addf %297, %5 : vector<8x128xf32>
    %299 = arith.mulf %286, %298 : vector<8x128xf32>
    %300 = arith.extf %296 : vector<8x128xbf16> to vector<8x128xf32>
    %301 = arith.addf %300, %299 : vector<8x128xf32>
    %302 = math.tanh %301 : vector<8x128xf32>
    %cst_88 = arith.constant 1.000000e+00 : f32
    %303 = vector.broadcast %cst_88 : f32 to vector<8x128xf32>
    %304 = arith.subf %303, %295 : vector<8x128xf32>
    %305 = arith.mulf %304, %302 : vector<8x128xf32>
    %306 = arith.mulf %295, %269 : vector<8x128xf32>
    %307 = arith.addf %305, %306 : vector<8x128xf32>
    %c7_89 = arith.constant 7 : index
    %c0_90 = arith.constant 0 : index
    %c0_91 = arith.constant 0 : index
    %308 = vector.load %arg8[%c7_89, %c0_90, %c0_91] : memref<8x8x128xf32, #tpu.memory_space<vmem>>, vector<1x8x128xf32>
    %309 = vector.shape_cast %308 : vector<1x8x128xf32> to vector<8x128xf32>
    %310 = vector.shape_cast %307 : vector<8x128xf32> to vector<1x8x128xf32>
    tpu.vector_store %arg8[%c7_89, %c0_90, %c0_91], %310 {strides = array<i32>} : memref<8x8x128xf32, #tpu.memory_space<vmem>>, vector<1x8x128xf32>,
    %c0_92 = arith.constant 0 : index
    %c0_93 = arith.constant 0 : index
    %311 = vector.load %arg7[%c0_92, %c0_93] : memref<8x128xf32, #tpu.memory_space<vmem>>, vector<8x128xf32>
    tpu.vector_store %arg7[%c0_92, %c0_93], %307 {strides = array<i32>} : memref<8x128xf32, #tpu.memory_space<vmem>>, vector<8x128xf32>,
    %c0_94 = arith.constant 0 : index
    %c0_95 = arith.constant 0 : index
    %c0_96 = arith.constant 0 : index
    %312 = vector.load %arg8[%c0_94, %c0_95, %c0_96] : memref<8x8x128xf32, #tpu.memory_space<vmem>>, vector<8x1x128xf32>
    %313 = vector.shape_cast %312 : vector<8x1x128xf32> to vector<8x128xf32>
    %314 = arith.truncf %313 : vector<8x128xf32> to vector<8x128xbf16>
    %c0_97 = arith.constant 0 : index
    %c0_98 = arith.constant 0 : index
    %c0_99 = arith.constant 0 : index
    %315 = vector.load %arg6[%c0_97, %c0_98, %c0_99] : memref<8x8x128xbf16, #tpu.memory_space<vmem>>, vector<1x8x128xbf16>
    %316 = vector.shape_cast %315 : vector<1x8x128xbf16> to vector<8x128xbf16>
    %317 = vector.shape_cast %314 : vector<8x128xbf16> to vector<1x8x128xbf16>
    tpu.vector_store %arg6[%c0_97, %c0_98, %c0_99], %317 {strides = array<i32>} : memref<8x8x128xbf16, #tpu.memory_space<vmem>>, vector<1x8x128xbf16>,
    %c0_100 = arith.constant 0 : index
    %c1_101 = arith.constant 1 : index
    %c0_102 = arith.constant 0 : index
    %318 = vector.load %arg8[%c0_100, %c1_101, %c0_102] : memref<8x8x128xf32, #tpu.memory_space<vmem>>, vector<8x1x128xf32>
    %319 = vector.shape_cast %318 : vector<8x1x128xf32> to vector<8x128xf32>
    %320 = arith.truncf %319 : vector<8x128xf32> to vector<8x128xbf16>
    %c1_103 = arith.constant 1 : index
    %c0_104 = arith.constant 0 : index
    %c0_105 = arith.constant 0 : index
    %321 = vector.load %arg6[%c1_103, %c0_104, %c0_105] : memref<8x8x128xbf16, #tpu.memory_space<vmem>>, vector<1x8x128xbf16>
    %322 = vector.shape_cast %321 : vector<1x8x128xbf16> to vector<8x128xbf16>
    %323 = vector.shape_cast %320 : vector<8x128xbf16> to vector<1x8x128xbf16>
    tpu.vector_store %arg6[%c1_103, %c0_104, %c0_105], %323 {strides = array<i32>} : memref<8x8x128xbf16, #tpu.memory_space<vmem>>, vector<1x8x128xbf16>,
    %c0_106 = arith.constant 0 : index
    %c2_107 = arith.constant 2 : index
    %c0_108 = arith.constant 0 : index
    %324 = vector.load %arg8[%c0_106, %c2_107, %c0_108] : memref<8x8x128xf32, #tpu.memory_space<vmem>>, vector<8x1x128xf32>
    %325 = vector.shape_cast %324 : vector<8x1x128xf32> to vector<8x128xf32>
    %326 = arith.truncf %325 : vector<8x128xf32> to vector<8x128xbf16>
    %c2_109 = arith.constant 2 : index
    %c0_110 = arith.constant 0 : index
    %c0_111 = arith.constant 0 : index
    %327 = vector.load %arg6[%c2_109, %c0_110, %c0_111] : memref<8x8x128xbf16, #tpu.memory_space<vmem>>, vector<1x8x128xbf16>
    %328 = vector.shape_cast %327 : vector<1x8x128xbf16> to vector<8x128xbf16>
    %329 = vector.shape_cast %326 : vector<8x128xbf16> to vector<1x8x128xbf16>
    tpu.vector_store %arg6[%c2_109, %c0_110, %c0_111], %329 {strides = array<i32>} : memref<8x8x128xbf16, #tpu.memory_space<vmem>>, vector<1x8x128xbf16>,
    %c0_112 = arith.constant 0 : index
    %c3_113 = arith.constant 3 : index
    %c0_114 = arith.constant 0 : index
    %330 = vector.load %arg8[%c0_112, %c3_113, %c0_114] : memref<8x8x128xf32, #tpu.memory_space<vmem>>, vector<8x1x128xf32>
    %331 = vector.shape_cast %330 : vector<8x1x128xf32> to vector<8x128xf32>
    %332 = arith.truncf %331 : vector<8x128xf32> to vector<8x128xbf16>
    %c3_115 = arith.constant 3 : index
    %c0_116 = arith.constant 0 : index
    %c0_117 = arith.constant 0 : index
    %333 = vector.load %arg6[%c3_115, %c0_116, %c0_117] : memref<8x8x128xbf16, #tpu.memory_space<vmem>>, vector<1x8x128xbf16>
    %334 = vector.shape_cast %333 : vector<1x8x128xbf16> to vector<8x128xbf16>
    %335 = vector.shape_cast %332 : vector<8x128xbf16> to vector<1x8x128xbf16>
    tpu.vector_store %arg6[%c3_115, %c0_116, %c0_117], %335 {strides = array<i32>} : memref<8x8x128xbf16, #tpu.memory_space<vmem>>, vector<1x8x128xbf16>,
    %c0_118 = arith.constant 0 : index
    %c4_119 = arith.constant 4 : index
    %c0_120 = arith.constant 0 : index
    %336 = vector.load %arg8[%c0_118, %c4_119, %c0_120] : memref<8x8x128xf32, #tpu.memory_space<vmem>>, vector<8x1x128xf32>
    %337 = vector.shape_cast %336 : vector<8x1x128xf32> to vector<8x128xf32>
    %338 = arith.truncf %337 : vector<8x128xf32> to vector<8x128xbf16>
    %c4_121 = arith.constant 4 : index
    %c0_122 = arith.constant 0 : index
    %c0_123 = arith.constant 0 : index
    %339 = vector.load %arg6[%c4_121, %c0_122, %c0_123] : memref<8x8x128xbf16, #tpu.memory_space<vmem>>, vector<1x8x128xbf16>
    %340 = vector.shape_cast %339 : vector<1x8x128xbf16> to vector<8x128xbf16>
    %341 = vector.shape_cast %338 : vector<8x128xbf16> to vector<1x8x128xbf16>
    tpu.vector_store %arg6[%c4_121, %c0_122, %c0_123], %341 {strides = array<i32>} : memref<8x8x128xbf16, #tpu.memory_space<vmem>>, vector<1x8x128xbf16>,
    %c0_124 = arith.constant 0 : index
    %c5_125 = arith.constant 5 : index
    %c0_126 = arith.constant 0 : index
    %342 = vector.load %arg8[%c0_124, %c5_125, %c0_126] : memref<8x8x128xf32, #tpu.memory_space<vmem>>, vector<8x1x128xf32>
    %343 = vector.shape_cast %342 : vector<8x1x128xf32> to vector<8x128xf32>
    %344 = arith.truncf %343 : vector<8x128xf32> to vector<8x128xbf16>
    %c5_127 = arith.constant 5 : index
    %c0_128 = arith.constant 0 : index
    %c0_129 = arith.constant 0 : index
    %345 = vector.load %arg6[%c5_127, %c0_128, %c0_129] : memref<8x8x128xbf16, #tpu.memory_space<vmem>>, vector<1x8x128xbf16>
    %346 = vector.shape_cast %345 : vector<1x8x128xbf16> to vector<8x128xbf16>
    %347 = vector.shape_cast %344 : vector<8x128xbf16> to vector<1x8x128xbf16>
    tpu.vector_store %arg6[%c5_127, %c0_128, %c0_129], %347 {strides = array<i32>} : memref<8x8x128xbf16, #tpu.memory_space<vmem>>, vector<1x8x128xbf16>,
    %c0_130 = arith.constant 0 : index
    %c6_131 = arith.constant 6 : index
    %c0_132 = arith.constant 0 : index
    %348 = vector.load %arg8[%c0_130, %c6_131, %c0_132] : memref<8x8x128xf32, #tpu.memory_space<vmem>>, vector<8x1x128xf32>
    %349 = vector.shape_cast %348 : vector<8x1x128xf32> to vector<8x128xf32>
    %350 = arith.truncf %349 : vector<8x128xf32> to vector<8x128xbf16>
    %c6_133 = arith.constant 6 : index
    %c0_134 = arith.constant 0 : index
    %c0_135 = arith.constant 0 : index
    %351 = vector.load %arg6[%c6_133, %c0_134, %c0_135] : memref<8x8x128xbf16, #tpu.memory_space<vmem>>, vector<1x8x128xbf16>
    %352 = vector.shape_cast %351 : vector<1x8x128xbf16> to vector<8x128xbf16>
    %353 = vector.shape_cast %350 : vector<8x128xbf16> to vector<1x8x128xbf16>
    tpu.vector_store %arg6[%c6_133, %c0_134, %c0_135], %353 {strides = array<i32>} : memref<8x8x128xbf16, #tpu.memory_space<vmem>>, vector<1x8x128xbf16>,
    %c0_136 = arith.constant 0 : index
    %c7_137 = arith.constant 7 : index
    %c0_138 = arith.constant 0 : index
    %354 = vector.load %arg8[%c0_136, %c7_137, %c0_138] : memref<8x8x128xf32, #tpu.memory_space<vmem>>, vector<8x1x128xf32>
    %355 = vector.shape_cast %354 : vector<8x1x128xf32> to vector<8x128xf32>
    %356 = arith.truncf %355 : vector<8x128xf32> to vector<8x128xbf16>
    %c7_139 = arith.constant 7 : index
    %c0_140 = arith.constant 0 : index
    %c0_141 = arith.constant 0 : index
    %357 = vector.load %arg6[%c7_139, %c0_140, %c0_141] : memref<8x8x128xbf16, #tpu.memory_space<vmem>>, vector<1x8x128xbf16>
    %358 = vector.shape_cast %357 : vector<1x8x128xbf16> to vector<8x128xbf16>
    %359 = vector.shape_cast %356 : vector<8x128xbf16> to vector<1x8x128xbf16>
    tpu.vector_store %arg6[%c7_139, %c0_140, %c0_141], %359 {strides = array<i32>} : memref<8x8x128xbf16, #tpu.memory_space<vmem>>, vector<1x8x128xbf16>,
    return
  }
  func.func @transform_0(%arg0: i32, %arg1: i32) -> (i32, i32, i32) {
    %c0_i32 = arith.constant 0 : i32
    %c0_i32_0 = arith.constant 0 : i32
    return %arg1, %arg0, %c0_i32 : i32, i32, i32
  }
  func.func @transform_1(%arg0: i32, %arg1: i32) -> (i32, i32) {
    %c0_i32 = arith.constant 0 : i32
    %c0_i32_0 = arith.constant 0 : i32
    return %arg0, %c0_i32 : i32, i32
  }
  func.func @transform_2(%arg0: i32, %arg1: i32) -> (i32, i32) {
    %c0_i32 = arith.constant 0 : i32
    %c0_i32_0 = arith.constant 0 : i32
    %c0_i32_1 = arith.constant 0 : i32
    return %c0_i32, %c0_i32_0 : i32, i32
  }
  func.func @transform_3(%arg0: i32, %arg1: i32) -> (i32, i32) {
    %c0_i32 = arith.constant 0 : i32
    %c0_i32_0 = arith.constant 0 : i32
    %c0_i32_1 = arith.constant 0 : i32
    return %c0_i32, %c0_i32_0 : i32, i32
  }
  func.func @transform_4(%arg0: i32, %arg1: i32) -> (i32, i32, i32) {
    %c0_i32 = arith.constant 0 : i32
    %c0_i32_0 = arith.constant 0 : i32
    return %arg0, %arg1, %c0_i32 : i32, i32, i32
  }
  func.func @transform_5(%arg0: i32, %arg1: i32) -> (i32, i32) {
    %c0_i32 = arith.constant 0 : i32
    %c0_i32_0 = arith.constant 0 : i32
    return %arg0, %c0_i32 : i32, i32
  }
}

</mosaic_0001>

<bundles_post_ra>
// kernel: _lambda_.5
= control target key start
LH: loop header
LB: loop body
LE: loop exit
PB: predicated region body
PF: predicated region fallthrough
CT: control target
= control target key end

     0   :  { %s455_s1 = inlined_call_operand.vmem [shape: bf16[128,128], index: 1, kind: input, shape index: {}]   ;;  %s456_s2 = inlined_call_operand.vmem [shape: f32[1,128], index: 2, kind: input, shape index: {}]   ;;  %s457_s0 = inlined_call_operand.vmem [shape: bf16[64,128], index: 0, kind: input, shape index: {}]   ;;  %s458_s3 = inlined_call_operand.vmem [shape: f32[64,128], index: 3, kind: output, shape index: {}]  }
   0x1   :  { %v294_v0 = vld [vmem:[%s455_s1 + $0x38] sm:$0xff]  ;;  %v293_v1 = vld [vmem:[%s455_s1 + $0x30] sm:$0xff]  ;;  %v292_v2 = vld [vmem:[%s455_s1 + $0x28] sm:$0xff] }
   0x2   :  { %114 = vmatpush.bf16.msra.mxu0 %v294_v0  ;;  %295 = vmatpush.bf16.msra.mxu1 %v294_v0  ;;  %v291_v3 = vld [vmem:[%s455_s1 + $0x20] sm:$0xff]  ;;  %v290_v4 = vld [vmem:[%s455_s1 + $0x18] sm:$0xff]  ;;  %v289_v5 = vld [vmem:[%s455_s1 + $0x10] sm:$0xff] }
   0x3   :  { %296 = vmatpush.bf16.msra.mxu2 %v294_v0  ;;  %297 = vmatpush.bf16.msra.mxu3 %v294_v0  ;;  %v288_v6 = vld [vmem:[%s455_s1 + $0x8] sm:$0xff]  ;;  %v287_v7 = vld [vmem:[%s455_s1] sm:$0xff]  ;;  %v285_v10 = vld [vmem:[%s457_s0 + $0x10] sm:$0xff] }
   0x4   :  { %v283_v8 = vld [vmem:[%s457_s0] sm:$0xff]  ;;  %v284_v9 = vld [vmem:[%s457_s0 + $0x8] sm:$0xff]  ;;  %v286_v11 = vld [vmem:[%s457_s0 + $0x18] sm:$0xff] }
   0x5   :  { %v319_v12 = vld [vmem:[%s456_s2] ss:$0 sm:$0xff] }
   0x6   :  { %115 = vmatpush.bf16.msra.mxu0 %v293_v1  ;;  %298 = vmatpush.bf16.msra.mxu1 %v293_v1 }
   0x7   :  { %299 = vmatpush.bf16.msra.mxu2 %v293_v1  ;;  %300 = vmatpush.bf16.msra.mxu3 %v293_v1 }
   0xa   :  { %116 = vmatpush.bf16.msra.mxu0 %v292_v2  ;;  %301 = vmatpush.bf16.msra.mxu1 %v292_v2 }
   0xb   :  { %302 = vmatpush.bf16.msra.mxu2 %v292_v2  ;;  %303 = vmatpush.bf16.msra.mxu3 %v292_v2 }
   0xe   :  { %117 = vmatpush.bf16.msra.mxu0 %v291_v3  ;;  %304 = vmatpush.bf16.msra.mxu1 %v291_v3 }
   0xf   :  { %305 = vmatpush.bf16.msra.mxu2 %v291_v3  ;;  %306 = vmatpush.bf16.msra.mxu3 %v291_v3 }
  0x12   :  { %118 = vmatpush.bf16.msra.mxu0 %v290_v4  ;;  %307 = vmatpush.bf16.msra.mxu1 %v290_v4 }
  0x13   :  { %308 = vmatpush.bf16.msra.mxu2 %v290_v4  ;;  %309 = vmatpush.bf16.msra.mxu3 %v290_v4 }
  0x16   :  { %119 = vmatpush.bf16.msra.mxu0 %v289_v5  ;;  %310 = vmatpush.bf16.msra.mxu1 %v289_v5 }
  0x17   :  { %311 = vmatpush.bf16.msra.mxu2 %v289_v5  ;;  %312 = vmatpush.bf16.msra.mxu3 %v289_v5 }
  0x1a   :  { %120 = vmatpush.bf16.msra.mxu0 %v288_v6  ;;  %313 = vmatpush.bf16.msra.mxu1 %v288_v6 }
  0x1b   :  { %314 = vmatpush.bf16.msra.mxu2 %v288_v6  ;;  %315 = vmatpush.bf16.msra.mxu3 %v288_v6 }
  0x1e   :  { %121 = vmatpush.bf16.msra.mxu0 %v287_v7  ;;  %316 = vmatpush.bf16.msra.mxu1 %v287_v7 }
  0x1f   :  { %317 = vmatpush.bf16.msra.mxu2 %v287_v7  ;;  %318 = vmatpush.bf16.msra.mxu3 %v287_v7 }
  0x21   :  { %122 = vmatmul.bf16.vlgmr.msra.gmra.mxu0 %v283_v8  ;;  %127 = vmatmul.bf16.vlgmr.msra.gmra.mxu1 %v284_v9 }
  0x22   :  { %132 = vmatmul.bf16.vlgmr.msra.gmra.mxu2 %v285_v10  ;;  %137 = vmatmul.bf16.vlgmr.msra.gmra.mxu3 %v286_v11 }
  0x9e   :  { %v123_v13 = vpop.f32.mrf.mxu0  ;;  %v128_v14 = vpop.f32.mrf.mxu1 }
  0x9f   :  { %v124_v15 = vadd.f32 %v319_v12, %v123_v13  ;;  %v129_v16 = vadd.f32 %v319_v12, %v128_v14 }
  0xa1   :  { %147 = vmax.xlane.f32.xlu1 %v129_v16  ;;  %143 = vmax.xlane.f32.xlu0 %v124_v15 }
  0xa5   :  { %v133_v17 = vpop.f32.mrf.mxu2  ;;  %v138_v18 = vpop.f32.mrf.mxu3 }
  0xa6   :  { %v134_v19 = vadd.f32 %v319_v12, %v133_v17  ;;  %v125_v20 = vpop.f32.mrf.mxu0  ;;  %v130_v21 = vpop.f32.mrf.mxu1  ;;  %v139_v27 = vadd.f32 %v319_v12, %v138_v18 }
  0xa7   :  { %v126_v22 = vadd.f32 %v319_v12, %v125_v20  ;;  %v131_v23 = vadd.f32 %v319_v12, %v130_v21 }
  0xa8   :  { %151 = vmax.xlane.f32.xlu2 %v134_v19 }
  0xa9   :  { %149 = vmax.xlane.f32.xlu1 %v131_v23  ;;  %145 = vmax.xlane.f32.xlu0 %v126_v22 }
  0xad   :  { %v135_v24 = vpop.f32.mrf.mxu2  ;;  %v140_v25 = vpop.f32.mrf.mxu3 }
  0xae   :  { %v136_v26 = vadd.f32 %v319_v12, %v135_v24  ;;  %v141_v28 = vadd.f32 %v319_v12, %v140_v25 }
  0xb0   :  { %153 = vmax.xlane.f32.xlu2 %v136_v26 }
  0xb1   :  { %157 = vmax.xlane.f32.xlu1 %v141_v28  ;;  %155 = vmax.xlane.f32.xlu0 %v139_v27 }
 0x114   :  { %v148_v29 = vpop.xlane.xlu1 %147  ;;  %v144_v30 = vpop.xlane.xlu0 %143 }
 0x115   :  { %v161_v31 = vsub.f32 %v129_v16, %v148_v29  ;;  %v159_v32 = vsub.f32 %v124_v15, %v144_v30 }
 0x117   :  { %v171_v33 = vmul.f32 1.442695, %v161_v31  ;;  %v167_v34 = vmul.f32 1.442695, %v159_v32 }
 0x119   :  { %320 = vpow2.f32 %v171_v33 }
 0x11a   :  { %322 = vpow2.f32 %v167_v34 }
 0x11b   :  { %v152_v35 = vpop.xlane.xlu2 %151 }
 0x11c   :  { %v411_v36 = vsub.f32 %v134_v19, %v152_v35  ;;  %v150_v37 = vpop.xlane.xlu1 %149  ;;  %v146_v38 = vpop.xlane.xlu0 %145 }
 0x11d   :  { %v413_v39 = vsub.f32 %v131_v23, %v150_v37  ;;  %v417_v43 = vsub.f32 %v126_v22, %v146_v38 }
 0x11e   :  { %v175_v40 = vmul.f32 1.442695, %v411_v36 }
 0x11f   :  { %v321_v41 = vpop.eup %320  ;;  %v173_v42 = vmul.f32 1.442695, %v413_v39  ;;  %v169_v45 = vmul.f32 1.442695, %v417_v43 }
 0x120   :  { %v323_v44 = vpop.eup %322  ;;  %324 = vpow2.f32 %v175_v40  ;;  %187 = vadd.xlane.f32.xlu1 %v321_v41 }
 0x121   :  { %326 = vpow2.f32 %v173_v42  ;;  %183 = vadd.xlane.f32.xlu2 %v323_v44 }
 0x122   :  { %328 = vpow2.f32 %v169_v45 }
 0x123   :  { %v154_v46 = vpop.xlane.xlu2 %153 }
 0x124   :  { %v420_v47 = vsub.f32 %v136_v26, %v154_v46  ;;  %v156_v48 = vpop.xlane.xlu0 %155  ;;  %v158_v49 = vpop.xlane.xlu1 %157 }
 0x125   :  { %v422_v50 = vsub.f32 %v139_v27, %v156_v48  ;;  %v166_v55 = vsub.f32 %v141_v28, %v158_v49 }
 0x126   :  { %v325_v51 = vpop.eup %324  ;;  %v177_v52 = vmul.f32 1.442695, %v420_v47 }
 0x127   :  { %v327_v53 = vpop.eup %326  ;;  %v179_v54 = vmul.f32 1.442695, %v422_v50  ;;  %191 = vadd.xlane.f32.xlu0 %v325_v51  ;;  %v181_v56 = vmul.f32 1.442695, %v166_v55 }
 0x128   :  { %330 = vpow2.f32 %v177_v52  ;;  %v329_v57 = vpop.eup %328 }
 0x129   :  { %189 = vadd.xlane.f32.xlu2 %v327_v53  ;;  %332 = vpow2.f32 %v179_v54 }
 0x12a   :  { %334 = vpow2.f32 %v181_v56 }
 0x12e   :  { %v331_v58 = vpop.eup %330 }
 0x12f   :  { %193 = vadd.xlane.f32.xlu1 %v331_v58  ;;  %185 = vadd.xlane.f32.xlu0 %v329_v57  ;;  %v333_v59 = vpop.eup %332 }
 0x130   :  { %v335_v60 = vpop.eup %334 }
 0x131   :  { %195 = vadd.xlane.f32.xlu2 %v333_v59 }
 0x137   :  { %197 = vadd.xlane.f32.xlu0 %v335_v60 }
 0x193   :  { %v188_v61 = vpop.xlane.xlu1 %187 }
 0x194   :  { %336 = vlog2.f32 %v188_v61  ;;  %v184_v62 = vpop.xlane.xlu2 %183 }
 0x195   :  { %338 = vlog2.f32 %v184_v62 }
 0x19a   :  { %v337_v63 = vpop.eup %336  ;;  %v192_v0 = vpop.xlane.xlu0 %191 }
 0x19b   :  { %v339_v1 = vpop.eup %338  ;;  %v204_v2 = vmul.f32 0.6931472, %v337_v63  ;;  %340 = vlog2.f32 %v192_v0 }
 0x19c   :  { %v200_v3 = vmul.f32 0.6931472, %v339_v1  ;;  %v190_v4 = vpop.xlane.xlu2 %189 }
 0x19d   :  { %v217_v5 = vsub.f32 %v161_v31, %v204_v2  ;;  %342 = vlog2.f32 %v190_v4 }
 0x19e   :  { %v215_v6 = vsub.f32 %v159_v32, %v200_v3 }
 0x19f   :  { %225 = vst [vmem:[%s458_s3 + $0x10] sm:$0xff] %v217_v5 }
 0x1a0   :  { %223 = vst [vmem:[%s458_s3] sm:$0xff] %v215_v6 }
 0x1a1   :  { %v341_v7 = vpop.eup %340 }
 0x1a2   :  { %v208_v8 = vmul.f32 0.6931472, %v341_v7  ;;  %v194_v9 = vpop.xlane.xlu1 %193  ;;  %v186_v10 = vpop.xlane.xlu0 %185 }
 0x1a3   :  { %v343_v11 = vpop.eup %342  ;;  %344 = vlog2.f32 %v194_v9 }
 0x1a4   :  { %v219_v12 = vsub.f32 %v411_v36, %v208_v8  ;;  %v206_v13 = vmul.f32 0.6931472, %v343_v11  ;;  %346 = vlog2.f32 %v186_v10  ;;  %v196_v14 = vpop.xlane.xlu2 %195 }
 0x1a5   :  { %348 = vlog2.f32 %v196_v14 }
 0x1a6   :  { %227 = vst [vmem:[%s458_s3 + $0x20] sm:$0xff] %v219_v12  ;;  %v218_v15 = vsub.f32 %v413_v39, %v206_v13 }
 0x1a8   :  { %226 = vst [vmem:[%s458_s3 + $0x18] sm:$0xff] %v218_v15 }
 0x1a9   :  { %v345_v16 = vpop.eup %344 }
 0x1aa   :  { %v347_v17 = vpop.eup %346  ;;  %v210_v18 = vmul.f32 0.6931472, %v345_v16  ;;  %v198_v19 = vpop.xlane.xlu0 %197 }
 0x1ab   :  { %v349_v20 = vpop.eup %348  ;;  %v202_v21 = vmul.f32 0.6931472, %v347_v17  ;;  %350 = vlog2.f32 %v198_v19 }
 0x1ac   :  { %v220_v22 = vsub.f32 %v420_v47, %v210_v18  ;;  %v212_v23 = vmul.f32 0.6931472, %v349_v20 }
 0x1ad   :  { %v216_v24 = vsub.f32 %v417_v43, %v202_v21 }
 0x1ae   :  { %228 = vst [vmem:[%s458_s3 + $0x28] sm:$0xff] %v220_v22  ;;  %v221_v25 = vsub.f32 %v422_v50, %v212_v23 }
 0x1af   :  { %224 = vst [vmem:[%s458_s3 + $0x8] sm:$0xff] %v216_v24 }
 0x1b0   :  { %229 = vst [vmem:[%s458_s3 + $0x30] sm:$0xff] %v221_v25 }
 0x1b1   :  { %v351_v26 = vpop.eup %350 }
 0x1b2   :  { %v214_v27 = vmul.f32 0.6931472, %v351_v26 }
 0x1b4   :  { %v222_v28 = vsub.f32 %v166_v55, %v214_v27 }
 0x1b6   :  { %230 = vst [vmem:[%s458_s3 + $0x38] sm:$0xff] %v222_v28 }

// kernel: _lambda_.3
= control target key start
LH: loop header
LB: loop body
LE: loop exit
PB: predicated region body
PF: predicated region fallthrough
CT: control target
= control target key end

     0   :  { %vm71_vm0 = vcmask 130048   ;;  %s400_s1 = inlined_call_operand.vmem [shape: bf16[16,384], index: 1, kind: input, shape index: {}]   ;;  %s401_s0 = inlined_call_operand.vmem [shape: bf16[64,16], index: 0, kind: input, shape index: {}]   ;;  %s402_s2 = inlined_call_operand.vmem [shape: f32[1,384], index: 2, kind: input, shape index: {}]   ;;  %s403_s3 = inlined_call_operand.vmem [shape: bf16[64,384], index: 3, kind: output, shape index: {}]  }
   0x1   :  { %v225_v0 = vld [vmem:[%s400_s1] sm:$0xf]  ;;  %v252_v1 = vld [vmem:[%s400_s1 + $0x8] sm:$0xf0]  ;;  %v251_v2 = vld [vmem:[%s400_s1 + $0x4] sm:$0xf] }
   0x2   :  { %v226_v3 = vor.u32 %v252_v1, %v225_v0  ;;  %v227_v4 = vld [vmem:[%s400_s1 + $0xc] sm:$0xf0]  ;;  %v233_v5 = vld [vmem:[%s400_s1 + $0x8] sm:$0xf]  ;;  %v253_v6 = vld [vmem:[%s400_s1 + $0x10] sm:$0xf0] }
   0x3   :  { %v230_v7 = vor.u32 %v251_v2, %v227_v4  ;;  %v234_v8 = vor.u32 %v253_v6, %v233_v5  ;;  %v247_v9 = vld [vmem:[%s401_s0] sm:$0xff]  ;;  %v248_v10 = vld [vmem:[%s401_s0 + $0x8] sm:$0xff]  ;;  %v249_v11 = vld [vmem:[%s401_s0 + $0x10] sm:$0xff] }
   0x4   :  { %91 = vmatpush.bf16.msra.mxu0 %v226_v3  ;;  %254 = vmatpush.bf16.msra.mxu3 %v226_v3  ;;  %v250_v12 = vld [vmem:[%s401_s0 + $0x18] sm:$0xff]  ;;  %v27_v13 = vld [vmem:[%s402_s2] sm:$0x7] }
   0x5   :  { %255 = vmatpush.bf16.msra.mxu1 %v230_v7  ;;  %256 = vmatpush.bf16.msra.mxu2 %v234_v8  ;;  %v322_v15 = vperm.slane %v27_v13, 1  ;;  %v324_v17 = vperm.slane %v27_v13, 0  ;;  %v326_v18 = vperm.slane %v27_v13, 2 }
   0x7   :  { %235 = vmatmul.msk.bf16.vlgmr.msra.gmra.mxu0 %vm71_vm0, %v247_v9  ;;  %236 = vmatmul.msk.bf16.vlgmr.msra.gmra.mxu3 %vm71_vm0, %v248_v10 }
   0x8   :  { %120 = vmatpush.bf16.msrb.mxu0 %v230_v7  ;;  %240 = vmatmul.msk.bf16.vlgmr.msra.gmra.mxu1 %vm71_vm0, %v248_v10 }
   0x9   :  { %244 = vmatmul.msk.bf16.vlgmr.msra.gmra.mxu2 %vm71_vm0, %v248_v10 }
   0xc   :  { %149 = vmatpush.bf16.msra.mxu0 %v234_v8 }
  0x17   :  { %237 = vmatmul.msk.bf16.gmra.mxu3 %vm71_vm0, %v249_v11  ;;  %239 = vmatmul.msk.bf16.vlgmr.msrb.gmra.mxu0 %vm71_vm0, %v247_v9 }
  0x18   :  { %241 = vmatmul.msk.bf16.gmra.mxu1 %vm71_vm0, %v249_v11 }
  0x19   :  { %245 = vmatmul.msk.bf16.gmra.mxu2 %vm71_vm0, %v249_v11 }
  0x27   :  { %238 = vmatmul.msk.bf16.gmra.mxu3 %vm71_vm0, %v250_v12  ;;  %243 = vmatmul.msk.bf16.vlgmr.msra.gmra.mxu0 %vm71_vm0, %v247_v9 }
  0x28   :  { %242 = vmatmul.msk.bf16.gmra.mxu1 %vm71_vm0, %v250_v12 }
  0x29   :  { %246 = vmatmul.msk.bf16.gmra.mxu2 %vm71_vm0, %v250_v12 }
  0x84   :  { %v93_v14 = vpop.f32.mrf.mxu0 }
  0x85   :  { %v127_v16 = vpop.f32.mrf.mxu1  ;;  %v94_v34 = vadd.f32 %v93_v14, %v324_v17 }
  0x86   :  { %v128_v19 = vadd.f32 %v127_v16, %v322_v15 }
  0x8a   :  { %v98_v20 = vpop.f32.mrf.mxu3 }
  0x8b   :  { %v99_v21 = vadd.f32 %v98_v20, %v324_v17 }
  0x8c   :  { %v156_v22 = vpop.f32.mrf.mxu2  ;;  %v95_v24 = vpop.f32.mrf.mxu0 }
  0x8d   :  { %v157_v23 = vadd.f32 %v156_v22, %v326_v18  ;;  %v175_v25 = vpack.c.bf16 %v128_v19, %v99_v21  ;;  %v129_v26 = vpop.f32.mrf.mxu1  ;;  %v96_v46 = vadd.f32 %v95_v24, %v324_v17 }
  0x8e   :  { %v130_v29 = vadd.f32 %v129_v26, %v322_v15 }
  0x8f   :  { %v176_v27 = vpack.c.bf16 %v157_v23, %v157_v23  ;;  %191 = vst [vmem:[%s403_s3 + $0x18] sm:$0xff] %v175_v25 }
  0x91   :  { %192 = vst [vmem:[%s403_s3 + $0x20] sm:$0xf] %v176_v27 }
  0x92   :  { %v100_v28 = vpop.f32.mrf.mxu3 }
  0x93   :  { %v101_v30 = vadd.f32 %v100_v28, %v324_v17 }
  0x94   :  { %v158_v31 = vpop.f32.mrf.mxu2  ;;  %v122_v33 = vpop.f32.mrf.mxu0 }
  0x95   :  { %v159_v32 = vadd.f32 %v158_v31, %v326_v18  ;;  %v177_v35 = vpack.c.bf16 %v130_v29, %v101_v30  ;;  %v123_v36 = vadd.f32 %v122_v33, %v322_v15  ;;  %v132_v37 = vpop.f32.mrf.mxu1 }
  0x96   :  { %v133_v40 = vadd.f32 %v132_v37, %v322_v15 }
  0x97   :  { %v178_v38 = vpack.c.bf16 %v159_v32, %v159_v32  ;;  %193 = vst [vmem:[%s403_s3 + $0x24] sm:$0xff] %v177_v35  ;;  %v171_v39 = vpack.c.bf16 %v123_v36, %v94_v34 }
  0x99   :  { %194 = vst [vmem:[%s403_s3 + $0x2c] sm:$0xf] %v178_v38 }
  0x9a   :  { %187 = vst [vmem:[%s403_s3] sm:$0xff] %v171_v39  ;;  %v103_v41 = vpop.f32.mrf.mxu3 }
  0x9b   :  { %v104_v42 = vadd.f32 %v103_v41, %v324_v17 }
  0x9c   :  { %v161_v43 = vpop.f32.mrf.mxu2  ;;  %v124_v45 = vpop.f32.mrf.mxu0 }
  0x9d   :  { %v162_v44 = vadd.f32 %v161_v43, %v326_v18  ;;  %v179_v47 = vpack.c.bf16 %v133_v40, %v104_v42  ;;  %v125_v48 = vadd.f32 %v124_v45, %v322_v15  ;;  %v134_v49 = vpop.f32.mrf.mxu1 }
  0x9e   :  { %v135_v53 = vadd.f32 %v134_v49, %v322_v15 }
  0x9f   :  { %v180_v50 = vpack.c.bf16 %v162_v44, %v162_v44  ;;  %195 = vst [vmem:[%s403_s3 + $0x30] sm:$0xff] %v179_v47  ;;  %v173_v51 = vpack.c.bf16 %v125_v48, %v96_v46 }
  0xa1   :  { %196 = vst [vmem:[%s403_s3 + $0x38] sm:$0xf] %v180_v50 }
  0xa2   :  { %189 = vst [vmem:[%s403_s3 + $0xc] sm:$0xff] %v173_v51  ;;  %v105_v52 = vpop.f32.mrf.mxu3 }
  0xa3   :  { %v106_v54 = vadd.f32 %v105_v52, %v324_v17 }
  0xa4   :  { %v163_v55 = vpop.f32.mrf.mxu2  ;;  %v151_v57 = vpop.f32.mrf.mxu0 }
  0xa5   :  { %v164_v56 = vadd.f32 %v163_v55, %v326_v18  ;;  %v181_v58 = vpack.c.bf16 %v135_v53, %v106_v54  ;;  %v152_v59 = vadd.f32 %v151_v57, %v326_v18  ;;  %v137_v61 = vpop.f32.mrf.mxu1 }
  0xa6   :  { %v138_v63 = vadd.f32 %v137_v61, %v322_v15 }
  0xa7   :  { %v182_v60 = vpack.c.bf16 %v164_v56, %v164_v56  ;;  %197 = vst [vmem:[%s403_s3 + $0x3c] sm:$0xff] %v181_v58  ;;  %v172_v62 = vpack.c.bf16 %v152_v59, %v152_v59 }
  0xa9   :  { %198 = vst [vmem:[%s403_s3 + $0x44] sm:$0xf] %v182_v60 }
  0xaa   :  { %188 = vst [vmem:[%s403_s3 + $0x8] sm:$0xf] %v172_v62  ;;  %v108_v0 = vpop.f32.mrf.mxu3 }
  0xab   :  { %v109_v1 = vadd.f32 %v108_v0, %v324_v17 }
  0xac   :  { %v166_v2 = vpop.f32.mrf.mxu2  ;;  %v153_v4 = vpop.f32.mrf.mxu0 }
  0xad   :  { %v167_v3 = vadd.f32 %v166_v2, %v326_v18  ;;  %v183_v5 = vpack.c.bf16 %v138_v63, %v109_v1  ;;  %v154_v6 = vadd.f32 %v153_v4, %v326_v18  ;;  %v139_v9 = vpop.f32.mrf.mxu1 }
  0xae   :  { %v140_v11 = vadd.f32 %v139_v9, %v322_v15 }
  0xaf   :  { %v184_v7 = vpack.c.bf16 %v167_v3, %v167_v3  ;;  %199 = vst [vmem:[%s403_s3 + $0x48] sm:$0xff] %v183_v5  ;;  %v174_v8 = vpack.c.bf16 %v154_v6, %v154_v6 }
  0xb1   :  { %200 = vst [vmem:[%s403_s3 + $0x50] sm:$0xf] %v184_v7 }
  0xb2   :  { %190 = vst [vmem:[%s403_s3 + $0x14] sm:$0xf] %v174_v8  ;;  %v110_v10 = vpop.f32.mrf.mxu3 }
  0xb3   :  { %v111_v12 = vadd.f32 %v110_v10, %v324_v17 }
  0xb4   :  { %v168_v13 = vpop.f32.mrf.mxu2 }
  0xb5   :  { %v169_v14 = vadd.f32 %v168_v13, %v326_v18  ;;  %v185_v16 = vpack.c.bf16 %v140_v11, %v111_v12 }
  0xb7   :  { %v186_v19 = vpack.c.bf16 %v169_v14, %v169_v14  ;;  %201 = vst [vmem:[%s403_s3 + $0x54] sm:$0xff] %v185_v16 }
  0xb9   :  { %202 = vst [vmem:[%s403_s3 + $0x5c] sm:$0xf] %v186_v19 }

// kernel: _lambda_.4
= control target key start
LH: loop header
LB: loop body
LE: loop exit
PB: predicated region body
PF: predicated region fallthrough
CT: control target
= control target key end

     0   :  { %s5122_s2 = inlined_call_operand.vmem [shape: bf16[128,384], index: 2, kind: input, shape index: {}]   ;;  %s5123_s1 = inlined_call_operand.vmem [shape: f32[8,128], index: 1, kind: input, shape index: {}]   ;;  %s5124_s3 = inlined_call_operand.vmem [shape: f32[1,128], index: 3, kind: input, shape index: {}]   ;;  %s5125_s0 = inlined_call_operand.vmem [shape: bf16[8,8,384], index: 0, kind: input, shape index: {}]   ;;  %s5126_s5 = inlined_call_operand.vmem [shape: f32[8,128], index: 5, kind: output, shape index: {1}]   ;;  %s5127_s4 = inlined_call_operand.vmem [shape: bf16[8,8,128], index: 4, kind: output, shape index: {0}]  }
   0x1   :  { %v2601_v0 = vld [vmem:[%s5122_s2 + $0xa8] sm:$0xf]  ;;  %v3342_v1 = vld [vmem:[%s5122_s2 + $0xb0] sm:$0xf0]  ;;  %v3341_v2 = vld [vmem:[%s5122_s2 + $0xac] sm:$0xf] }
   0x2   :  { %v2602_v3 = vor.u32 %v3342_v1, %v2601_v0  ;;  %v2603_v4 = vld [vmem:[%s5122_s2 + $0xb4] sm:$0xf0]  ;;  %v2589_v5 = vld [vmem:[%s5122_s2 + $0x90] sm:$0xf]  ;;  %v3339_v6 = vld [vmem:[%s5122_s2 + $0x98] sm:$0xf0] }
   0x3   :  { %v2606_v7 = vor.u32 %v3341_v2, %v2603_v4  ;;  %v3338_v8 = vld [vmem:[%s5122_s2 + $0x94] sm:$0xf]  ;;  %v2591_v9 = vld [vmem:[%s5122_s2 + $0x9c] sm:$0xf0]  ;;  %v2590_v10 = vor.u32 %v3339_v6, %v2589_v5  ;;  %v2577_v12 = vld [vmem:[%s5122_s2 + $0x78] sm:$0xf] }
   0x4   :  { %193 = vmatpush.bf16.msra.mxu0 %v2602_v3  ;;  %v2594_v11 = vor.u32 %v3338_v8, %v2591_v9  ;;  %v3336_v13 = vld [vmem:[%s5122_s2 + $0x80] sm:$0xf0]  ;;  %v3335_v14 = vld [vmem:[%s5122_s2 + $0x7c] sm:$0xf]  ;;  %v2579_v15 = vld [vmem:[%s5122_s2 + $0x84] sm:$0xf0] }
   0x5   :  { %206 = vmatpush.bf16.msra.mxu1 %v2606_v7  ;;  %v2609_v16 = vld [vmem:[%s5122_s2 + $0xb0] sm:$0xf]  ;;  %v3343_v17 = vld [vmem:[%s5122_s2 + $0xb8] sm:$0xf0]  ;;  %v2578_v19 = vor.u32 %v3336_v13, %v2577_v12  ;;  %v2597_v20 = vld [vmem:[%s5122_s2 + $0x98] sm:$0xf]  ;;  %v2582_v22 = vor.u32 %v3335_v14, %v2579_v15 }
   0x6   :  { %v2610_v18 = vor.u32 %v3343_v17, %v2609_v16  ;;  %v3340_v21 = vld [vmem:[%s5122_s2 + $0xa0] sm:$0xf0]  ;;  %v2565_v23 = vld [vmem:[%s5122_s2 + $0x60] sm:$0xf]  ;;  %v3333_v24 = vld [vmem:[%s5122_s2 + $0x68] sm:$0xf0] }
   0x7   :  { %v3332_v25 = vld [vmem:[%s5122_s2 + $0x64] sm:$0xf]  ;;  %v2598_v26 = vor.u32 %v3340_v21, %v2597_v20  ;;  %v2567_v27 = vld [vmem:[%s5122_s2 + $0x6c] sm:$0xf0]  ;;  %v2585_v28 = vld [vmem:[%s5122_s2 + $0x80] sm:$0xf]  ;;  %v2566_v30 = vor.u32 %v3333_v24, %v2565_v23 }
   0x8   :  { %194 = vmatpush.bf16.msra.mxu0 %v2590_v10  ;;  %219 = vmatpush.bf16.msra.mxu2 %v2610_v18  ;;  %v3337_v29 = vld [vmem:[%s5122_s2 + $0x88] sm:$0xf0]  ;;  %v2570_v31 = vor.u32 %v3332_v25, %v2567_v27  ;;  %v2553_v32 = vld [vmem:[%s5122_s2 + $0x48] sm:$0xf]  ;;  %v3330_v33 = vld [vmem:[%s5122_s2 + $0x50] sm:$0xf0] }
   0x9   :  { %207 = vmatpush.bf16.msra.mxu1 %v2594_v11  ;;  %v3329_v34 = vld [vmem:[%s5122_s2 + $0x4c] sm:$0xf]  ;;  %v2586_v35 = vor.u32 %v3337_v29, %v2585_v28  ;;  %v2555_v36 = vld [vmem:[%s5122_s2 + $0x54] sm:$0xf0]  ;;  %v2573_v37 = vld [vmem:[%s5122_s2 + $0x68] sm:$0xf]  ;;  %v2554_v39 = vor.u32 %v3330_v33, %v2553_v32 }
   0xa   :  { %v3334_v38 = vld [vmem:[%s5122_s2 + $0x70] sm:$0xf0]  ;;  %v2558_v40 = vor.u32 %v3329_v34, %v2555_v36  ;;  %v2541_v41 = vld [vmem:[%s5122_s2 + $0x30] sm:$0xf]  ;;  %v3327_v42 = vld [vmem:[%s5122_s2 + $0x38] sm:$0xf0] }
   0xb   :  { %v3326_v43 = vld [vmem:[%s5122_s2 + $0x34] sm:$0xf]  ;;  %v2574_v44 = vor.u32 %v3334_v38, %v2573_v37  ;;  %v2543_v45 = vld [vmem:[%s5122_s2 + $0x3c] sm:$0xf0]  ;;  %v2561_v46 = vld [vmem:[%s5122_s2 + $0x50] sm:$0xf]  ;;  %v2542_v48 = vor.u32 %v3327_v42, %v2541_v41 }
   0xc   :  { %195 = vmatpush.bf16.msra.mxu0 %v2578_v19  ;;  %220 = vmatpush.bf16.msra.mxu2 %v2598_v26  ;;  %v3331_v47 = vld [vmem:[%s5122_s2 + $0x58] sm:$0xf0]  ;;  %v2546_v49 = vor.u32 %v3326_v43, %v2543_v45  ;;  %v2529_v50 = vld [vmem:[%s5122_s2 + $0x18] sm:$0xf]  ;;  %v3324_v51 = vld [vmem:[%s5122_s2 + $0x20] sm:$0xf0] }
   0xd   :  { %208 = vmatpush.bf16.msra.mxu1 %v2582_v22  ;;  %v3323_v52 = vld [vmem:[%s5122_s2 + $0x1c] sm:$0xf]  ;;  %v2562_v53 = vor.u32 %v3331_v47, %v2561_v46  ;;  %v2531_v54 = vld [vmem:[%s5122_s2 + $0x24] sm:$0xf0]  ;;  %v2549_v55 = vld [vmem:[%s5122_s2 + $0x38] sm:$0xf]  ;;  %v2530_v57 = vor.u32 %v3324_v51, %v2529_v50 }
   0xe   :  { %v3328_v56 = vld [vmem:[%s5122_s2 + $0x40] sm:$0xf0]  ;;  %v2534_v58 = vor.u32 %v3323_v52, %v2531_v54  ;;  %v2517_v59 = vld [vmem:[%s5122_s2] sm:$0xf]  ;;  %v3321_v60 = vld [vmem:[%s5122_s2 + $0x8] sm:$0xf0] }
   0xf   :  { %v3320_v61 = vld [vmem:[%s5122_s2 + $0x4] sm:$0xf]  ;;  %v2550_v62 = vor.u32 %v3328_v56, %v2549_v55  ;;  %v2519_v63 = vld [vmem:[%s5122_s2 + $0xc] sm:$0xf0]  ;;  %v2537_v0 = vld [vmem:[%s5122_s2 + $0x20] sm:$0xf]  ;;  %v2518_v2 = vor.u32 %v3321_v60, %v2517_v59 }
  0x10   :  { %196 = vmatpush.bf16.msra.mxu0 %v2566_v30  ;;  %221 = vmatpush.bf16.msra.mxu2 %v2586_v35  ;;  %v3325_v1 = vld [vmem:[%s5122_s2 + $0x28] sm:$0xf0]  ;;  %v3766_v3 = vld [vmem:[%s5123_s1] sm:$0xff]  ;;  %v2522_v4 = vor.u32 %v3320_v61, %v2519_v63  ;;  %v2525_v6 = vld [vmem:[%s5122_s2 + $0x8] sm:$0xf] }
  0x11   :  { %209 = vmatpush.bf16.msra.mxu1 %v2570_v31  ;;  %v2538_v5 = vor.u32 %v3325_v1, %v2537_v0  ;;  %v3322_v7 = vld [vmem:[%s5122_s2 + $0x10] sm:$0xf0]  ;;  %v32_v8 = vpack.c.bf16 %v3766_v3, %v3766_v3  ;;  %v2701_v10 = vld [vmem:[%s5122_s2 + $0xa8] sm:$0xf]  ;;  %v3365_v12 = vld [vmem:[%s5122_s2 + $0xac] sm:$0xf] }
  0x12   :  { %v2526_v9 = vor.u32 %v3322_v7, %v2525_v6  ;;  %v3366_v11 = vld [vmem:[%s5122_s2 + $0xb0] sm:$0xf0]  ;;  %v2703_v14 = vld [vmem:[%s5122_s2 + $0xb4] sm:$0xf0]  ;;  %v2709_v15 = vld [vmem:[%s5122_s2 + $0xb0] sm:$0xf] }
  0x13   :  { %v2702_v13 = vor.u32 %v3366_v11, %v2701_v10  ;;  %v3367_v16 = vld [vmem:[%s5122_s2 + $0xb8] sm:$0xf0]  ;;  %v2706_v17 = vor.u32 %v3365_v12, %v2703_v14  ;;  %v2689_v19 = vld [vmem:[%s5122_s2 + $0x90] sm:$0xf]  ;;  %v3362_v21 = vld [vmem:[%s5122_s2 + $0x94] sm:$0xf] }
  0x14   :  { %197 = vmatpush.bf16.msra.mxu0 %v2554_v39  ;;  %222 = vmatpush.bf16.msra.mxu2 %v2574_v44  ;;  %v2710_v18 = vor.u32 %v3367_v16, %v2709_v15  ;;  %v3363_v20 = vld [vmem:[%s5122_s2 + $0x98] sm:$0xf0]  ;;  %v2691_v23 = vld [vmem:[%s5122_s2 + $0x9c] sm:$0xf0]  ;;  %v2697_v24 = vld [vmem:[%s5122_s2 + $0x98] sm:$0xf] }
  0x15   :  { %210 = vmatpush.bf16.msra.mxu1 %v2558_v40  ;;  %451 = vmatpush.bf16.msra.mxu3 %v2702_v13  ;;  %v2690_v22 = vor.u32 %v3363_v20, %v2689_v19  ;;  %v3364_v25 = vld [vmem:[%s5122_s2 + $0xa0] sm:$0xf0]  ;;  %v2694_v26 = vor.u32 %v3362_v21, %v2691_v23  ;;  %v2677_v29 = vld [vmem:[%s5122_s2 + $0x78] sm:$0xf]  ;;  %v3359_v31 = vld [vmem:[%s5122_s2 + $0x7c] sm:$0xf] }
  0x16   :  { %v2698_v27 = vor.u32 %v3364_v25, %v2697_v24  ;;  %v30_v28 = vld [vmem:[%s5125_s0] sm:$0xff]  ;;  %v2679_v33 = vld [vmem:[%s5122_s2 + $0x84] sm:$0xf0]  ;;  %v3361_v35 = vld [vmem:[%s5122_s2 + $0x88] sm:$0xf0] }
  0x17   :  { %v3360_v30 = vld [vmem:[%s5122_s2 + $0x80] sm:$0xf0]  ;;  %v2685_v34 = vld [vmem:[%s5122_s2 + $0x80] sm:$0xf]  ;;  %v2682_v36 = vor.u32 %v3359_v31, %v2679_v33  ;;  %v254_v38 = vrot.slane %v30_v28, 4  ;;  %v232_v46 = vunpack.c.l.bf16 %v30_v28 }
  0x18   :  { %198 = vmatpush.bf16.msra.mxu0 %v2542_v48  ;;  %223 = vmatpush.bf16.msra.mxu2 %v2562_v53  ;;  %v2678_v32 = vor.u32 %v3360_v30, %v2677_v29  ;;  %v2686_v37 = vor.u32 %v3361_v35, %v2685_v34  ;;  %v2665_v39 = vld [vmem:[%s5122_s2 + $0x60] sm:$0xf]  ;;  %v3357_v40 = vld [vmem:[%s5122_s2 + $0x68] sm:$0xf0]  ;;  %v3356_v41 = vld [vmem:[%s5122_s2 + $0x64] sm:$0xf] }
  0x19   :  { %211 = vmatpush.bf16.msra.mxu1 %v2546_v49  ;;  %452 = vmatpush.bf16.msra.mxu3 %v2690_v22  ;;  %v2666_v42 = vor.u32 %v3357_v40, %v2665_v39  ;;  %v2667_v43 = vld [vmem:[%s5122_s2 + $0x6c] sm:$0xf0]  ;;  %v2673_v44 = vld [vmem:[%s5122_s2 + $0x68] sm:$0xf]  ;;  %v3358_v45 = vld [vmem:[%s5122_s2 + $0x70] sm:$0xf0]  ;;  %v256_v49 = vunpack.c.l.bf16 %v254_v38 }
  0x1a   :  { %v2670_v47 = vor.u32 %v3356_v41, %v2667_v43  ;;  %v2674_v48 = vor.u32 %v3358_v45, %v2673_v44  ;;  %v2653_v50 = vld [vmem:[%s5122_s2 + $0x48] sm:$0xf]  ;;  %v3354_v51 = vld [vmem:[%s5122_s2 + $0x50] sm:$0xf0]  ;;  %v3353_v52 = vld [vmem:[%s5122_s2 + $0x4c] sm:$0xf] }
  0x1b   :  { %v2654_v54 = vor.u32 %v3354_v51, %v2653_v50  ;;  %v2655_v55 = vld [vmem:[%s5122_s2 + $0x54] sm:$0xf0]  ;;  %v2661_v56 = vld [vmem:[%s5122_s2 + $0x50] sm:$0xf]  ;;  %v3351_v1 = vld [vmem:[%s5122_s2 + $0x38] sm:$0xf0] }
  0x1c   :  { %199 = vmatpush.bf16.msra.mxu0 %v2530_v57  ;;  %224 = vmatpush.bf16.msra.mxu2 %v2550_v62  ;;  %v3355_v57 = vld [vmem:[%s5122_s2 + $0x58] sm:$0xf0]  ;;  %v2658_v60 = vor.u32 %v3353_v52, %v2655_v55  ;;  %v2641_v0 = vld [vmem:[%s5122_s2 + $0x30] sm:$0xf]  ;;  %v2643_v6 = vld [vmem:[%s5122_s2 + $0x3c] sm:$0xf0] }
  0x1d   :  { %212 = vmatpush.bf16.msra.mxu1 %v2534_v58  ;;  %453 = vmatpush.bf16.msra.mxu3 %v2678_v32  ;;  %v2662_v61 = vor.u32 %v3355_v57, %v2661_v56  ;;  %v2629_v10 = vld [vmem:[%s5122_s2 + $0x18] sm:$0xf]  ;;  %v3348_v12 = vld [vmem:[%s5122_s2 + $0x20] sm:$0xf0]  ;;  %v3347_v13 = vld [vmem:[%s5122_s2 + $0x1c] sm:$0xf] }
  0x1e   :  { %v2631_v14 = vld [vmem:[%s5122_s2 + $0x24] sm:$0xf0]  ;;  %v2630_v15 = vor.u32 %v3348_v12, %v2629_v10  ;;  %v2617_v19 = vld [vmem:[%s5122_s2] sm:$0xf]  ;;  %v3345_v22 = vld [vmem:[%s5122_s2 + $0x8] sm:$0xf0] }
  0x1f   :  { %v2634_v16 = vor.u32 %v3347_v13, %v2631_v14  ;;  %v3344_v23 = vld [vmem:[%s5122_s2 + $0x4] sm:$0xf]  ;;  %v2619_v24 = vld [vmem:[%s5122_s2 + $0xc] sm:$0xf0]  ;;  %v2618_v28 = vor.u32 %v3345_v22, %v2617_v19  ;;  %v3926_v41 = vld [vmem:[%s5124_s3] ss:$0 sm:$0xff] }
  0x20   :  { %200 = vmatpush.bf16.msra.mxu0 %v2518_v2  ;;  %225 = vmatpush.bf16.msra.mxu2 %v2538_v5  ;;  %v3350_v5 = vld [vmem:[%s5122_s2 + $0x34] sm:$0xf]  ;;  %v2622_v31 = vor.u32 %v3344_v23, %v2619_v24  ;;  %v2803_v10 = vld [vmem:[%s5122_s2 + $0xb4] sm:$0xf0]  ;;  %v3391_v12 = vld [vmem:[%s5122_s2 + $0xb8] sm:$0xf0] }
  0x21   :  { %213 = vmatpush.bf16.msra.mxu1 %v2522_v4  ;;  %454 = vmatpush.bf16.msra.mxu3 %v2666_v42  ;;  %v2642_v4 = vor.u32 %v3351_v1, %v2641_v0  ;;  %v2646_v7 = vor.u32 %v3350_v5, %v2643_v6  ;;  %v3941_v6 = vld [vmem:[%s5125_s0 + $0xc] sm:$0xff]  ;;  %v3388_v22 = vld [vmem:[%s5122_s2 + $0xa0] sm:$0xf0] }
  0x22   :  { %v512_v13 = vrot.slane %v3941_v6, 4 }
  0x23   :  { %201 = vmatmul.bf16.vlgmr.msra.gmra.mxu0 %v32_v8 }
  0x24   :  { %214 = vmatmul.bf16.vlgmr.msra.gmra.mxu1 %v32_v8  ;;  %226 = vmatpush.bf16.msra.mxu2 %v2526_v9  ;;  %v3352_v9 = vld [vmem:[%s5122_s2 + $0x40] sm:$0xf0]  ;;  %v514_v23 = vunpack.c.l.bf16 %v512_v13 }
  0x25   :  { %464 = vmatpush.bf16.msrb.mxu0 %v2706_v17  ;;  %477 = vmatpush.bf16.msrb.mxu1 %v2710_v18  ;;  %v2637_v17 = vld [vmem:[%s5122_s2 + $0x20] sm:$0xf]  ;;  %v3349_v18 = vld [vmem:[%s5122_s2 + $0x28] sm:$0xf0] }
  0x26   :  { %455 = vmatpush.bf16.msra.mxu3 %v2654_v54  ;;  %v2638_v21 = vor.u32 %v3349_v18, %v2637_v17  ;;  %v3387_v17 = vld [vmem:[%s5122_s2 + $0x98] sm:$0xf0]  ;;  %v3386_v18 = vld [vmem:[%s5122_s2 + $0x94] sm:$0xf] }
  0x27   :  { %227 = vmatmul.bf16.vlgmr.msra.gmra.mxu2 %v32_v8  ;;  %v2649_v8 = vld [vmem:[%s5122_s2 + $0x38] sm:$0xf] }
  0x28   :  { %v2650_v11 = vor.u32 %v3352_v9, %v2649_v8  ;;  %v3389_v8 = vld [vmem:[%s5122_s2 + $0xac] sm:$0xf] }
  0x29   :  { %465 = vmatpush.bf16.msrb.mxu0 %v2694_v26  ;;  %478 = vmatpush.bf16.msrb.mxu1 %v2698_v27  ;;  %v2625_v26 = vld [vmem:[%s5122_s2 + $0x8] sm:$0xf]  ;;  %v3346_v27 = vld [vmem:[%s5122_s2 + $0x10] sm:$0xf0]  ;;  %v2806_v14 = vor.u32 %v3389_v8, %v2803_v10  ;;  %v2729_v10 = vld [vmem:[%s5122_s2 + $0x18] sm:$0xf] }
  0x2a   :  { %456 = vmatpush.bf16.msra.mxu3 %v2642_v4  ;;  %v2626_v34 = vor.u32 %v3346_v27, %v2625_v26  ;;  %v2777_v26 = vld [vmem:[%s5122_s2 + $0x78] sm:$0xf]  ;;  %v3384_v27 = vld [vmem:[%s5122_s2 + $0x80] sm:$0xf0] }
  0x2d   :  { %466 = vmatpush.bf16.msrb.mxu0 %v2682_v36  ;;  %479 = vmatpush.bf16.msrb.mxu1 %v2686_v37 }
  0x2e   :  { %457 = vmatpush.bf16.msra.mxu3 %v2630_v15 }
  0x31   :  { %467 = vmatpush.bf16.msrb.mxu0 %v2670_v47  ;;  %480 = vmatpush.bf16.msrb.mxu1 %v2674_v48  ;;  %v31_v48 = vld [vmem:[%s5125_s0 + $0x8] sm:$0xf] }
  0x32   :  { %458 = vmatpush.bf16.msra.mxu3 %v2618_v28  ;;  %v3383_v28 = vld [vmem:[%s5122_s2 + $0x7c] sm:$0xf] }
  0x35   :  { %468 = vmatpush.bf16.msrb.mxu0 %v2658_v60  ;;  %481 = vmatpush.bf16.msrb.mxu1 %v2662_v61 }
  0x36   :  { %723 = vmatpush.bf16.msrb.mxu3 %v2806_v14  ;;  %v3371_v14 = vld [vmem:[%s5122_s2 + $0x1c] sm:$0xf] }
  0x39   :  { %469 = vmatpush.bf16.msrb.mxu0 %v2646_v7  ;;  %482 = vmatpush.bf16.msrb.mxu1 %v2650_v11  ;;  %v2801_v7 = vld [vmem:[%s5122_s2 + $0xa8] sm:$0xf]  ;;  %v2809_v11 = vld [vmem:[%s5122_s2 + $0xb0] sm:$0xf] }
  0x3a   :  { %v2810_v15 = vor.u32 %v3391_v12, %v2809_v11  ;;  %v3372_v11 = vld [vmem:[%s5122_s2 + $0x20] sm:$0xf0] }
  0x3d   :  { %470 = vmatpush.bf16.msrb.mxu0 %v2634_v16  ;;  %483 = vmatpush.bf16.msrb.mxu1 %v2638_v21  ;;  %v2789_v16 = vld [vmem:[%s5122_s2 + $0x90] sm:$0xf]  ;;  %v2797_v21 = vld [vmem:[%s5122_s2 + $0x98] sm:$0xf] }
  0x3e   :  { %v2790_v19 = vor.u32 %v3387_v17, %v2789_v16  ;;  %v2737_v16 = vld [vmem:[%s5122_s2 + $0x20] sm:$0xf]  ;;  %v3373_v17 = vld [vmem:[%s5122_s2 + $0x28] sm:$0xf0] }
  0x41   :  { %471 = vmatpush.bf16.msrb.mxu0 %v2622_v31  ;;  %484 = vmatpush.bf16.msrb.mxu1 %v2626_v34  ;;  %v2779_v31 = vld [vmem:[%s5122_s2 + $0x84] sm:$0xf0] }
  0x45   :  { %736 = vmatpush.bf16.msra.mxu0 %v2810_v15  ;;  %v2731_v15 = vld [vmem:[%s5122_s2 + $0x24] sm:$0xf0] }
  0xa0   :  { %v202_v53 = vpop.f32.mrf.mxu0 }
  0xa1   :  { %v233_v58 = vadd.f32 %v232_v46, %v202_v53  ;;  %v215_v59 = vpop.f32.mrf.mxu1  ;;  %v279_v53 = vunpack.c.l.bf16 %v31_v48  ;;  %v3382_v48 = vld [vmem:[%s5122_s2 + $0x70] sm:$0xf0] }
  0xa2   :  { %v257_v62 = vadd.f32 %v256_v49, %v215_v59 }
  0xa3   :  { %v2611_v63 = vmul.f32 -1.442695, %v233_v58 }
  0xa4   :  { %v2612_v2 = vmul.f32 -1.442695, %v257_v62 }
  0xa5   :  { %3513 = vpow2.f32 %v2611_v63 }
  0xa6   :  { %3515 = vpow2.f32 %v2612_v2 }
  0xa8   :  { %v204_v20 = vpop.f32.mrf.mxu0 }
  0xa9   :  { %v217_v25 = vpop.f32.mrf.mxu1  ;;  %v2791_v20 = vld [vmem:[%s5122_s2 + $0x9c] sm:$0xf0] }
  0xaa   :  { %v228_v30 = vpop.f32.mrf.mxu2  ;;  %v2794_v24 = vor.u32 %v3386_v18, %v2791_v20  ;;  %v2798_v25 = vor.u32 %v3388_v22, %v2797_v21  ;;  %v2734_v20 = vor.u32 %v3371_v14, %v2731_v15  ;;  %v2717_v21 = vld [vmem:[%s5122_s2] sm:$0xf]  ;;  %v3369_v22 = vld [vmem:[%s5122_s2 + $0x8] sm:$0xf0] }
  0xab   :  { %v3514_v29 = vpop.eup %3513  ;;  %v277_v50 = vadd.f32 %v3926_v41, %v228_v30  ;;  %v2778_v30 = vor.u32 %v3384_v27, %v2777_v26  ;;  %v2725_v27 = vld [vmem:[%s5122_s2 + $0x8] sm:$0xf]  ;;  %v2891_v15 = vld [vmem:[%s5122_s2 + $0x9c] sm:$0xf0] }
  0xac   :  { %v3516_v32 = vpop.eup %3515  ;;  %v237_v33 = vadd.f32 1.0, %v3514_v29  ;;  %724 = vmatpush.bf16.msrb.mxu3 %v2794_v24  ;;  %737 = vmatpush.bf16.msra.mxu0 %v2798_v25  ;;  %v3368_v24 = vld [vmem:[%s5122_s2 + $0x4] sm:$0xf]  ;;  %v2719_v25 = vld [vmem:[%s5122_s2 + $0xc] sm:$0xf0] }
  0xad   :  { %v261_v35 = vadd.f32 1.0, %v3516_v32  ;;  %v2785_v32 = vld [vmem:[%s5122_s2 + $0x80] sm:$0xf] }
  0xae   :  { %3517 = vrcp.f32 %v237_v33  ;;  %v249_v44 = vand.u32 2147483648, %v237_v33  ;;  %v247_v46 = vand.u32 2147483647, %v237_v33  ;;  %vm243_vm1 = vweird.f32 %v237_v33 }
  0xaf   :  { %3519 = vrcp.f32 %v261_v35  ;;  %vm267_vm4 = vweird.f32 %v261_v35  ;;  %v273_v56 = vand.u32 2147483648, %v261_v35  ;;  %v271_v58 = vand.u32 2147483647, %v261_v35 }
  0xb0   :  { %v250_v51 = vor.u32 1.1754944e-38, %v249_v44  ;;  %vm248_vm3 = vcmp.eq.f32.partialorder %v247_v46, 8.507059e+37  ;;  %v3380_v44 = vld [vmem:[%s5122_s2 + $0x64] sm:$0xf]  ;;  %v2773_v46 = vld [vmem:[%s5122_s2 + $0x68] sm:$0xf] }
  0xb1   :  { %v274_v61 = vor.u32 1.1754944e-38, %v273_v56  ;;  %vm272_vm7 = vcmp.eq.f32.partialorder %v271_v58, 8.507059e+37  ;;  %v2761_v56 = vld [vmem:[%s5122_s2 + $0x50] sm:$0xf] }
  0xb2   :  { %v230_v36 = vpop.f32.mrf.mxu2 }
  0xb3   :  { %v2782_v36 = vor.u32 %v3383_v28, %v2779_v31  ;;  %v3370_v28 = vld [vmem:[%s5122_s2 + $0x10] sm:$0xf0]  ;;  %v2722_v31 = vor.u32 %v3368_v24, %v2719_v25  ;;  %v2879_v25 = vld [vmem:[%s5122_s2 + $0x84] sm:$0xf0] }
  0xb4   :  { %v3518_v37 = vpop.eup %3517 }
  0xb5   :  { %v3520_v38 = vpop.eup %3519  ;;  %v239_v39 = vmul.f32 %v3518_v37, %v237_v33  ;;  %vm244_vm0 = vweird.f32 %v3518_v37  ;;  %v3385_v33 = vld [vmem:[%s5122_s2 + $0x88] sm:$0xf0]  ;;  %725 = vmatpush.bf16.msrb.mxu3 %v2782_v36 }
  0xb6   :  { %v263_v40 = vmul.f32 %v3520_v38, %v261_v35  ;;  %vm245_vm2 = vmor %vm243_vm1, %vm244_vm0  ;;  %vm268_vm5 = vweird.f32 %v3520_v38 }
  0xb7   :  { %v240_v42 = vsub.f32 1.0, %v239_v39  ;;  %vm269_vm6 = vmor %vm267_vm4, %vm268_vm5  ;;  %v490_v39 = vunpack.c.l.bf16 %v3941_v6  ;;  %v2749_v6 = vld [vmem:[%s5122_s2 + $0x38] sm:$0xf] }
  0xb8   :  { %v264_v43 = vsub.f32 1.0, %v263_v40  ;;  %v2765_v40 = vld [vmem:[%s5122_s2 + $0x60] sm:$0xf] }
  0xb9   :  { %v241_v45 = vmul.f32 %v3518_v37, %v240_v42  ;;  %v3381_v42 = vld [vmem:[%s5122_s2 + $0x68] sm:$0xf0] }
  0xba   :  { %v265_v47 = vmul.f32 %v3520_v38, %v264_v43  ;;  %v2766_v43 = vor.u32 %v3381_v42, %v2765_v40 }
  0xbb   :  { %v242_v49 = vadd.f32 %v3518_v37, %v241_v45  ;;  %v2767_v45 = vld [vmem:[%s5122_s2 + $0x6c] sm:$0xf0] }
  0xbc   :  { %v266_v55 = vadd.f32 %v3520_v38, %v265_v47  ;;  %v2770_v47 = vor.u32 %v3380_v44, %v2767_v45  ;;  %v2614_v45 = vld [vmem:[%s5125_s0 + $0x14] sm:$0xf] }
  0xbd   :  { %v246_v52 = vsel %vm245_vm2, %v3518_v37, %v242_v49  ;;  %v2786_v37 = vor.u32 %v3385_v33, %v2785_v32  ;;  %v2753_v49 = vld [vmem:[%s5122_s2 + $0x48] sm:$0xf]  ;;  %v2726_v32 = vor.u32 %v3370_v28, %v2725_v27  ;;  %v3409_v27 = vld [vmem:[%s5122_s2 + $0x88] sm:$0xf0] }
  0xbe   :  { %v251_v54 = vsel %vm248_vm3, %v250_v51, %v246_v52  ;;  %v270_v60 = vsel %vm269_vm6, %v3520_v38, %v266_v55  ;;  %v2774_v52 = vor.u32 %v3382_v48, %v2773_v46  ;;  %v2755_v55 = vld [vmem:[%s5122_s2 + $0x54] sm:$0xf0]  ;;  %726 = vmatpush.bf16.msrb.mxu3 %v2770_v47 }
  0xbf   :  { %v278_v57 = vmul.f32 %v277_v50, %v251_v54  ;;  %v275_v62 = vsel %vm272_vm7, %v274_v61, %v270_v60  ;;  %738 = vmatpush.bf16.msra.mxu0 %v2786_v37  ;;  %v3378_v50 = vld [vmem:[%s5122_s2 + $0x50] sm:$0xf0]  ;;  %v3377_v54 = vld [vmem:[%s5122_s2 + $0x4c] sm:$0xf]  ;;  %v2741_v60 = vld [vmem:[%s5122_s2 + $0x30] sm:$0xf] }
  0xc0   :  { %v282_v63 = vsub.f32 1.0, %v275_v62  ;;  %v284_v2 = vmul.f32 %v275_v62, %v3766_v3  ;;  %v3390_v3 = vld [vmem:[%s5122_s2 + $0xb0] sm:$0xf0]  ;;  %v2758_v58 = vor.u32 %v3377_v54, %v2755_v55  ;;  %v3375_v61 = vld [vmem:[%s5122_s2 + $0x38] sm:$0xf0] }
  0xc1   :  { %v280_v59 = vadd.f32 %v279_v53, %v278_v57  ;;  %v2802_v9 = vor.u32 %v3390_v3, %v2801_v7  ;;  %v2754_v53 = vor.u32 %v3378_v50, %v2753_v49  ;;  %v3376_v7 = vld [vmem:[%s5122_s2 + $0x40] sm:$0xf0]  ;;  %v2742_v3 = vor.u32 %v3375_v61, %v2741_v60 }
  0xc2   :  { %727 = vmatpush.bf16.msrb.mxu3 %v2758_v58  ;;  %v2750_v13 = vor.u32 %v3376_v7, %v2749_v6  ;;  %v537_v50 = vunpack.c.l.bf16 %v2614_v45  ;;  %v2903_v6 = vld [vmem:[%s5122_s2 + $0xb4] sm:$0xf0]  ;;  %v2909_v7 = vld [vmem:[%s5122_s2 + $0xb0] sm:$0xf]  ;;  %v3402_v45 = vld [vmem:[%s5122_s2 + $0x50] sm:$0xf0] }
  0xc3   :  { %3521 = vtanh.f32 %v280_v59  ;;  %710 = vmatpush.bf16.msrb.mxu2 %v2802_v9  ;;  %v3379_v59 = vld [vmem:[%s5122_s2 + $0x58] sm:$0xf0]  ;;  %739 = vmatpush.bf16.msra.mxu0 %v2774_v52 }
  0xc7   :  { %711 = vmatpush.bf16.msrb.mxu2 %v2790_v19  ;;  %v2730_v19 = vor.u32 %v3372_v11, %v2729_v10  ;;  %v2713_v10 = vld [vmem:[%s5125_s0 + $0x18] sm:$0xff]  ;;  %v2889_v11 = vld [vmem:[%s5122_s2 + $0x90] sm:$0xf] }
  0xc9   :  { %v3522_v0 = vpop.eup %3521 }
  0xca   :  { %v283_v1 = vmul.f32 %v3522_v0, %v282_v63  ;;  %v2762_v63 = vor.u32 %v3379_v59, %v2761_v56  ;;  %v3374_v0 = vld [vmem:[%s5122_s2 + $0x34] sm:$0xf] }
  0xcb   :  { %712 = vmatpush.bf16.msrb.mxu2 %v2778_v30  ;;  %v2718_v30 = vor.u32 %v3369_v22, %v2717_v21  ;;  %v2877_v21 = vld [vmem:[%s5122_s2 + $0x78] sm:$0xf]  ;;  %v3408_v22 = vld [vmem:[%s5122_s2 + $0x80] sm:$0xf0] }
  0xcc   :  { %v3933_v4 = vadd.f32 %v284_v2, %v283_v1  ;;  %v2743_v1 = vld [vmem:[%s5122_s2 + $0x3c] sm:$0xf0]  ;;  %740 = vmatpush.bf16.msra.mxu0 %v2762_v63  ;;  %v2878_v24 = vor.u32 %v3408_v22, %v2877_v21  ;;  %v3394_v21 = vld [vmem:[%s5122_s2 + $0x10] sm:$0xf0] }
  0xcd   :  { %v2746_v9 = vor.u32 %v3374_v0, %v2743_v1  ;;  %v2901_v1 = vld [vmem:[%s5122_s2 + $0xa8] sm:$0xf] }
  0xce   :  { %286 = vst [vmem:[#allocation2] sm:$0xff] %v3933_v4  ;;  %v290_v5 = vpack.c.bf16 %v3933_v4, %v3933_v4 }
  0xcf   :  { %713 = vmatpush.bf16.msrb.mxu2 %v2766_v43  ;;  %728 = vmatpush.bf16.msrb.mxu3 %v2746_v9 }
  0xd0   :  { %459 = vmatmul.bf16.vlgmr.msra.gmra.mxu3 %v290_v5  ;;  %472 = vmatmul.bf16.vlgmr.msrb.gmra.mxu0 %v290_v5 }
  0xd1   :  { %485 = vmatmul.bf16.vlgmr.msrb.gmra.mxu1 %v290_v5  ;;  %741 = vmatpush.bf16.msra.mxu0 %v2750_v13  ;;  %v3410_v13 = vld [vmem:[%s5122_s2 + $0x94] sm:$0xf] }
  0xd3   :  { %714 = vmatpush.bf16.msrb.mxu2 %v2754_v53  ;;  %729 = vmatpush.bf16.msrb.mxu3 %v2734_v20  ;;  %v771_v20 = vrot.slane %v2713_v10, 4 }
  0xd7   :  { %715 = vmatpush.bf16.msrb.mxu2 %v2742_v3  ;;  %730 = vmatpush.bf16.msrb.mxu3 %v2722_v31  ;;  %v3415_v3 = vld [vmem:[%s5122_s2 + $0xb8] sm:$0xf0]  ;;  %v749_v31 = vunpack.c.l.bf16 %v2713_v10  ;;  %v3397_v10 = vld [vmem:[%s5122_s2 + $0x28] sm:$0xf0] }
  0xd8   :  { %v2910_v9 = vor.u32 %v3415_v3, %v2909_v7  ;;  %v3396_v7 = vld [vmem:[%s5122_s2 + $0x20] sm:$0xf0]  ;;  %v3395_v3 = vld [vmem:[%s5122_s2 + $0x1c] sm:$0xf] }
  0xdb   :  { %716 = vmatpush.bf16.msrb.mxu2 %v2730_v19  ;;  %995 = vmatpush.bf16.msra.mxu3 %v2910_v9  ;;  %v2837_v9 = vld [vmem:[%s5122_s2 + $0x20] sm:$0xf] }
  0xdf   :  { %717 = vmatpush.bf16.msrb.mxu2 %v2718_v30 }
 0x14d   :  { %v473_v29 = vpop.f32.mrf.mxu0 }
 0x14e   :  { %v515_v34 = vadd.f32 %v514_v23, %v473_v29  ;;  %v3998_v35 = vpop.f32.mrf.mxu1  ;;  %v2738_v23 = vor.u32 %v3373_v17, %v2737_v16  ;;  %v2897_v16 = vld [vmem:[%s5122_s2 + $0x98] sm:$0xf]  ;;  %v3412_v17 = vld [vmem:[%s5122_s2 + $0xa0] sm:$0xf0] }
 0x14f   :  { %v535_v48 = vadd.f32 %v3926_v41, %v3998_v35  ;;  %v2898_v19 = vor.u32 %v3412_v17, %v2897_v16  ;;  %v2817_v16 = vld [vmem:[%s5122_s2] sm:$0xf]  ;;  %v3393_v17 = vld [vmem:[%s5122_s2 + $0x8] sm:$0xf0] }
 0x150   :  { %v2712_v38 = vmul.f32 -1.442695, %v515_v34  ;;  %742 = vmatpush.bf16.msra.mxu0 %v2738_v23  ;;  %v3407_v23 = vld [vmem:[%s5122_s2 + $0x7c] sm:$0xf] }
 0x151   :  { %996 = vmatpush.bf16.msra.mxu3 %v2898_v19  ;;  %v2819_v19 = vld [vmem:[%s5122_s2 + $0xc] sm:$0xf0] }
 0x152   :  { %3523 = vpow2.f32 %v2712_v38 }
 0x153   :  { %v460_v51 = vpop.f32.mrf.mxu3 }
 0x154   :  { %v491_v57 = vadd.f32 %v490_v39, %v460_v51  ;;  %743 = vmatpush.bf16.msra.mxu0 %v2726_v32  ;;  %v773_v32 = vunpack.c.l.bf16 %v771_v20  ;;  %v2825_v20 = vld [vmem:[%s5122_s2 + $0x8] sm:$0xf] }
 0x155   :  { %v475_v62 = vpop.f32.mrf.mxu0 }
 0x156   :  { %v2711_v2 = vmul.f32 -1.442695, %v491_v57  ;;  %v488_v5 = vpop.f32.mrf.mxu1 }
 0x158   :  { %v3524_v8 = vpop.eup %3523  ;;  %3525 = vpow2.f32 %v2711_v2  ;;  %v3414_v2 = vld [vmem:[%s5122_s2 + $0xb0] sm:$0xf0] }
 0x159   :  { %v4061_v12 = vadd.f32 1.0, %v3524_v8  ;;  %v2902_v5 = vor.u32 %v3414_v2, %v2901_v1 }
 0x15b   :  { %v462_v18 = vpop.f32.mrf.mxu3  ;;  %3527 = vrcp.f32 %v4061_v12  ;;  %v531_v53 = vand.u32 2147483648, %v4061_v12  ;;  %vm525_vm13 = vweird.f32 %v4061_v12  ;;  %v529_v55 = vand.u32 2147483647, %v4061_v12  ;;  %969 = vmatpush.bf16.msra.mxu1 %v2902_v5 }
 0x15c   :  { %v2894_v18 = vor.u32 %v3410_v13, %v2891_v15  ;;  %v2838_v15 = vor.u32 %v3397_v10, %v2837_v9  ;;  %v2991_v10 = vld [vmem:[%s5122_s2 + $0x9c] sm:$0xf0] }
 0x15d   :  { %v532_v58 = vor.u32 1.1754944e-38, %v531_v53  ;;  %vm530_vm15 = vcmp.eq.f32.partialorder %v529_v55, 8.507059e+37 }
 0x15e   :  { %v3526_v26 = vpop.eup %3525 }
 0x15f   :  { %v495_v29 = vadd.f32 1.0, %v3526_v26  ;;  %v2885_v26 = vld [vmem:[%s5122_s2 + $0x80] sm:$0xf] }
 0x160   :  { %v2886_v30 = vor.u32 %v3409_v27, %v2885_v26 }
 0x161   :  { %3529 = vrcp.f32 %v495_v29  ;;  %v3528_v33 = vpop.eup %3527  ;;  %v507_v40 = vand.u32 2147483648, %v495_v29  ;;  %v505_v43 = vand.u32 2147483647, %v495_v29  ;;  %vm501_vm9 = vweird.f32 %v495_v29 }
 0x162   :  { %v521_v34 = vmul.f32 %v3528_v33, %v4061_v12  ;;  %vm526_vm12 = vweird.f32 %v3528_v33  ;;  %v3411_v12 = vld [vmem:[%s5122_s2 + $0x98] sm:$0xf0]  ;;  %997 = vmatpush.bf16.msra.mxu3 %v2886_v30 }
 0x163   :  { %v508_v47 = vor.u32 1.1754944e-38, %v507_v40  ;;  %vm506_vm11 = vcmp.eq.f32.partialorder %v505_v43, 8.507059e+37  ;;  %vm527_vm14 = vmor %vm525_vm13, %vm526_vm12  ;;  %v2890_v14 = vor.u32 %v3411_v12, %v2889_v11  ;;  %v3406_v40 = vld [vmem:[%s5122_s2 + $0x70] sm:$0xf0] }
 0x164   :  { %v522_v38 = vsub.f32 1.0, %v521_v34  ;;  %v3405_v34 = vld [vmem:[%s5122_s2 + $0x68] sm:$0xf0] }
 0x165   :  { %970 = vmatpush.bf16.msra.mxu1 %v2890_v14 }
 0x166   :  { %v523_v44 = vmul.f32 %v3528_v33, %v522_v38  ;;  %v2867_v38 = vld [vmem:[%s5122_s2 + $0x6c] sm:$0xf0] }
 0x167   :  { %v3530_v36 = vpop.eup %3529 }
 0x168   :  { %v497_v37 = vmul.f32 %v3530_v36, %v495_v29  ;;  %vm502_vm8 = vweird.f32 %v3530_v36  ;;  %v524_v52 = vadd.f32 %v3528_v33, %v523_v44  ;;  %v2882_v29 = vor.u32 %v3407_v23, %v2879_v25  ;;  %v2853_v44 = vld [vmem:[%s5122_s2 + $0x48] sm:$0xf] }
 0x169   :  { %vm503_vm10 = vmor %vm501_vm9, %vm502_vm8  ;;  %971 = vmatpush.bf16.msra.mxu1 %v2878_v24  ;;  %v2818_v25 = vor.u32 %v3393_v17, %v2817_v16  ;;  %v2977_v16 = vld [vmem:[%s5122_s2 + $0x78] sm:$0xf]  ;;  %v3432_v17 = vld [vmem:[%s5122_s2 + $0x80] sm:$0xf0] }
 0x16a   :  { %v498_v39 = vsub.f32 1.0, %v497_v37  ;;  %v528_v57 = vsel %vm527_vm14, %v3528_v33, %v524_v52  ;;  %v2865_v33 = vld [vmem:[%s5122_s2 + $0x60] sm:$0xf]  ;;  %v3403_v52 = vld [vmem:[%s5122_s2 + $0x58] sm:$0xf0] }
 0x16b   :  { %v533_v35 = vsel %vm530_vm15, %v532_v58, %v528_v57  ;;  %v2866_v37 = vor.u32 %v3405_v34, %v2865_v33  ;;  %v3399_v57 = vld [vmem:[%s5122_s2 + $0x38] sm:$0xf0]  ;;  %v3398_v58 = vld [vmem:[%s5122_s2 + $0x34] sm:$0xf] }
 0x16c   :  { %v499_v42 = vmul.f32 %v3530_v36, %v498_v39  ;;  %v540_v59 = vsub.f32 1.0, %v533_v35  ;;  %v542_v62 = vmul.f32 %v533_v35, %v3933_v4  ;;  %v3413_v4 = vld [vmem:[%s5122_s2 + $0xac] sm:$0xf]  ;;  %v2873_v39 = vld [vmem:[%s5122_s2 + $0x68] sm:$0xf] }
 0x16d   :  { %v2906_v8 = vor.u32 %v3413_v4, %v2903_v6  ;;  %v2874_v43 = vor.u32 %v3406_v40, %v2873_v39  ;;  %972 = vmatpush.bf16.msra.mxu1 %v2866_v37  ;;  %v2829_v6 = vld [vmem:[%s5122_s2 + $0x18] sm:$0xf] }
 0x16e   :  { %v500_v46 = vadd.f32 %v3530_v36, %v499_v42  ;;  %v2830_v13 = vor.u32 %v3396_v7, %v2829_v6  ;;  %v2989_v7 = vld [vmem:[%s5122_s2 + $0x90] sm:$0xf] }
 0x16f   :  { %982 = vmatpush.bf16.msra.mxu2 %v2906_v8  ;;  %998 = vmatpush.bf16.msra.mxu3 %v2874_v43  ;;  %v2831_v8 = vld [vmem:[%s5122_s2 + $0x24] sm:$0xf0] }
 0x170   :  { %v504_v49 = vsel %vm503_vm10, %v3530_v36, %v500_v46  ;;  %v3404_v36 = vld [vmem:[%s5122_s2 + $0x64] sm:$0xf]  ;;  %v3401_v46 = vld [vmem:[%s5122_s2 + $0x4c] sm:$0xf]  ;;  %v2834_v14 = vor.u32 %v3395_v3, %v2831_v8  ;;  %v3435_v3 = vld [vmem:[%s5122_s2 + $0x98] sm:$0xf0] }
 0x171   :  { %v509_v51 = vsel %vm506_vm11, %v508_v47, %v504_v49  ;;  %v2870_v42 = vor.u32 %v3404_v36, %v2867_v38  ;;  %v2854_v49 = vor.u32 %v3402_v45, %v2853_v44  ;;  %v3434_v8 = vld [vmem:[%s5122_s2 + $0x94] sm:$0xf]  ;;  %v2990_v9 = vor.u32 %v3435_v3, %v2989_v7  ;;  %v2937_v7 = vld [vmem:[%s5122_s2 + $0x20] sm:$0xf] }
 0x172   :  { %v536_v54 = vmul.f32 %v535_v48, %v509_v51  ;;  %v2861_v51 = vld [vmem:[%s5122_s2 + $0x50] sm:$0xf] }
 0x173   :  { %983 = vmatpush.bf16.msra.mxu2 %v2894_v18  ;;  %v2862_v35 = vor.u32 %v3403_v52, %v2861_v51  ;;  %973 = vmatpush.bf16.msra.mxu1 %v2854_v49  ;;  %v3392_v18 = vld [vmem:[%s5122_s2 + $0x4] sm:$0xf] }
 0x174   :  { %v538_v56 = vadd.f32 %v537_v50, %v536_v54  ;;  %v2855_v50 = vld [vmem:[%s5122_s2 + $0x54] sm:$0xf0]  ;;  %v2822_v27 = vor.u32 %v3392_v18, %v2819_v19  ;;  %v3431_v18 = vld [vmem:[%s5122_s2 + $0x7c] sm:$0xf]  ;;  %v2978_v19 = vor.u32 %v3432_v17, %v2977_v16  ;;  %v2919_v16 = vld [vmem:[%s5122_s2 + $0xc] sm:$0xf0] }
 0x175   :  { %v2858_v55 = vor.u32 %v3401_v46, %v2855_v50  ;;  %999 = vmatpush.bf16.msra.mxu3 %v2862_v35 }
 0x176   :  { %3531 = vtanh.f32 %v538_v56  ;;  %v2841_v56 = vld [vmem:[%s5122_s2 + $0x30] sm:$0xf] }
 0x177   :  { %984 = vmatpush.bf16.msra.mxu2 %v2882_v29  ;;  %v2842_v2 = vor.u32 %v3399_v57, %v2841_v56  ;;  %v2826_v29 = vor.u32 %v3394_v21, %v2825_v20  ;;  %v2979_v20 = vld [vmem:[%s5122_s2 + $0x84] sm:$0xf0]  ;;  %v2985_v21 = vld [vmem:[%s5122_s2 + $0x80] sm:$0xf] }
 0x179   :  { %974 = vmatpush.bf16.msra.mxu1 %v2842_v2  ;;  %v3009_v2 = vld [vmem:[%s5122_s2 + $0xb0] sm:$0xf] }
 0x17b   :  { %985 = vmatpush.bf16.msra.mxu2 %v2870_v42  ;;  %v2714_v42 = vld [vmem:[%s5125_s0 + $0x20] sm:$0xf] }
 0x17c   :  { %v3532_v60 = vpop.eup %3531 }
 0x17d   :  { %v541_v61 = vmul.f32 %v3532_v60, %v540_v59  ;;  %v2843_v59 = vld [vmem:[%s5122_s2 + $0x3c] sm:$0xf0]  ;;  %v2849_v60 = vld [vmem:[%s5122_s2 + $0x38] sm:$0xf]  ;;  %975 = vmatpush.bf16.msra.mxu1 %v2830_v13  ;;  %v2994_v13 = vor.u32 %v3434_v8, %v2991_v10 }
 0x17e   :  { %v2846_v4 = vor.u32 %v3398_v58, %v2843_v59  ;;  %v2917_v10 = vld [vmem:[%s5122_s2] sm:$0xf] }
 0x17f   :  { %v4104_v63 = vadd.f32 %v542_v62, %v541_v61  ;;  %v3400_v61 = vld [vmem:[%s5122_s2 + $0x40] sm:$0xf0]  ;;  %986 = vmatpush.bf16.msra.mxu2 %v2858_v55 }
 0x180   :  { %v2850_v5 = vor.u32 %v3400_v61, %v2849_v60  ;;  %v3001_v61 = vld [vmem:[%s5122_s2 + $0xa8] sm:$0xf] }
 0x181   :  { %545 = vst [vmem:[#allocation2 + $0x8] sm:$0xff] %v4104_v63  ;;  %v549_v0 = vpack.c.bf16 %v4104_v63, %v4104_v63  ;;  %976 = vmatpush.bf16.msra.mxu1 %v2818_v25 }
 0x182   :  { %1000 = vmatpush.bf16.msra.mxu3 %v2850_v5 }
 0x183   :  { %718 = vmatmul.bf16.vlgmr.msrb.gmra.mxu2 %v549_v0  ;;  %731 = vmatmul.bf16.vlgmr.msrb.gmra.mxu3 %v549_v0 }
 0x184   :  { %744 = vmatmul.bf16.vlgmr.msra.gmra.mxu0 %v549_v0  ;;  %987 = vmatpush.bf16.msra.mxu2 %v2846_v4  ;;  %v3439_v4 = vld [vmem:[%s5122_s2 + $0xb8] sm:$0xf0] }
 0x185   :  { %v3010_v6 = vor.u32 %v3439_v4, %v3009_v2  ;;  %v3420_v2 = vld [vmem:[%s5122_s2 + $0x20] sm:$0xf0] }
 0x186   :  { %1001 = vmatpush.bf16.msra.mxu3 %v2838_v15  ;;  %v2813_v15 = vld [vmem:[%s5125_s0 + $0x24] sm:$0xff] }
 0x187   :  { %v1008_v25 = vunpack.c.l.bf16 %v2813_v15 }
 0x188   :  { %988 = vmatpush.bf16.msra.mxu2 %v2834_v14 }
 0x18a   :  { %1002 = vmatpush.bf16.msra.mxu3 %v2826_v29  ;;  %v3428_v29 = vld [vmem:[%s5122_s2 + $0x64] sm:$0xf] }
 0x18c   :  { %989 = vmatpush.bf16.msra.mxu2 %v2822_v27  ;;  %v3429_v27 = vld [vmem:[%s5122_s2 + $0x68] sm:$0xf0] }
 0x190   :  { %1254 = vmatpush.bf16.msrb.mxu2 %v3010_v6  ;;  %v2931_v6 = vld [vmem:[%s5122_s2 + $0x24] sm:$0xf0] }
 0x201   :  { %v4166_v28 = vpop.f32.mrf.mxu0 }
 0x202   :  { %v794_v45 = vadd.f32 %v3926_v41, %v4166_v28 }
 0x206   :  { %v719_v47 = vpop.f32.mrf.mxu2  ;;  %v732_v48 = vpop.f32.mrf.mxu3 }
 0x207   :  { %v750_v53 = vadd.f32 %v749_v31, %v719_v47  ;;  %v774_v54 = vadd.f32 %v773_v32, %v732_v48  ;;  %v796_v47 = vunpack.c.l.bf16 %v2714_v42  ;;  %v3426_v42 = vld [vmem:[%s5122_s2 + $0x50] sm:$0xf0] }
 0x209   :  { %v2811_v62 = vmul.f32 -1.442695, %v750_v53  ;;  %v2812_v0 = vmul.f32 -1.442695, %v774_v54  ;;  %v747_v1 = vpop.f32.mrf.mxu0 }
 0x20a   :  { %v3003_v1 = vld [vmem:[%s5122_s2 + $0xb4] sm:$0xf0] }
 0x20b   :  { %3533 = vpow2.f32 %v2811_v62  ;;  %v3438_v62 = vld [vmem:[%s5122_s2 + $0xb0] sm:$0xf0] }
 0x20c   :  { %3535 = vpow2.f32 %v2812_v0  ;;  %v3002_v0 = vor.u32 %v3438_v62, %v3001_v61 }
 0x20e   :  { %v721_v11 = vpop.f32.mrf.mxu2  ;;  %v734_v12 = vpop.f32.mrf.mxu3  ;;  %1228 = vmatpush.bf16.msrb.mxu0 %v3002_v0 }
 0x20f   :  { %v2997_v11 = vld [vmem:[%s5122_s2 + $0x98] sm:$0xf]  ;;  %v3436_v12 = vld [vmem:[%s5122_s2 + $0xa0] sm:$0xf0] }
 0x210   :  { %v2998_v14 = vor.u32 %v3436_v12, %v2997_v11  ;;  %v3417_v11 = vld [vmem:[%s5122_s2 + $0x8] sm:$0xf0] }
 0x211   :  { %v3534_v22 = vpop.eup %3533 }
 0x212   :  { %v3536_v23 = vpop.eup %3535  ;;  %v754_v24 = vadd.f32 1.0, %v3534_v22  ;;  %1229 = vmatpush.bf16.msrb.mxu0 %v2990_v9  ;;  %1255 = vmatpush.bf16.msrb.mxu2 %v2998_v14  ;;  %v3433_v22 = vld [vmem:[%s5122_s2 + $0x88] sm:$0xf0]  ;;  %v2918_v14 = vor.u32 %v3417_v11, %v2917_v10 }
 0x213   :  { %v778_v26 = vadd.f32 1.0, %v3536_v23  ;;  %v2982_v23 = vor.u32 %v3431_v18, %v2979_v20  ;;  %v3421_v9 = vld [vmem:[%s5122_s2 + $0x28] sm:$0xf0]  ;;  %v2925_v18 = vld [vmem:[%s5122_s2 + $0x8] sm:$0xf] }
 0x214   :  { %3537 = vrcp.f32 %v754_v24  ;;  %v766_v36 = vand.u32 2147483648, %v754_v24  ;;  %v764_v39 = vand.u32 2147483647, %v754_v24  ;;  %vm760_vm1 = vweird.f32 %v754_v24 }
 0x215   :  { %3539 = vrcp.f32 %v778_v26  ;;  %v790_v51 = vand.u32 2147483648, %v778_v26  ;;  %vm784_vm5 = vweird.f32 %v778_v26  ;;  %v788_v52 = vand.u32 2147483647, %v778_v26 }
 0x216   :  { %v767_v44 = vor.u32 1.1754944e-38, %v766_v36  ;;  %vm765_vm3 = vcmp.eq.f32.partialorder %v764_v39, 8.507059e+37  ;;  %1230 = vmatpush.bf16.msrb.mxu0 %v2978_v19  ;;  %v3418_v19 = vld [vmem:[%s5122_s2 + $0x10] sm:$0xf0] }
 0x217   :  { %v791_v55 = vor.u32 1.1754944e-38, %v790_v51  ;;  %vm789_vm7 = vcmp.eq.f32.partialorder %v788_v52, 8.507059e+37  ;;  %v2941_v52 = vld [vmem:[%s5122_s2 + $0x30] sm:$0xf] }
 0x21a   :  { %v3538_v30 = vpop.eup %3537 }
 0x21b   :  { %v3540_v31 = vpop.eup %3539  ;;  %v756_v32 = vmul.f32 %v3538_v30, %v754_v24  ;;  %vm761_vm0 = vweird.f32 %v3538_v30  ;;  %v2986_v24 = vor.u32 %v3433_v22, %v2985_v21  ;;  %v2926_v22 = vor.u32 %v3418_v19, %v2925_v18  ;;  %v3457_v18 = vld [vmem:[%s5122_s2 + $0x88] sm:$0xf0] }
 0x21c   :  { %v780_v33 = vmul.f32 %v3540_v31, %v778_v26  ;;  %vm762_vm2 = vmor %vm760_vm1, %vm761_vm0  ;;  %vm785_vm4 = vweird.f32 %v3540_v31  ;;  %v2965_v26 = vld [vmem:[%s5122_s2 + $0x60] sm:$0xf] }
 0x21d   :  { %v757_v34 = vsub.f32 1.0, %v756_v32  ;;  %vm786_vm6 = vmor %vm784_vm5, %vm785_vm4  ;;  %1256 = vmatpush.bf16.msrb.mxu2 %v2986_v24  ;;  %v2973_v32 = vld [vmem:[%s5122_s2 + $0x68] sm:$0xf] }
 0x21e   :  { %v781_v37 = vsub.f32 1.0, %v780_v33  ;;  %v3430_v33 = vld [vmem:[%s5122_s2 + $0x70] sm:$0xf0] }
 0x21f   :  { %v758_v38 = vmul.f32 %v3538_v30, %v757_v34  ;;  %v1030_v34 = vrot.slane %v2813_v15, 4  ;;  %v3416_v15 = vld [vmem:[%s5122_s2 + $0x4] sm:$0xf] }
 0x220   :  { %v782_v40 = vmul.f32 %v3540_v31, %v781_v37  ;;  %v2974_v37 = vor.u32 %v3430_v33, %v2973_v32  ;;  %v2922_v17 = vor.u32 %v3416_v15, %v2919_v16  ;;  %v3079_v16 = vld [vmem:[%s5122_s2 + $0x84] sm:$0xf0] }
 0x221   :  { %v759_v43 = vadd.f32 %v3538_v30, %v758_v38 }
 0x222   :  { %v783_v49 = vadd.f32 %v3540_v31, %v782_v40  ;;  %1257 = vmatpush.bf16.msrb.mxu2 %v2974_v37  ;;  %v2953_v40 = vld [vmem:[%s5122_s2 + $0x48] sm:$0xf] }
 0x223   :  { %v763_v46 = vsel %vm762_vm2, %v3538_v30, %v759_v43  ;;  %v2966_v30 = vor.u32 %v3429_v27, %v2965_v26  ;;  %v2954_v43 = vor.u32 %v3426_v42, %v2953_v40 }
 0x224   :  { %v768_v48 = vsel %vm765_vm3, %v767_v44, %v763_v46  ;;  %v787_v54 = vsel %vm786_vm6, %v3540_v31, %v783_v49  ;;  %v2967_v31 = vld [vmem:[%s5122_s2 + $0x6c] sm:$0xf0]  ;;  %v3425_v44 = vld [vmem:[%s5122_s2 + $0x4c] sm:$0xf] }
 0x225   :  { %v795_v50 = vmul.f32 %v794_v45, %v768_v48  ;;  %v792_v56 = vsel %vm789_vm7, %v791_v55, %v787_v54  ;;  %v2970_v36 = vor.u32 %v3428_v29, %v2967_v31  ;;  %1231 = vmatpush.bf16.msrb.mxu0 %v2966_v30  ;;  %v2955_v45 = vld [vmem:[%s5122_s2 + $0x54] sm:$0xf0]  ;;  %v2961_v46 = vld [vmem:[%s5122_s2 + $0x50] sm:$0xf]  ;;  %v1032_v48 = vunpack.c.l.bf16 %v1030_v34  ;;  %v3422_v54 = vld [vmem:[%s5122_s2 + $0x34] sm:$0xf] }
 0x226   :  { %v799_v57 = vsub.f32 1.0, %v792_v56  ;;  %v801_v35 = vmul.f32 %v792_v56, %v4104_v63  ;;  %v3437_v63 = vld [vmem:[%s5122_s2 + $0xac] sm:$0xf]  ;;  %v2958_v49 = vor.u32 %v3425_v44, %v2955_v45 }
 0x227   :  { %v797_v53 = vadd.f32 %v796_v47, %v795_v50  ;;  %v3006_v5 = vor.u32 %v3437_v63, %v3003_v1  ;;  %v3427_v50 = vld [vmem:[%s5122_s2 + $0x58] sm:$0xf0]  ;;  %v2929_v1 = vld [vmem:[%s5122_s2 + $0x18] sm:$0xf]  ;;  %v2814_v30 = vld [vmem:[%s5125_s0 + $0x2c] sm:$0xf] }
 0x228   :  { %v2962_v51 = vor.u32 %v3427_v50, %v2961_v46  ;;  %v2930_v4 = vor.u32 %v3420_v2, %v2929_v1  ;;  %v2913_v1 = vld [vmem:[%s5125_s0 + $0x30] sm:$0xff] }
 0x229   :  { %3541 = vtanh.f32 %v797_v53  ;;  %1241 = vmatpush.bf16.msrb.mxu1 %v3006_v5  ;;  %1232 = vmatpush.bf16.msrb.mxu0 %v2954_v43  ;;  %v3423_v53 = vld [vmem:[%s5122_s2 + $0x38] sm:$0xf0]  ;;  %v3089_v2 = vld [vmem:[%s5122_s2 + $0x90] sm:$0xf]  ;;  %v1289_v11 = vrot.slane %v2913_v1, 4 }
 0x22a   :  { %1258 = vmatpush.bf16.msrb.mxu2 %v2962_v51  ;;  %v2942_v56 = vor.u32 %v3423_v53, %v2941_v52  ;;  %v3419_v5 = vld [vmem:[%s5122_s2 + $0x1c] sm:$0xf] }
 0x22b   :  { %v2934_v8 = vor.u32 %v3419_v5, %v2931_v6  ;;  %v3458_v5 = vld [vmem:[%s5122_s2 + $0x94] sm:$0xf] }
 0x22d   :  { %1242 = vmatpush.bf16.msrb.mxu1 %v2994_v13  ;;  %1233 = vmatpush.bf16.msrb.mxu0 %v2942_v56  ;;  %v2938_v13 = vor.u32 %v3421_v9, %v2937_v7  ;;  %v3091_v7 = vld [vmem:[%s5122_s2 + $0x9c] sm:$0xf0] }
 0x22e   :  { %v3094_v9 = vor.u32 %v3458_v5, %v3091_v7  ;;  %v3017_v7 = vld [vmem:[%s5122_s2] sm:$0xf] }
 0x22f   :  { %v3542_v58 = vpop.eup %3541 }
 0x230   :  { %v800_v28 = vmul.f32 %v3542_v58, %v799_v57  ;;  %v2943_v57 = vld [vmem:[%s5122_s2 + $0x3c] sm:$0xf0]  ;;  %v2949_v58 = vld [vmem:[%s5122_s2 + $0x38] sm:$0xf] }
 0x231   :  { %1243 = vmatpush.bf16.msrb.mxu1 %v2982_v23  ;;  %v2946_v61 = vor.u32 %v3422_v54, %v2943_v57  ;;  %1234 = vmatpush.bf16.msrb.mxu0 %v2930_v4  ;;  %v3459_v4 = vld [vmem:[%s5122_s2 + $0x98] sm:$0xf0] }
 0x232   :  { %v4264_v59 = vadd.f32 %v801_v35, %v800_v28  ;;  %v3424_v28 = vld [vmem:[%s5122_s2 + $0x40] sm:$0xf0]  ;;  %v3090_v6 = vor.u32 %v3459_v4, %v3089_v2  ;;  %v3445_v2 = vld [vmem:[%s5122_s2 + $0x28] sm:$0xf0] }
 0x233   :  { %v2950_v62 = vor.u32 %v3424_v28, %v2949_v58  ;;  %v3101_v58 = vld [vmem:[%s5122_s2 + $0xa8] sm:$0xf]  ;;  %v3462_v28 = vld [vmem:[%s5122_s2 + $0xb0] sm:$0xf0] }
 0x234   :  { %804 = vst [vmem:[#allocation2 + $0x10] sm:$0xff] %v4264_v59  ;;  %v808_v60 = vpack.c.bf16 %v4264_v59, %v4264_v59 }
 0x235   :  { %1244 = vmatpush.bf16.msrb.mxu1 %v2970_v36  ;;  %1259 = vmatpush.bf16.msrb.mxu2 %v2950_v62  ;;  %v3463_v62 = vld [vmem:[%s5122_s2 + $0xb8] sm:$0xf0] }
 0x236   :  { %977 = vmatmul.bf16.vlgmr.msra.gmra.mxu1 %v808_v60  ;;  %990 = vmatmul.bf16.vlgmr.msra.gmra.mxu2 %v808_v60 }
 0x237   :  { %1003 = vmatmul.bf16.vlgmr.msra.gmra.mxu3 %v808_v60  ;;  %1235 = vmatpush.bf16.msrb.mxu0 %v2918_v14  ;;  %v3455_v14 = vld [vmem:[%s5122_s2 + $0x7c] sm:$0xf] }
 0x238   :  { %v3082_v19 = vor.u32 %v3455_v14, %v3079_v16  ;;  %v3442_v16 = vld [vmem:[%s5122_s2 + $0x10] sm:$0xf0] }
 0x239   :  { %1245 = vmatpush.bf16.msrb.mxu1 %v2958_v49  ;;  %1260 = vmatpush.bf16.msrb.mxu2 %v2938_v13  ;;  %v3456_v13 = vld [vmem:[%s5122_s2 + $0x80] sm:$0xf0] }
 0x23d   :  { %1246 = vmatpush.bf16.msrb.mxu1 %v2946_v61  ;;  %1261 = vmatpush.bf16.msrb.mxu2 %v2926_v22  ;;  %v3109_v61 = vld [vmem:[%s5122_s2 + $0xb0] sm:$0xf]  ;;  %v1291_v22 = vunpack.c.l.bf16 %v1289_v11 }
 0x241   :  { %1247 = vmatpush.bf16.msrb.mxu1 %v2934_v8  ;;  %v3460_v8 = vld [vmem:[%s5122_s2 + $0xa0] sm:$0xf0] }
 0x245   :  { %1248 = vmatpush.bf16.msrb.mxu1 %v2922_v17  ;;  %v3085_v17 = vld [vmem:[%s5122_s2 + $0x80] sm:$0xf] }
 0x2b3   :  { %v978_v38 = vpop.f32.mrf.mxu1 }
 0x2b4   :  { %v1009_v39 = vadd.f32 %v1008_v25, %v978_v38  ;;  %v1055_v38 = vunpack.c.l.bf16 %v2814_v30  ;;  %v3454_v30 = vld [vmem:[%s5122_s2 + $0x70] sm:$0xf0] }
 0x2b6   :  { %v2911_v47 = vmul.f32 -1.442695, %v1009_v39 }
 0x2b8   :  { %3543 = vpow2.f32 %v2911_v47 }
 0x2b9   :  { %v991_v55 = vpop.f32.mrf.mxu2 }
 0x2ba   :  { %v1033_v35 = vadd.f32 %v1032_v48, %v991_v55  ;;  %v1004_v60 = vpop.f32.mrf.mxu3 }
 0x2bb   :  { %v980_v63 = vpop.f32.mrf.mxu1  ;;  %v1053_v42 = vadd.f32 %v3926_v41, %v1004_v60  ;;  %v3103_v60 = vld [vmem:[%s5122_s2 + $0xb4] sm:$0xf0] }
 0x2bc   :  { %v2912_v0 = vmul.f32 -1.442695, %v1033_v35  ;;  %v3102_v35 = vor.u32 %v3462_v28, %v3101_v58 }
 0x2be   :  { %v3544_v3 = vpop.eup %3543  ;;  %3545 = vpow2.f32 %v2912_v0  ;;  %v3110_v0 = vor.u32 %v3463_v62, %v3109_v61  ;;  %1487 = vmatpush.bf16.msrb.mxu3 %v3102_v35  ;;  %v3444_v61 = vld [vmem:[%s5122_s2 + $0x20] sm:$0xf0]  ;;  %v3443_v62 = vld [vmem:[%s5122_s2 + $0x1c] sm:$0xf] }
 0x2bf   :  { %v1013_v12 = vadd.f32 1.0, %v3544_v3  ;;  %v3097_v3 = vld [vmem:[%s5122_s2 + $0x98] sm:$0xf] }
 0x2c0   :  { %1513 = vmatpush.bf16.msra.mxu1 %v3110_v0  ;;  %v3098_v10 = vor.u32 %v3460_v8, %v3097_v3  ;;  %v3031_v0 = vld [vmem:[%s5122_s2 + $0x24] sm:$0xf0]  ;;  %v3441_v3 = vld [vmem:[%s5122_s2 + $0x8] sm:$0xf0]  ;;  %v3440_v8 = vld [vmem:[%s5122_s2 + $0x4] sm:$0xf] }
 0x2c1   :  { %3547 = vrcp.f32 %v1013_v12  ;;  %v993_v20 = vpop.f32.mrf.mxu2  ;;  %v1025_v29 = vand.u32 2147483648, %v1013_v12  ;;  %v1023_v32 = vand.u32 2147483647, %v1013_v12  ;;  %vm1019_vm9 = vweird.f32 %v1013_v12 }
 0x2c2   :  { %v1006_v21 = vpop.f32.mrf.mxu3  ;;  %1488 = vmatpush.bf16.msrb.mxu3 %v3090_v6  ;;  %v3086_v20 = vor.u32 %v3457_v18, %v3085_v17  ;;  %v3034_v5 = vor.u32 %v3443_v62, %v3031_v0  ;;  %v3018_v11 = vor.u32 %v3441_v3, %v3017_v7  ;;  %v3189_v62 = vld [vmem:[%s5122_s2 + $0x90] sm:$0xf]  ;;  %v3482_v0 = vld [vmem:[%s5122_s2 + $0x94] sm:$0xf] }
 0x2c3   :  { %v1026_v37 = vor.u32 1.1754944e-38, %v1025_v29  ;;  %vm1024_vm11 = vcmp.eq.f32.partialorder %v1023_v32, 8.507059e+37  ;;  %v1267_v21 = vunpack.c.l.bf16 %v2913_v1  ;;  %v3073_v29 = vld [vmem:[%s5122_s2 + $0x68] sm:$0xf]  ;;  %v3037_v1 = vld [vmem:[%s5122_s2 + $0x20] sm:$0xf] }
 0x2c4   :  { %v3546_v23 = vpop.eup %3545  ;;  %1514 = vmatpush.bf16.msra.mxu1 %v3098_v10  ;;  %v3074_v32 = vor.u32 %v3454_v30, %v3073_v29  ;;  %v3038_v6 = vor.u32 %v3445_v2, %v3037_v1  ;;  %v2914_v30 = vld [vmem:[%s5125_s0 + $0x38] sm:$0xf]  ;;  %v3191_v2 = vld [vmem:[%s5122_s2 + $0x9c] sm:$0xf0] }
 0x2c5   :  { %v1037_v24 = vadd.f32 1.0, %v3546_v23  ;;  %v3065_v23 = vld [vmem:[%s5122_s2 + $0x60] sm:$0xf]  ;;  %v3194_v7 = vor.u32 %v3482_v0, %v3191_v2 }
 0x2c7   :  { %v3548_v25 = vpop.eup %3547  ;;  %3549 = vrcp.f32 %v1037_v24  ;;  %v1049_v45 = vand.u32 2147483648, %v1037_v24  ;;  %v1047_v47 = vand.u32 2147483647, %v1037_v24  ;;  %vm1043_vm13 = vweird.f32 %v1037_v24 }
 0x2c8   :  { %v1015_v26 = vmul.f32 %v3548_v25, %v1013_v12  ;;  %vm1020_vm8 = vweird.f32 %v3548_v25  ;;  %v3077_v12 = vld [vmem:[%s5122_s2 + $0x78] sm:$0xf]  ;;  %1515 = vmatpush.bf16.msra.mxu1 %v3086_v20 }
 0x2c9   :  { %vm1021_vm10 = vmor %vm1019_vm9, %vm1020_vm8  ;;  %v1050_v50 = vor.u32 1.1754944e-38, %v1049_v45  ;;  %vm1048_vm15 = vcmp.eq.f32.partialorder %v1047_v47, 8.507059e+37  ;;  %v3078_v15 = vor.u32 %v3456_v13, %v3077_v12  ;;  %v3451_v45 = vld [vmem:[%s5122_s2 + $0x58] sm:$0xf0]  ;;  %v3019_v12 = vld [vmem:[%s5122_s2 + $0xc] sm:$0xf0] }
 0x2ca   :  { %v1016_v27 = vsub.f32 1.0, %v1015_v26  ;;  %v3022_v14 = vor.u32 %v3440_v8, %v3019_v12  ;;  %v3177_v8 = vld [vmem:[%s5122_s2 + $0x78] sm:$0xf] }
 0x2cb   :  { %1489 = vmatpush.bf16.msrb.mxu3 %v3078_v15  ;;  %v3025_v15 = vld [vmem:[%s5122_s2 + $0x8] sm:$0xf] }
 0x2cc   :  { %v1017_v31 = vmul.f32 %v3548_v25, %v1016_v27  ;;  %v3067_v27 = vld [vmem:[%s5122_s2 + $0x6c] sm:$0xf0]  ;;  %1516 = vmatpush.bf16.msra.mxu1 %v3074_v32  ;;  %v3026_v18 = vor.u32 %v3442_v16, %v3025_v15  ;;  %v3481_v15 = vld [vmem:[%s5122_s2 + $0x88] sm:$0xf0] }
 0x2cd   :  { %v3550_v33 = vpop.eup %3549 }
 0x2ce   :  { %v1039_v34 = vmul.f32 %v3550_v33, %v1037_v24  ;;  %v1018_v36 = vadd.f32 %v3548_v25, %v1017_v31  ;;  %vm1044_vm12 = vweird.f32 %v3550_v33  ;;  %v3453_v24 = vld [vmem:[%s5122_s2 + $0x68] sm:$0xf0] }
 0x2cf   :  { %vm1045_vm14 = vmor %vm1043_vm13, %vm1044_vm12  ;;  %v3066_v26 = vor.u32 %v3453_v24, %v3065_v23 }
 0x2d0   :  { %v1040_v39 = vsub.f32 1.0, %v1039_v34  ;;  %v1022_v40 = vsel %vm1021_vm10, %v3548_v25, %v1018_v36  ;;  %v3452_v25 = vld [vmem:[%s5122_s2 + $0x64] sm:$0xf] }
 0x2d1   :  { %v1027_v43 = vsel %vm1024_vm11, %v1026_v37, %v1022_v40  ;;  %v3070_v31 = vor.u32 %v3452_v25, %v3067_v27  ;;  %1490 = vmatpush.bf16.msrb.mxu3 %v3066_v26  ;;  %v3449_v40 = vld [vmem:[%s5122_s2 + $0x4c] sm:$0xf] }
 0x2d2   :  { %v1041_v44 = vmul.f32 %v3550_v33, %v1040_v39  ;;  %v1054_v46 = vmul.f32 %v1053_v42, %v1027_v43  ;;  %v3450_v39 = vld [vmem:[%s5122_s2 + $0x50] sm:$0xf0]  ;;  %v3055_v43 = vld [vmem:[%s5122_s2 + $0x54] sm:$0xf0] }
 0x2d4   :  { %v1042_v48 = vadd.f32 %v3550_v33, %v1041_v44  ;;  %v1056_v49 = vadd.f32 %v1055_v38, %v1054_v46  ;;  %v3053_v38 = vld [vmem:[%s5122_s2 + $0x48] sm:$0xf]  ;;  %v3061_v44 = vld [vmem:[%s5122_s2 + $0x50] sm:$0xf] }
 0x2d5   :  { %v3054_v42 = vor.u32 %v3450_v39, %v3053_v38 }
 0x2d6   :  { %v1046_v51 = vsel %vm1045_vm14, %v3550_v33, %v1042_v48  ;;  %3551 = vtanh.f32 %v1056_v49  ;;  %v3058_v48 = vor.u32 %v3449_v40, %v3055_v43  ;;  %v3062_v49 = vor.u32 %v3451_v45, %v3061_v44 }
 0x2d7   :  { %v1051_v52 = vsel %vm1048_vm15, %v1050_v50, %v1046_v51  ;;  %1491 = vmatpush.bf16.msrb.mxu3 %v3054_v42  ;;  %v3041_v50 = vld [vmem:[%s5122_s2 + $0x30] sm:$0xf]  ;;  %v3447_v51 = vld [vmem:[%s5122_s2 + $0x38] sm:$0xf0] }
 0x2d8   :  { %v1058_v53 = vsub.f32 1.0, %v1051_v52  ;;  %v1060_v41 = vmul.f32 %v1051_v52, %v4264_v59  ;;  %v3461_v59 = vld [vmem:[%s5122_s2 + $0xac] sm:$0xf]  ;;  %1517 = vmatpush.bf16.msra.mxu1 %v3062_v49  ;;  %v3446_v52 = vld [vmem:[%s5122_s2 + $0x34] sm:$0xf] }
 0x2d9   :  { %v3106_v63 = vor.u32 %v3461_v59, %v3103_v60  ;;  %v3029_v60 = vld [vmem:[%s5122_s2 + $0x18] sm:$0xf] }
 0x2db   :  { %1500 = vmatpush.bf16.msra.mxu0 %v3106_v63  ;;  %v3030_v63 = vor.u32 %v3444_v61, %v3029_v60 }
 0x2dc   :  { %v3552_v54 = vpop.eup %3551 }
 0x2dd   :  { %v1059_v55 = vmul.f32 %v3552_v54, %v1058_v53  ;;  %v3042_v53 = vor.u32 %v3447_v51, %v3041_v50  ;;  %v3043_v54 = vld [vmem:[%s5122_s2 + $0x3c] sm:$0xf0] }
 0x2de   :  { %v3046_v58 = vor.u32 %v3446_v52, %v3043_v54  ;;  %v4591_v54 = vld [vmem:[%s5125_s0 + $0x3c] sm:$0xff] }
 0x2df   :  { %v4421_v56 = vadd.f32 %v1060_v41, %v1059_v55  ;;  %1501 = vmatpush.bf16.msra.mxu0 %v3094_v9  ;;  %v3049_v55 = vld [vmem:[%s5122_s2 + $0x38] sm:$0xf]  ;;  %v3448_v41 = vld [vmem:[%s5122_s2 + $0x40] sm:$0xf0]  ;;  %1492 = vmatpush.bf16.msrb.mxu3 %v3042_v53 }
 0x2e0   :  { %v3050_v28 = vor.u32 %v3448_v41, %v3049_v55  ;;  %v3201_v55 = vld [vmem:[%s5122_s2 + $0xa8] sm:$0xf]  ;;  %v3485_v41 = vld [vmem:[%s5122_s2 + $0xac] sm:$0xf] }
 0x2e1   :  { %1063 = vst [vmem:[#allocation2 + $0x18] sm:$0xff] %v4421_v56  ;;  %v1067_v57 = vpack.c.bf16 %v4421_v56, %v4421_v56 }
 0x2e2   :  { %1518 = vmatpush.bf16.msra.mxu1 %v3050_v28  ;;  %v3209_v28 = vld [vmem:[%s5122_s2 + $0xb0] sm:$0xf] }
 0x2e3   :  { %1236 = vmatmul.bf16.vlgmr.msrb.gmra.mxu0 %v1067_v57  ;;  %1249 = vmatmul.bf16.vlgmr.msrb.gmra.mxu1 %v1067_v57 }
 0x2e4   :  { %1262 = vmatmul.bf16.vlgmr.msrb.gmra.mxu2 %v1067_v57  ;;  %1502 = vmatpush.bf16.msra.mxu0 %v3082_v19 }
 0x2e5   :  { %1493 = vmatpush.bf16.msrb.mxu3 %v3030_v63  ;;  %v3483_v63 = vld [vmem:[%s5122_s2 + $0x98] sm:$0xf0] }
 0x2e6   :  { %1519 = vmatpush.bf16.msra.mxu1 %v3038_v6  ;;  %v3190_v1 = vor.u32 %v3483_v63, %v3189_v62  ;;  %v3137_v62 = vld [vmem:[%s5122_s2 + $0x20] sm:$0xf]  ;;  %v3469_v63 = vld [vmem:[%s5122_s2 + $0x28] sm:$0xf0] }
 0x2e8   :  { %1503 = vmatpush.bf16.msra.mxu0 %v3070_v31 }
 0x2e9   :  { %1494 = vmatpush.bf16.msrb.mxu3 %v3018_v11 }
 0x2ea   :  { %1520 = vmatpush.bf16.msra.mxu1 %v3026_v18 }
 0x2ec   :  { %1504 = vmatpush.bf16.msra.mxu0 %v3058_v48 }
 0x2f0   :  { %1505 = vmatpush.bf16.msra.mxu0 %v3046_v58  ;;  %v3203_v58 = vld [vmem:[%s5122_s2 + $0xb4] sm:$0xf0] }
 0x2f1   :  { %v3206_v60 = vor.u32 %v3485_v41, %v3203_v58  ;;  %v3129_v58 = vld [vmem:[%s5122_s2 + $0x18] sm:$0xf] }
 0x2f3   :  { %1759 = vmatpush.bf16.msra.mxu3 %v3206_v60  ;;  %v3467_v60 = vld [vmem:[%s5122_s2 + $0x1c] sm:$0xf] }
 0x2f4   :  { %1506 = vmatpush.bf16.msra.mxu0 %v3034_v5  ;;  %v3484_v5 = vld [vmem:[%s5122_s2 + $0xa0] sm:$0xf0] }
 0x2f7   :  { %1760 = vmatpush.bf16.msra.mxu3 %v3194_v7  ;;  %v3464_v7 = vld [vmem:[%s5122_s2 + $0x4] sm:$0xf] }
 0x2f8   :  { %1507 = vmatpush.bf16.msra.mxu0 %v3022_v14  ;;  %v3185_v14 = vld [vmem:[%s5122_s2 + $0x80] sm:$0xf] }
 0x360   :  { %v1237_v33 = vpop.f32.mrf.mxu0  ;;  %v1250_v34 = vpop.f32.mrf.mxu1 }
 0x361   :  { %v1268_v36 = vadd.f32 %v1267_v21, %v1237_v33  ;;  %v1292_v37 = vadd.f32 %v1291_v22, %v1250_v34  ;;  %v4579_v34 = vld [vmem:[%s5124_s3] ss:$0 sm:$0xff] }
 0x363   :  { %v3011_v46 = vmul.f32 -1.442695, %v1268_v36  ;;  %v3012_v47 = vmul.f32 -1.442695, %v1292_v37  ;;  %v1314_v37 = vunpack.c.l.bf16 %v2914_v30  ;;  %v3478_v30 = vld [vmem:[%s5122_s2 + $0x70] sm:$0xf0] }
 0x365   :  { %3553 = vpow2.f32 %v3011_v46 }
 0x366   :  { %3555 = vpow2.f32 %v3012_v47 }
 0x367   :  { %v1263_v57 = vpop.f32.mrf.mxu2 }
 0x368   :  { %v1239_v59 = vpop.f32.mrf.mxu0  ;;  %v1252_v35 = vpop.f32.mrf.mxu1  ;;  %v1312_v36 = vadd.f32 %v4579_v34, %v1263_v57 }
 0x369   :  { %v3487_v59 = vld [vmem:[%s5122_s2 + $0xb8] sm:$0xf0]  ;;  %v1548_v35 = vrot.slane %v4591_v54, 4 }
 0x36a   :  { %v3210_v61 = vor.u32 %v3487_v59, %v3209_v28  ;;  %v3468_v28 = vld [vmem:[%s5122_s2 + $0x20] sm:$0xf0] }
 0x36b   :  { %v3554_v4 = vpop.eup %3553  ;;  %v1550_v6 = vunpack.c.l.bf16 %v1548_v35 }
 0x36c   :  { %v3556_v9 = vpop.eup %3555  ;;  %v1272_v10 = vadd.f32 1.0, %v3554_v4  ;;  %1772 = vmatpush.bf16.msrb.mxu0 %v3210_v61  ;;  %v3197_v4 = vld [vmem:[%s5122_s2 + $0x98] sm:$0xf]  ;;  %v3131_v61 = vld [vmem:[%s5122_s2 + $0x24] sm:$0xf0] }
 0x36d   :  { %v1296_v13 = vadd.f32 1.0, %v3556_v9  ;;  %v3198_v3 = vor.u32 %v3484_v5, %v3197_v4  ;;  %v3480_v9 = vld [vmem:[%s5122_s2 + $0x80] sm:$0xf0]  ;;  %v3134_v2 = vor.u32 %v3467_v60, %v3131_v61  ;;  %v3117_v4 = vld [vmem:[%s5122_s2] sm:$0xf] }
 0x36e   :  { %3557 = vrcp.f32 %v1272_v10  ;;  %v1284_v25 = vand.u32 2147483648, %v1272_v10  ;;  %v1282_v27 = vand.u32 2147483647, %v1272_v10  ;;  %vm1278_vm1 = vweird.f32 %v1272_v10  ;;  %v3465_v5 = vld [vmem:[%s5122_s2 + $0x8] sm:$0xf0] }
 0x36f   :  { %3559 = vrcp.f32 %v1296_v13  ;;  %v1265_v17 = vpop.f32.mrf.mxu2  ;;  %v1308_v40 = vand.u32 2147483648, %v1296_v13  ;;  %vm1302_vm5 = vweird.f32 %v1296_v13  ;;  %v1306_v43 = vand.u32 2147483647, %v1296_v13  ;;  %v3291_v61 = vld [vmem:[%s5122_s2 + $0x9c] sm:$0xf0] }
 0x370   :  { %v1285_v32 = vor.u32 1.1754944e-38, %v1284_v25  ;;  %vm1283_vm3 = vcmp.eq.f32.partialorder %v1282_v27, 8.507059e+37  ;;  %1773 = vmatpush.bf16.msrb.mxu0 %v3198_v3  ;;  %v3178_v12 = vor.u32 %v3480_v9, %v3177_v8  ;;  %v3476_v25 = vld [vmem:[%s5122_s2 + $0x64] sm:$0xf]  ;;  %v3173_v27 = vld [vmem:[%s5122_s2 + $0x68] sm:$0xf] }
 0x371   :  { %v1309_v46 = vor.u32 1.1754944e-38, %v1308_v40  ;;  %vm1307_vm7 = vcmp.eq.f32.partialorder %v1306_v43, 8.507059e+37  ;;  %v3161_v40 = vld [vmem:[%s5122_s2 + $0x50] sm:$0xf]  ;;  %v3125_v9 = vld [vmem:[%s5122_s2 + $0x8] sm:$0xf] }
 0x372   :  { %v3119_v3 = vld [vmem:[%s5122_s2 + $0xc] sm:$0xf0] }
 0x374   :  { %v3558_v19 = vpop.eup %3557 }
 0x375   :  { %v3560_v20 = vpop.eup %3559  ;;  %v1274_v21 = vmul.f32 %v3558_v19, %v1272_v10  ;;  %vm1279_vm0 = vweird.f32 %v3558_v19  ;;  %v3479_v10 = vld [vmem:[%s5122_s2 + $0x7c] sm:$0xf] }
 0x376   :  { %v1298_v22 = vmul.f32 %v3560_v20, %v1296_v13  ;;  %vm1280_vm2 = vmor %vm1278_vm1, %vm1279_vm0  ;;  %vm1303_vm4 = vweird.f32 %v3560_v20  ;;  %v3179_v13 = vld [vmem:[%s5122_s2 + $0x84] sm:$0xf0] }
 0x377   :  { %v1275_v23 = vsub.f32 1.0, %v1274_v21  ;;  %vm1304_vm6 = vmor %vm1302_vm5, %vm1303_vm4  ;;  %v3182_v18 = vor.u32 %v3479_v10, %v3179_v13  ;;  %v1526_v21 = vunpack.c.l.bf16 %v4591_v54  ;;  %v3149_v54 = vld [vmem:[%s5122_s2 + $0x38] sm:$0xf]  ;;  %v3466_v10 = vld [vmem:[%s5122_s2 + $0x10] sm:$0xf0]  ;;  %v3122_v13 = vor.u32 %v3464_v7, %v3119_v3 }
 0x378   :  { %v1299_v24 = vsub.f32 1.0, %v1298_v22  ;;  %v3165_v22 = vld [vmem:[%s5122_s2 + $0x60] sm:$0xf]  ;;  %v3279_v3 = vld [vmem:[%s5122_s2 + $0x84] sm:$0xf0] }
 0x379   :  { %v1276_v26 = vmul.f32 %v3558_v19, %v1275_v23  ;;  %1761 = vmatpush.bf16.msra.mxu3 %v3182_v18  ;;  %v3477_v23 = vld [vmem:[%s5122_s2 + $0x68] sm:$0xf0] }
 0x37a   :  { %v1300_v29 = vmul.f32 %v3560_v20, %v1299_v24  ;;  %v3166_v24 = vor.u32 %v3477_v23, %v3165_v22 }
 0x37b   :  { %v1277_v31 = vadd.f32 %v3558_v19, %v1276_v26  ;;  %v3167_v26 = vld [vmem:[%s5122_s2 + $0x6c] sm:$0xf0] }
 0x37c   :  { %v1301_v38 = vadd.f32 %v3560_v20, %v1300_v29  ;;  %v3170_v29 = vor.u32 %v3476_v25, %v3167_v26  ;;  %v3014_v26 = vld [vmem:[%s5125_s0 + $0x44] sm:$0xf] }
 0x37d   :  { %v1281_v33 = vsel %vm1280_vm2, %v3558_v19, %v1277_v31  ;;  %v3186_v19 = vor.u32 %v3481_v15, %v3185_v14  ;;  %v3153_v31 = vld [vmem:[%s5122_s2 + $0x48] sm:$0xf]  ;;  %v3126_v14 = vor.u32 %v3466_v10, %v3125_v9  ;;  %v3505_v9 = vld [vmem:[%s5122_s2 + $0x88] sm:$0xf0] }
 0x37e   :  { %v1286_v39 = vsel %vm1283_vm3, %v1285_v32, %v1281_v33  ;;  %v1305_v45 = vsel %vm1304_vm6, %v3560_v20, %v1301_v38  ;;  %v3474_v32 = vld [vmem:[%s5122_s2 + $0x50] sm:$0xf0]  ;;  %v3473_v38 = vld [vmem:[%s5122_s2 + $0x4c] sm:$0xf]  ;;  %1762 = vmatpush.bf16.msra.mxu3 %v3170_v29 }
 0x37f   :  { %v1313_v42 = vmul.f32 %v1312_v36, %v1286_v39  ;;  %v1310_v47 = vsel %vm1307_vm7, %v1309_v46, %v1305_v45  ;;  %1774 = vmatpush.bf16.msrb.mxu0 %v3186_v19  ;;  %v3174_v36 = vor.u32 %v3478_v30, %v3173_v27  ;;  %v3155_v39 = vld [vmem:[%s5122_s2 + $0x54] sm:$0xf0]  ;;  %v3141_v45 = vld [vmem:[%s5122_s2 + $0x30] sm:$0xf]  ;;  %v3471_v46 = vld [vmem:[%s5122_s2 + $0x38] sm:$0xf0] }
 0x380   :  { %v1317_v48 = vsub.f32 1.0, %v1310_v47  ;;  %v1319_v51 = vmul.f32 %v1310_v47, %v4421_v56  ;;  %v3486_v56 = vld [vmem:[%s5122_s2 + $0xb0] sm:$0xf0]  ;;  %v3158_v43 = vor.u32 %v3473_v38, %v3155_v39 }
 0x381   :  { %v1315_v44 = vadd.f32 %v1314_v37, %v1313_v42  ;;  %v3202_v57 = vor.u32 %v3486_v56, %v3201_v55  ;;  %v3154_v37 = vor.u32 %v3474_v32, %v3153_v31  ;;  %v3472_v55 = vld [vmem:[%s5122_s2 + $0x40] sm:$0xf0]  ;;  %v3142_v56 = vor.u32 %v3471_v46, %v3141_v45 }
 0x382   :  { %1763 = vmatpush.bf16.msra.mxu3 %v3158_v43  ;;  %v3150_v35 = vor.u32 %v3472_v55, %v3149_v54  ;;  %v1573_v32 = vunpack.c.l.bf16 %v3014_v26  ;;  %v3303_v54 = vld [vmem:[%s5122_s2 + $0xb4] sm:$0xf0]  ;;  %v3309_v55 = vld [vmem:[%s5122_s2 + $0xb0] sm:$0xf]  ;;  %v3498_v26 = vld [vmem:[%s5122_s2 + $0x50] sm:$0xf0] }
 0x383   :  { %3561 = vtanh.f32 %v1315_v44  ;;  %1746 = vmatpush.bf16.msra.mxu2 %v3202_v57  ;;  %v3475_v44 = vld [vmem:[%s5122_s2 + $0x58] sm:$0xf0]  ;;  %1775 = vmatpush.bf16.msrb.mxu0 %v3174_v36 }
 0x387   :  { %1747 = vmatpush.bf16.msra.mxu2 %v3190_v1  ;;  %v3130_v1 = vor.u32 %v3468_v28, %v3129_v58  ;;  %v3113_v58 = vld [vmem:[%s5125_s0 + $0x48] sm:$0xff]  ;;  %v3289_v28 = vld [vmem:[%s5122_s2 + $0x90] sm:$0xf] }
 0x389   :  { %v3562_v49 = vpop.eup %3561 }
 0x38a   :  { %v1318_v50 = vmul.f32 %v3562_v49, %v1317_v48  ;;  %v3162_v48 = vor.u32 %v3475_v44, %v3161_v40  ;;  %v3470_v49 = vld [vmem:[%s5122_s2 + $0x34] sm:$0xf] }
 0x38b   :  { %1748 = vmatpush.bf16.msra.mxu2 %v3178_v12  ;;  %v3118_v12 = vor.u32 %v3465_v5, %v3117_v4  ;;  %v3277_v4 = vld [vmem:[%s5122_s2 + $0x78] sm:$0xf]  ;;  %v3504_v5 = vld [vmem:[%s5122_s2 + $0x80] sm:$0xf0] }
 0x38c   :  { %v4583_v52 = vadd.f32 %v1319_v51, %v1318_v50  ;;  %v3143_v50 = vld [vmem:[%s5122_s2 + $0x3c] sm:$0xf0]  ;;  %1776 = vmatpush.bf16.msrb.mxu0 %v3162_v48  ;;  %v3278_v7 = vor.u32 %v3504_v5, %v3277_v4  ;;  %v3490_v4 = vld [vmem:[%s5122_s2 + $0x10] sm:$0xf0] }
 0x38d   :  { %v3146_v57 = vor.u32 %v3470_v49, %v3143_v50  ;;  %v3301_v50 = vld [vmem:[%s5122_s2 + $0xa8] sm:$0xf] }
 0x38e   :  { %1322 = vst [vmem:[#allocation2 + $0x20] sm:$0xff] %v4583_v52  ;;  %v1326_v53 = vpack.c.bf16 %v4583_v52, %v4583_v52 }
 0x38f   :  { %1749 = vmatpush.bf16.msra.mxu2 %v3166_v24  ;;  %1764 = vmatpush.bf16.msra.mxu3 %v3146_v57 }
 0x390   :  { %1495 = vmatmul.bf16.vlgmr.msrb.gmra.mxu3 %v1326_v53  ;;  %1508 = vmatmul.bf16.vlgmr.msra.gmra.mxu0 %v1326_v53 }
 0x391   :  { %1521 = vmatmul.bf16.vlgmr.msra.gmra.mxu1 %v1326_v53  ;;  %1777 = vmatpush.bf16.msrb.mxu0 %v3150_v35  ;;  %v3506_v35 = vld [vmem:[%s5122_s2 + $0x94] sm:$0xf] }
 0x393   :  { %1750 = vmatpush.bf16.msra.mxu2 %v3154_v37  ;;  %1765 = vmatpush.bf16.msra.mxu3 %v3134_v2  ;;  %v1807_v2 = vrot.slane %v3113_v58, 4 }
 0x397   :  { %1751 = vmatpush.bf16.msra.mxu2 %v3142_v56  ;;  %1766 = vmatpush.bf16.msra.mxu3 %v3122_v13  ;;  %v3511_v56 = vld [vmem:[%s5122_s2 + $0xb8] sm:$0xf0]  ;;  %v1785_v13 = vunpack.c.l.bf16 %v3113_v58  ;;  %v3493_v58 = vld [vmem:[%s5122_s2 + $0x28] sm:$0xf0] }
 0x398   :  { %v3310_v57 = vor.u32 %v3511_v56, %v3309_v55  ;;  %v3492_v55 = vld [vmem:[%s5122_s2 + $0x20] sm:$0xf0]  ;;  %v3491_v56 = vld [vmem:[%s5122_s2 + $0x1c] sm:$0xf] }
 0x39b   :  { %1752 = vmatpush.bf16.msra.mxu2 %v3130_v1  ;;  %2031 = vmatpush.bf16.msrb.mxu3 %v3310_v57  ;;  %v3237_v57 = vld [vmem:[%s5122_s2 + $0x20] sm:$0xf] }
 0x39f   :  { %1753 = vmatpush.bf16.msra.mxu2 %v3118_v12 }
 0x40d   :  { %v1509_v11 = vpop.f32.mrf.mxu0 }
 0x40e   :  { %v1551_v16 = vadd.f32 %v1550_v6, %v1509_v11  ;;  %v4648_v17 = vpop.f32.mrf.mxu1  ;;  %v3138_v6 = vor.u32 %v3469_v63, %v3137_v62  ;;  %v3297_v62 = vld [vmem:[%s5122_s2 + $0x98] sm:$0xf]  ;;  %v3508_v63 = vld [vmem:[%s5122_s2 + $0xa0] sm:$0xf0] }
 0x40f   :  { %v1571_v30 = vadd.f32 %v4579_v34, %v4648_v17  ;;  %v3298_v1 = vor.u32 %v3508_v63, %v3297_v62  ;;  %v3217_v62 = vld [vmem:[%s5122_s2] sm:$0xf]  ;;  %v3489_v63 = vld [vmem:[%s5122_s2 + $0x8] sm:$0xf0] }
 0x410   :  { %v3112_v20 = vmul.f32 -1.442695, %v1551_v16  ;;  %1778 = vmatpush.bf16.msrb.mxu0 %v3138_v6  ;;  %v3503_v6 = vld [vmem:[%s5122_s2 + $0x7c] sm:$0xf] }
 0x411   :  { %2032 = vmatpush.bf16.msrb.mxu3 %v3298_v1  ;;  %v3219_v1 = vld [vmem:[%s5122_s2 + $0xc] sm:$0xf0] }
 0x412   :  { %3563 = vpow2.f32 %v3112_v20 }
 0x413   :  { %v1496_v33 = vpop.f32.mrf.mxu3 }
 0x414   :  { %v1527_v42 = vadd.f32 %v1526_v21, %v1496_v33  ;;  %1779 = vmatpush.bf16.msrb.mxu0 %v3126_v14  ;;  %v1809_v14 = vunpack.c.l.bf16 %v1807_v2  ;;  %v3225_v2 = vld [vmem:[%s5122_s2 + $0x8] sm:$0xf] }
 0x415   :  { %v1511_v47 = vpop.f32.mrf.mxu0 }
 0x416   :  { %v3111_v51 = vmul.f32 -1.442695, %v1527_v42  ;;  %v1524_v53 = vpop.f32.mrf.mxu1 }
 0x418   :  { %v3564_v41 = vpop.eup %3563  ;;  %3565 = vpow2.f32 %v3111_v51  ;;  %v3510_v51 = vld [vmem:[%s5122_s2 + $0xb0] sm:$0xf0] }
 0x419   :  { %v4711_v59 = vadd.f32 1.0, %v3564_v41  ;;  %v3302_v53 = vor.u32 %v3510_v51, %v3301_v50 }
 0x41b   :  { %v1498_v0 = vpop.f32.mrf.mxu3  ;;  %3567 = vrcp.f32 %v4711_v59  ;;  %v1567_v37 = vand.u32 2147483648, %v4711_v59  ;;  %vm1561_vm13 = vweird.f32 %v4711_v59  ;;  %v1565_v39 = vand.u32 2147483647, %v4711_v59  ;;  %2005 = vmatpush.bf16.msrb.mxu1 %v3302_v53 }
 0x41c   :  { %v3294_v0 = vor.u32 %v3506_v35, %v3291_v61  ;;  %v3238_v61 = vor.u32 %v3493_v58, %v3237_v57  ;;  %v2357_v58 = vld [vmem:[#allocation2 + $0x5] sm:$0x1] }
 0x41d   :  { %v1568_v43 = vor.u32 1.1754944e-38, %v1567_v37  ;;  %vm1566_vm15 = vcmp.eq.f32.partialorder %v1565_v39, 8.507059e+37 }
 0x41e   :  { %v3566_v8 = vpop.eup %3565 }
 0x41f   :  { %v1531_v11 = vadd.f32 1.0, %v3566_v8  ;;  %v3285_v8 = vld [vmem:[%s5122_s2 + $0x80] sm:$0xf] }
 0x420   :  { %v3286_v12 = vor.u32 %v3505_v9, %v3285_v8 }
 0x421   :  { %3569 = vrcp.f32 %v1531_v11  ;;  %v3568_v15 = vpop.eup %3567  ;;  %v1543_v22 = vand.u32 2147483648, %v1531_v11  ;;  %v1541_v24 = vand.u32 2147483647, %v1531_v11  ;;  %vm1537_vm9 = vweird.f32 %v1531_v11 }
 0x422   :  { %v1557_v16 = vmul.f32 %v3568_v15, %v4711_v59  ;;  %vm1562_vm12 = vweird.f32 %v3568_v15  ;;  %v3507_v59 = vld [vmem:[%s5122_s2 + $0x98] sm:$0xf0]  ;;  %2033 = vmatpush.bf16.msrb.mxu3 %v3286_v12 }
 0x423   :  { %v1544_v29 = vor.u32 1.1754944e-38, %v1543_v22  ;;  %vm1542_vm11 = vcmp.eq.f32.partialorder %v1541_v24, 8.507059e+37  ;;  %vm1563_vm14 = vmor %vm1561_vm13, %vm1562_vm12  ;;  %v3290_v60 = vor.u32 %v3507_v59, %v3289_v28  ;;  %v3502_v22 = vld [vmem:[%s5122_s2 + $0x70] sm:$0xf0] }
 0x424   :  { %v1558_v20 = vsub.f32 1.0, %v1557_v16  ;;  %v3501_v16 = vld [vmem:[%s5122_s2 + $0x68] sm:$0xf0] }
 0x425   :  { %2006 = vmatpush.bf16.msrb.mxu1 %v3290_v60 }
 0x426   :  { %v1559_v25 = vmul.f32 %v3568_v15, %v1558_v20  ;;  %v3267_v20 = vld [vmem:[%s5122_s2 + $0x6c] sm:$0xf0] }
 0x427   :  { %v3570_v18 = vpop.eup %3569 }
 0x428   :  { %v1533_v19 = vmul.f32 %v3570_v18, %v1531_v11  ;;  %vm1538_vm8 = vweird.f32 %v3570_v18  ;;  %v1560_v33 = vadd.f32 %v3568_v15, %v1559_v25  ;;  %v3282_v11 = vor.u32 %v3503_v6, %v3279_v3  ;;  %v3253_v25 = vld [vmem:[%s5122_s2 + $0x48] sm:$0xf] }
 0x429   :  { %vm1539_vm10 = vmor %vm1537_vm9, %vm1538_vm8  ;;  %2007 = vmatpush.bf16.msrb.mxu1 %v3278_v7  ;;  %v3218_v3 = vor.u32 %v3489_v63, %v3217_v62  ;;  %vm2134_vm8 = vcmask 1041409   ;;  %vm2137_vm9 = vcmask 1042434  }
 0x42a   :  { %v1534_v21 = vsub.f32 1.0, %v1533_v19  ;;  %v1564_v42 = vsel %vm1563_vm14, %v3568_v15, %v1560_v33  ;;  %v3265_v15 = vld [vmem:[%s5122_s2 + $0x60] sm:$0xf]  ;;  %v3261_v33 = vld [vmem:[%s5122_s2 + $0x50] sm:$0xf] }
 0x42b   :  { %v1569_v17 = vsel %vm1566_vm15, %v1568_v43, %v1564_v42  ;;  %v3266_v19 = vor.u32 %v3501_v16, %v3265_v15  ;;  %v3495_v42 = vld [vmem:[%s5122_s2 + $0x38] sm:$0xf0]  ;;  %v3494_v43 = vld [vmem:[%s5122_s2 + $0x34] sm:$0xf] }
 0x42c   :  { %v1535_v23 = vmul.f32 %v3570_v18, %v1534_v21  ;;  %v1576_v44 = vsub.f32 1.0, %v1569_v17  ;;  %v1578_v47 = vmul.f32 %v1569_v17, %v4583_v52  ;;  %v3509_v52 = vld [vmem:[%s5122_s2 + $0xac] sm:$0xf]  ;;  %v3273_v21 = vld [vmem:[%s5122_s2 + $0x68] sm:$0xf] }
 0x42d   :  { %v3306_v41 = vor.u32 %v3509_v52, %v3303_v54  ;;  %v3274_v24 = vor.u32 %v3502_v22, %v3273_v21  ;;  %2008 = vmatpush.bf16.msrb.mxu1 %v3266_v19  ;;  %v3229_v54 = vld [vmem:[%s5122_s2 + $0x18] sm:$0xf] }
 0x42e   :  { %v1536_v27 = vadd.f32 %v3570_v18, %v1535_v23  ;;  %v3230_v35 = vor.u32 %v3492_v55, %v3229_v54  ;;  %v2308_v54 = vld [vmem:[#allocation2 + $0xc] sm:$0x1]  ;;  %v2257_v55 = vld [vmem:[#allocation2 + $0x3] sm:$0x1] }
 0x42f   :  { %2018 = vmatpush.bf16.msrb.mxu2 %v3306_v41  ;;  %2034 = vmatpush.bf16.msrb.mxu3 %v3274_v24  ;;  %v3231_v41 = vld [vmem:[%s5122_s2 + $0x24] sm:$0xf0]  ;;  %v2316_v63 = vpack.c.bf16 %v2308_v54, %v2308_v54 }
 0x430   :  { %v1540_v31 = vsel %vm1539_vm10, %v3570_v18, %v1536_v27  ;;  %v3500_v18 = vld [vmem:[%s5122_s2 + $0x64] sm:$0xf]  ;;  %v3497_v27 = vld [vmem:[%s5122_s2 + $0x4c] sm:$0xf]  ;;  %v3234_v60 = vor.u32 %v3491_v56, %v3231_v41  ;;  %vm2140_vm10 = vcmask 1043459  }
 0x431   :  { %v1545_v36 = vsel %vm1542_vm11, %v1544_v29, %v1540_v31  ;;  %v3270_v23 = vor.u32 %v3500_v18, %v3267_v20  ;;  %v3254_v31 = vor.u32 %v3498_v26, %v3253_v25  ;;  %v2307_v56 = vld [vmem:[#allocation2 + $0x4] sm:$0x1]  ;;  %v2358_v41 = vld [vmem:[#allocation2 + $0xd] sm:$0x1]  ;;  %vm2143_vm11 = vcmask 1044484  }
 0x432   :  { %v1572_v38 = vmul.f32 %v1571_v30, %v1545_v36  ;;  %v3499_v36 = vld [vmem:[%s5122_s2 + $0x58] sm:$0xf0] }
 0x433   :  { %2019 = vmatpush.bf16.msrb.mxu2 %v3294_v0  ;;  %v3262_v17 = vor.u32 %v3499_v36, %v3261_v33  ;;  %2009 = vmatpush.bf16.msrb.mxu1 %v3254_v31  ;;  %v3488_v0 = vld [vmem:[%s5122_s2 + $0x4] sm:$0xf] }
 0x434   :  { %v1574_v40 = vadd.f32 %v1573_v32, %v1572_v38  ;;  %v3255_v32 = vld [vmem:[%s5122_s2 + $0x54] sm:$0xf0]  ;;  %v3222_v9 = vor.u32 %v3488_v0, %v3219_v1  ;;  %v2265_v0 = vpack.c.bf16 %v2257_v55, %v2257_v55  ;;  %v2315_v1 = vpack.c.bf16 %v2307_v56, %v2307_v56 }
 0x435   :  { %v3258_v39 = vor.u32 %v3497_v27, %v3255_v32  ;;  %2035 = vmatpush.bf16.msrb.mxu3 %v3262_v17 }
 0x436   :  { %3571 = vtanh.f32 %v1574_v40  ;;  %v3241_v40 = vld [vmem:[%s5122_s2 + $0x30] sm:$0xf] }
 0x437   :  { %2020 = vmatpush.bf16.msrb.mxu2 %v3282_v11  ;;  %v3242_v51 = vor.u32 %v3495_v42, %v3241_v40  ;;  %v3226_v11 = vor.u32 %v3490_v4, %v3225_v2  ;;  %v2407_v2 = vld [vmem:[#allocation2 + $0x6] sm:$0x1]  ;;  %v2457_v4 = vld [vmem:[#allocation2 + $0x7] sm:$0x1] }
 0x439   :  { %2010 = vmatpush.bf16.msrb.mxu1 %v3242_v51  ;;  %v2258_v51 = vld [vmem:[#allocation2 + $0xb] sm:$0x1] }
 0x43b   :  { %2021 = vmatpush.bf16.msrb.mxu2 %v3270_v23  ;;  %v3114_v23 = vld [vmem:[%s5125_s0 + $0x50] sm:$0xf] }
 0x43c   :  { %v3572_v45 = vpop.eup %3571 }
 0x43d   :  { %v1577_v46 = vmul.f32 %v3572_v45, %v1576_v44  ;;  %v3243_v44 = vld [vmem:[%s5122_s2 + $0x3c] sm:$0xf0]  ;;  %v3249_v45 = vld [vmem:[%s5122_s2 + $0x38] sm:$0xf]  ;;  %2011 = vmatpush.bf16.msrb.mxu1 %v3230_v35  ;;  %v2266_v35 = vpack.c.bf16 %v2258_v51, %v2258_v51 }
 0x43e   :  { %v3246_v52 = vor.u32 %v3494_v43, %v3243_v44 }
 0x43f   :  { %v4754_v48 = vadd.f32 %v1578_v47, %v1577_v46  ;;  %v3496_v46 = vld [vmem:[%s5122_s2 + $0x40] sm:$0xf0]  ;;  %2022 = vmatpush.bf16.msrb.mxu2 %v3258_v39 }
 0x440   :  { %v3250_v53 = vor.u32 %v3496_v46, %v3249_v45  ;;  %v2102_v45 = vld [vmem:[#allocation2 + $0x8] sm:$0x1]  ;;  %v2101_v46 = vld [vmem:[#allocation2] sm:$0x1] }
 0x441   :  { %1581 = vst [vmem:[#allocation2 + $0x28] sm:$0xff] %v4754_v48  ;;  %v1585_v49 = vpack.c.bf16 %v4754_v48, %v4754_v48  ;;  %2012 = vmatpush.bf16.msrb.mxu1 %v3218_v3  ;;  %v2365_v3 = vpack.c.bf16 %v2357_v58, %v2357_v58  ;;  %v2409_v58 = vld [vmem:[#allocation2 + $0x16] sm:$0x1] }
 0x442   :  { %2036 = vmatpush.bf16.msrb.mxu3 %v3250_v53  ;;  %v2110_v53 = vpack.c.bf16 %v2102_v45, %v2102_v45 }
 0x443   :  { %1754 = vmatmul.bf16.vlgmr.msra.gmra.mxu2 %v1585_v49  ;;  %1767 = vmatmul.bf16.vlgmr.msra.gmra.mxu3 %v1585_v49 }
 0x444   :  { %1780 = vmatmul.bf16.vlgmr.msrb.gmra.mxu0 %v1585_v49  ;;  %2023 = vmatpush.bf16.msrb.mxu2 %v3246_v52  ;;  %v2207_v52 = vld [vmem:[#allocation2 + $0x2] sm:$0x1] }
 0x445   :  { %v2215_v62 = vpack.c.bf16 %v2207_v52, %v2207_v52 }
 0x446   :  { %2037 = vmatpush.bf16.msrb.mxu3 %v3238_v61  ;;  %v2458_v61 = vld [vmem:[#allocation2 + $0xf] sm:$0x1] }
 0x448   :  { %2024 = vmatpush.bf16.msrb.mxu2 %v3234_v60  ;;  %v2408_v60 = vld [vmem:[#allocation2 + $0xe] sm:$0x1] }
 0x44a   :  { %2038 = vmatpush.bf16.msrb.mxu3 %v3226_v11 }
 0x44c   :  { %2025 = vmatpush.bf16.msrb.mxu2 %v3222_v9  ;;  %v2466_v9 = vpack.c.bf16 %v2458_v61, %v2458_v61 }
 0x4c1   :  { %v4816_v10 = vpop.f32.mrf.mxu0 }
 0x4c2   :  { %v1830_v26 = vadd.f32 %v4579_v34, %v4816_v10 }
 0x4c6   :  { %v1755_v29 = vpop.f32.mrf.mxu2  ;;  %v1768_v30 = vpop.f32.mrf.mxu3 }
 0x4c7   :  { %v1786_v37 = vadd.f32 %v1785_v13, %v1755_v29  ;;  %v1810_v38 = vadd.f32 %v1809_v14, %v1768_v30  ;;  %v1832_v29 = vunpack.c.l.bf16 %v3114_v23 }
 0x4c9   :  { %v3211_v47 = vmul.f32 -1.442695, %v1786_v37  ;;  %v3212_v49 = vmul.f32 -1.442695, %v1810_v38  ;;  %v1783_v50 = vpop.f32.mrf.mxu0 }
 0x4ca   :  { %v2208_v50 = vld [vmem:[#allocation2 + $0xa] sm:$0x1] }
 0x4cb   :  { %3573 = vpow2.f32 %v3211_v47  ;;  %v2157_v47 = vld [vmem:[#allocation2 + $0x1] sm:$0x1] }
 0x4cc   :  { %3575 = vpow2.f32 %v3212_v49  ;;  %v2158_v49 = vld [vmem:[#allocation2 + $0x9] sm:$0x1]  ;;  %v2165_v57 = vpack.c.bf16 %v2157_v47, %v2157_v47  ;;  %v2359_v47 = vld [vmem:[#allocation2 + $0x15] sm:$0x1] }
 0x4ce   :  { %v1757_v28 = vpop.f32.mrf.mxu2  ;;  %v1770_v59 = vpop.f32.mrf.mxu3  ;;  %v2181_v11 = vunpack.c.l.b16 %v2165_v57  ;;  %v2367_v57 = vpack.c.bf16 %v2359_v47, %v2359_v47 }
 0x4cf   :  { %v2166_v28 = vpack.c.bf16 %v2158_v49, %v2158_v49  ;;  %v2216_v59 = vpack.c.bf16 %v2208_v50, %v2208_v50 }
 0x4d1   :  { %v3574_v5 = vpop.eup %3573 }
 0x4d2   :  { %v3576_v6 = vpop.eup %3575  ;;  %v1790_v7 = vadd.f32 1.0, %v3574_v5  ;;  %v2126_v5 = vunpack.c.l.b16 %v2110_v53 }
 0x4d3   :  { %v1814_v8 = vadd.f32 1.0, %v3576_v6  ;;  %v2366_v6 = vpack.c.bf16 %v2358_v41, %v2358_v41 }
 0x4d4   :  { %3577 = vrcp.f32 %v1790_v7  ;;  %v1802_v18 = vand.u32 2147483648, %v1790_v7  ;;  %v1800_v21 = vand.u32 2147483647, %v1790_v7  ;;  %vm1796_vm1 = vweird.f32 %v1790_v7 }
 0x4d5   :  { %3579 = vrcp.f32 %v1814_v8  ;;  %v1826_v33 = vand.u32 2147483648, %v1814_v8  ;;  %vm1820_vm5 = vweird.f32 %v1814_v8  ;;  %v1824_v36 = vand.u32 2147483647, %v1814_v8 }
 0x4d6   :  { %v1803_v25 = vor.u32 1.1754944e-38, %v1802_v18  ;;  %vm1801_vm3 = vcmp.eq.f32.partialorder %v1800_v21, 8.507059e+37  ;;  %v2415_v18 = vpack.c.bf16 %v2407_v2, %v2407_v2  ;;  %v2281_v21 = vunpack.c.l.b16 %v2265_v0  ;;  %v2104_v0 = vld [vmem:[#allocation2 + $0x18] sm:$0x1] }
 0x4d7   :  { %v1827_v39 = vor.u32 1.1754944e-38, %v1826_v33  ;;  %vm1825_vm7 = vcmp.eq.f32.partialorder %v1824_v36, 8.507059e+37  ;;  %v2133_v23 = vrot.slane %v2126_v5, 7  ;;  %v2160_v5 = vld [vmem:[#allocation2 + $0x19] sm:$0x1] }
 0x4da   :  { %v3578_v12 = vpop.eup %3577 }
 0x4db   :  { %v3580_v13 = vpop.eup %3579  ;;  %v1792_v14 = vmul.f32 %v3578_v12, %v1790_v7  ;;  %vm1797_vm0 = vweird.f32 %v3578_v12 }
 0x4dc   :  { %v1816_v15 = vmul.f32 %v3580_v13, %v1814_v8  ;;  %vm1798_vm2 = vmor %vm1796_vm1, %vm1797_vm0  ;;  %vm1821_vm4 = vweird.f32 %v3580_v13  ;;  %v2416_v8 = vpack.c.bf16 %v2408_v60, %v2408_v60 }
 0x4dd   :  { %v1793_v16 = vsub.f32 1.0, %v1792_v14  ;;  %vm1822_vm6 = vmor %vm1820_vm5, %vm1821_vm4  ;;  %v2282_v14 = vunpack.c.l.b16 %v2266_v35  ;;  %vm2146_vm4 = vcmask 1045509   ;;  %vm2149_vm5 = vcmask 1046534  }
 0x4de   :  { %v1817_v19 = vsub.f32 1.0, %v1816_v15  ;;  %v3213_v15 = vld [vmem:[%s5125_s0 + $0x54] sm:$0xff] }
 0x4df   :  { %v1794_v20 = vmul.f32 %v3578_v12, %v1793_v16  ;;  %v2231_v16 = vunpack.c.l.b16 %v2215_v62  ;;  %v2289_v36 = vrot.slane %v2282_v14, 7 }
 0x4e0   :  { %v1818_v22 = vmul.f32 %v3580_v13, %v1817_v19  ;;  %v2465_v19 = vpack.c.bf16 %v2457_v4, %v2457_v4 }
 0x4e1   :  { %v1795_v24 = vadd.f32 %v3578_v12, %v1794_v20  ;;  %v2332_v20 = vunpack.c.l.b16 %v2316_v63  ;;  %v4930_v41 = vsel %vm2134_vm8, %v2289_v36, %v2281_v21  ;;  %v2459_v63 = vld [vmem:[#allocation2 + $0x17] sm:$0x1] }
 0x4e2   :  { %v1819_v31 = vadd.f32 %v3580_v13, %v1818_v22  ;;  %v2331_v22 = vunpack.c.l.b16 %v2315_v1  ;;  %v2467_v14 = vpack.c.bf16 %v2459_v63, %v2459_v63 }
 0x4e3   :  { %v1799_v27 = vsel %vm1798_vm2, %v3578_v12, %v1795_v24  ;;  %v2182_v12 = vunpack.c.l.b16 %v2166_v28  ;;  %v2382_v24 = vunpack.c.l.b16 %v2366_v6  ;;  %v2210_v6 = vld [vmem:[#allocation2 + $0x1a] sm:$0x1] }
 0x4e4   :  { %v1804_v30 = vsel %vm1801_vm3, %v1803_v25, %v1799_v27  ;;  %v1823_v38 = vsel %vm1822_vm6, %v3580_v13, %v1819_v31  ;;  %v2232_v13 = vunpack.c.l.b16 %v2216_v59  ;;  %v2432_v25 = vunpack.c.l.b16 %v2416_v8  ;;  %v2103_v27 = vld [vmem:[#allocation2 + $0x10] sm:$0x1] }
 0x4e5   :  { %v1831_v32 = vmul.f32 %v1830_v26, %v1804_v30  ;;  %v1828_v40 = vsel %vm1825_vm7, %v1827_v39, %v1823_v38  ;;  %v2482_v26 = vunpack.c.l.b16 %v2466_v9  ;;  %v2044_v30 = vunpack.c.l.bf16 %v3213_v15  ;;  %v2260_v9 = vld [vmem:[#allocation2 + $0x1b] sm:$0x1] }
 0x4e6   :  { %v1835_v42 = vsub.f32 1.0, %v1828_v40  ;;  %v1837_v10 = vmul.f32 %v1828_v40, %v4754_v48  ;;  %v2109_v48 = vpack.c.bf16 %v2101_v46, %v2101_v46  ;;  %v2381_v31 = vunpack.c.l.b16 %v2365_v3 }
 0x4e7   :  { %v1833_v37 = vadd.f32 %v1832_v29, %v1831_v32  ;;  %v2159_v29 = vld [vmem:[#allocation2 + $0x11] sm:$0x1]  ;;  %v2189_v32 = vrot.slane %v2182_v12, 7  ;;  %v2239_v33 = vrot.slane %v2232_v13, 7  ;;  %v2431_v38 = vunpack.c.l.b16 %v2415_v18  ;;  %v2410_v18 = vld [vmem:[#allocation2 + $0x1e] sm:$0x1] }
 0x4e8   :  { %v2125_v7 = vunpack.c.l.b16 %v2109_v48  ;;  %v2481_v39 = vunpack.c.l.b16 %v2465_v19  ;;  %v2339_v40 = vrot.slane %v2332_v20, 7  ;;  %v2111_v45 = vpack.c.bf16 %v2103_v27, %v2103_v27 }
 0x4e9   :  { %3581 = vtanh.f32 %v1833_v37  ;;  %v2209_v37 = vld [vmem:[#allocation2 + $0x12] sm:$0x1]  ;;  %v2167_v46 = vpack.c.bf16 %v2159_v29, %v2159_v29  ;;  %v2439_v50 = vrot.slane %v2432_v25, 7  ;;  %v2489_v51 = vrot.slane %v2482_v26, 7 }
 0x4ea   :  { %v2217_v52 = vpack.c.bf16 %v2209_v37, %v2209_v37  ;;  %v2190_v54 = vsel %vm2134_vm8, %v2189_v32, %v2181_v11  ;;  %v4927_v48 = vsel %vm2134_vm8, %v2239_v33, %v2231_v16  ;;  %v4933_v35 = vsel %vm2134_vm8, %v2339_v40, %v2331_v22  ;;  %v2310_v11 = vld [vmem:[#allocation2 + $0x1c] sm:$0x1]  ;;  %v2360_v16 = vld [vmem:[#allocation2 + $0x1d] sm:$0x1] }
 0x4eb   :  { %v2127_v61 = vunpack.c.l.b16 %v2111_v45  ;;  %v2183_v62 = vunpack.c.l.b16 %v2167_v46  ;;  %v4939_v1 = vsel %vm2134_vm8, %v2439_v50, %v2431_v38  ;;  %v4942_v2 = vsel %vm2134_vm8, %v2489_v51, %v2481_v39 }
 0x4ec   :  { %v2233_v4 = vunpack.c.l.b16 %v2217_v52  ;;  %v2417_v8 = vpack.c.bf16 %v2409_v58, %v2409_v58  ;;  %v2383_v13 = vunpack.c.l.b16 %v2367_v57  ;;  %v2268_v27 = vpack.c.bf16 %v2260_v9, %v2260_v9 }
 0x4ed   :  { %v2136_v21 = vrot.slane %v2127_v61, 6  ;;  %v2191_v22 = vrot.slane %v2183_v62, 6  ;;  %v2318_v29 = vpack.c.bf16 %v2310_v11, %v2310_v11  ;;  %v2368_v33 = vpack.c.bf16 %v2360_v16, %v2360_v16  ;;  %v2105_v62 = vld [vmem:[#allocation2 + $0x20] sm:$0x1] }
 0x4ee   :  { %v2241_v26 = vrot.slane %v2233_v4, 6  ;;  %v2433_v32 = vunpack.c.l.b16 %v2417_v8  ;;  %v2418_v36 = vpack.c.bf16 %v2410_v18, %v2410_v18  ;;  %v2483_v39 = vunpack.c.l.b16 %v2467_v14  ;;  %v2311_v14 = vld [vmem:[#allocation2 + $0x24] sm:$0x1] }
 0x4ef   :  { %v3582_v43 = vpop.eup %3581  ;;  %v2192_v47 = vsel %vm2137_vm9, %v2191_v22, %v2190_v54  ;;  %v2334_v50 = vunpack.c.l.b16 %v2318_v29  ;;  %v2384_v52 = vunpack.c.l.b16 %v2368_v33  ;;  %v2411_v29 = vld [vmem:[#allocation2 + $0x26] sm:$0x1]  ;;  %v2461_v33 = vld [vmem:[#allocation2 + $0x27] sm:$0x1]  ;;  %vm2152_vm6 = vcmask 1047559  }
 0x4f0   :  { %v1836_v34 = vmul.f32 %v3582_v43, %v1835_v42  ;;  %v2259_v42 = vld [vmem:[#allocation2 + $0x13] sm:$0x1]  ;;  %v2309_v43 = vld [vmem:[#allocation2 + $0x14] sm:$0x1]  ;;  %v2441_v51 = vrot.slane %v2433_v32, 6  ;;  %v2491_v57 = vrot.slane %v2483_v39, 6 }
 0x4f1   :  { %v2267_v55 = vpack.c.bf16 %v2259_v42, %v2259_v42  ;;  %v2317_v56 = vpack.c.bf16 %v2309_v43, %v2309_v43  ;;  %v2391_v42 = vrot.slane %v2383_v13, 6  ;;  %v2393_v8 = vrot.slane %v2384_v52, 5  ;;  %v2261_v13 = vld [vmem:[#allocation2 + $0x23] sm:$0x1] }
 0x4f2   :  { %v4914_v17 = vadd.f32 %v1837_v10, %v1836_v34  ;;  %v2066_v34 = vrot.slane %v3213_v15, 4  ;;  %v4923_v10 = vsel %vm2134_vm8, %v2133_v23, %v2125_v7  ;;  %v2112_v15 = vpack.c.bf16 %v2104_v0, %v2104_v0 }
 0x4f3   :  { %v2283_v7 = vunpack.c.l.b16 %v2267_v55  ;;  %v2333_v3 = vunpack.c.l.b16 %v2317_v56  ;;  %v2168_v23 = vpack.c.bf16 %v2160_v5, %v2160_v5  ;;  %v2138_v46 = vsel %vm2137_vm9, %v2136_v21, %v4923_v10 }
 0x4f4   :  { %1840 = vst [vmem:[#allocation2 + $0x30] sm:$0xff] %v4914_v17  ;;  %v1844_v44 = vpack.c.bf16 %v4914_v17, %v4914_v17  ;;  %v2068_v59 = vunpack.c.l.bf16 %v2066_v34  ;;  %v2128_v40 = vunpack.c.l.b16 %v2112_v15  ;;  %v2242_v56 = vsel %vm2137_vm9, %v2241_v26, %v4927_v48  ;;  %v2361_v15 = vld [vmem:[#allocation2 + $0x25] sm:$0x1] }
 0x4f5   :  { %v2341_v38 = vrot.slane %v2333_v3, 6  ;;  %v2184_v43 = vunpack.c.l.b16 %v2168_v23  ;;  %v2343_v48 = vrot.slane %v2334_v50, 5  ;;  %v2442_v3 = vsel %vm2137_vm9, %v2441_v51, %v4939_v1 }
 0x4f6   :  { %2013 = vmatmul.bf16.vlgmr.msrb.gmra.mxu1 %v1844_v44  ;;  %2026 = vmatmul.bf16.vlgmr.msrb.gmra.mxu2 %v1844_v44  ;;  %v2139_v58 = vrot.slane %v2128_v40, 5  ;;  %v4966_v11 = vsel %vm2137_vm9, %v2491_v57, %v4942_v2  ;;  %v2319_v26 = vpack.c.bf16 %v2311_v14, %v2311_v14  ;;  %v2419_v40 = vpack.c.bf16 %v2411_v29, %v2411_v29 }
 0x4f7   :  { %2039 = vmatmul.bf16.vlgmr.msrb.gmra.mxu3 %v1844_v44  ;;  %v2389_v44 = vrot.slane %v2382_v24, 7  ;;  %v2218_v24 = vpack.c.bf16 %v2210_v6, %v2210_v6  ;;  %v2193_v54 = vrot.slane %v2184_v43, 5  ;;  %v2342_v0 = vsel %vm2137_vm9, %v2341_v38, %v4933_v35  ;;  %v2161_v6 = vld [vmem:[#allocation2 + $0x21] sm:$0x1] }
 0x4f8   :  { %v4969_v35 = vsel %vm2140_vm10, %v2139_v58, %v2138_v46  ;;  %v2169_v18 = vpack.c.bf16 %v2161_v6, %v2161_v6  ;;  %v4984_v22 = vsel %vm2140_vm10, %v2343_v48, %v2342_v0  ;;  %v2469_v50 = vpack.c.bf16 %v2461_v33, %v2461_v33 }
 0x4f9   :  { %v4936_v60 = vsel %vm2134_vm8, %v2389_v44, %v2381_v31  ;;  %v2291_v31 = vrot.slane %v2283_v7, 6  ;;  %v2234_v34 = vunpack.c.l.b16 %v2218_v24  ;;  %v2460_v44 = vld [vmem:[#allocation2 + $0x1f] sm:$0x1]  ;;  %v2211_v7 = vld [vmem:[#allocation2 + $0x22] sm:$0x1]  ;;  %v4974_v1 = vsel %vm2140_vm10, %v2193_v54, %v2192_v47 }
 0x4fa   :  { %v2392_v4 = vsel %vm2137_vm9, %v2391_v42, %v4936_v60  ;;  %v2113_v60 = vpack.c.bf16 %v2105_v62, %v2105_v62  ;;  %v3214_v42 = vld [vmem:[%s5125_s0 + $0x5c] sm:$0xf]  ;;  %v2335_v47 = vunpack.c.l.b16 %v2319_v26  ;;  %v2435_v62 = vunpack.c.l.b16 %v2419_v40 }
 0x4fb   :  { %v2292_v10 = vsel %vm2137_vm9, %v2291_v31, %v4930_v41  ;;  %v2243_v61 = vrot.slane %v2234_v34, 5  ;;  %v4988_v24 = vsel %vm2140_vm10, %v2393_v8, %v2392_v4  ;;  %v2091_v58 = vunpack.c.l.bf16 %v3214_v42  ;;  %v2106_v4 = vld [vmem:[#allocation2 + $0x28] sm:$0x1] }
 0x4fc   :  { %v2129_v32 = vunpack.c.l.b16 %v2113_v60  ;;  %v2262_v60 = vld [vmem:[#allocation2 + $0x2b] sm:$0x1] }
 0x4fd   :  { %v4978_v2 = vsel %vm2140_vm10, %v2243_v61, %v2242_v56 }
 0x4fe   :  { %v2142_v51 = vrot.slane %v2129_v32, 4  ;;  %v2412_v32 = vld [vmem:[#allocation2 + $0x2e] sm:$0x1] }
 0x573   :  { %v2014_v49 = vpop.f32.mrf.mxu1 }
 0x574   :  { %v2045_v53 = vadd.f32 %v2044_v30, %v2014_v49  ;;  %v2284_v49 = vunpack.c.l.b16 %v2268_v27  ;;  %v2369_v27 = vpack.c.bf16 %v2361_v15, %v2361_v15  ;;  %v2445_v15 = vrot.slane %v2435_v62, 4 }
 0x576   :  { %v3311_v28 = vmul.f32 -1.442695, %v2045_v53  ;;  %v2434_v53 = vunpack.c.l.b16 %v2418_v36  ;;  %v2293_v5 = vrot.slane %v2284_v49, 5  ;;  %v2385_v49 = vunpack.c.l.b16 %v2369_v27 }
 0x578   :  { %3583 = vpow2.f32 %v3311_v28  ;;  %v2468_v28 = vpack.c.bf16 %v2460_v44, %v2460_v44  ;;  %v2443_v41 = vrot.slane %v2434_v53, 5  ;;  %v4981_v21 = vsel %vm2140_vm10, %v2293_v5, %v2292_v10  ;;  %v3594_v10 = vld [vmem:[%s5124_s3] ss:$0 sm:$0xff] }
 0x579   :  { %v2027_v12 = vpop.f32.mrf.mxu2  ;;  %v2395_v8 = vrot.slane %v2385_v49, 4  ;;  %v2420_v49 = vpack.c.bf16 %v2412_v32, %v2412_v32 }
 0x57a   :  { %v2069_v19 = vadd.f32 %v2068_v59, %v2027_v12  ;;  %v4944_v20 = vpop.f32.mrf.mxu3  ;;  %v4971_v12 = vunpack.c.l.b16 %v2468_v28 }
 0x57b   :  { %v2016_v25 = vpop.f32.mrf.mxu1  ;;  %v2089_v54 = vadd.f32 %v3594_v10, %v4944_v20  ;;  %v2463_v10 = vld [vmem:[#allocation2 + $0x37] sm:$0x1] }
 0x57c   :  { %v3312_v30 = vmul.f32 -1.442695, %v2069_v19  ;;  %v2219_v19 = vpack.c.bf16 %v2211_v7, %v2211_v7  ;;  %v2269_v25 = vpack.c.bf16 %v2261_v13, %v2261_v13  ;;  %v2493_v31 = vrot.slane %v4971_v12, 5 }
 0x57d   :  { %v5016_v12 = vsel %vm2143_vm11, %v2142_v51, %v4969_v35  ;;  %v2362_v35 = vld [vmem:[#allocation2 + $0x2d] sm:$0x1] }
 0x57e   :  { %v3584_v37 = vpop.eup %3583  ;;  %3585 = vpow2.f32 %v3312_v30  ;;  %v4991_v30 = vsel %vm2140_vm10, %v2443_v41, %v2442_v3  ;;  %v2235_v38 = vunpack.c.l.b16 %v2219_v19  ;;  %v2285_v46 = vunpack.c.l.b16 %v2269_v25  ;;  %v2212_v41 = vld [vmem:[#allocation2 + $0x2a] sm:$0x1]  ;;  %v2312_v25 = vld [vmem:[#allocation2 + $0x2c] sm:$0x1] }
 0x57f   :  { %v4946_v45 = vadd.f32 1.0, %v3584_v37  ;;  %v2185_v37 = vunpack.c.l.b16 %v2169_v18  ;;  %v2494_v7 = vsel %vm2140_vm10, %v2493_v31, %v4966_v11  ;;  %v2345_v3 = vrot.slane %v2335_v47, 4 }
 0x580   :  { %v2245_v56 = vrot.slane %v2235_v38, 4  ;;  %v2295_v61 = vrot.slane %v2285_v46, 4  ;;  %v2114_v18 = vpack.c.bf16 %v2106_v4, %v2106_v4  ;;  %v2270_v31 = vpack.c.bf16 %v2262_v60, %v2262_v60  ;;  %v2163_v38 = vld [vmem:[#allocation2 + $0x31] sm:$0x1] }
 0x581   :  { %3587 = vrcp.f32 %v4946_v45  ;;  %v2029_v55 = vpop.f32.mrf.mxu2  ;;  %v2061_v39 = vand.u32 2147483648, %v4946_v45  ;;  %v2059_v34 = vand.u32 2147483647, %v4946_v45  ;;  %vm2055_vm13 = vweird.f32 %v4946_v45 }
 0x582   :  { %v2042_v59 = vpop.f32.mrf.mxu3  ;;  %v2195_v55 = vrot.slane %v2185_v37, 4  ;;  %v5035_v29 = vsel %vm2143_vm11, %v2245_v56, %v4978_v2  ;;  %v5039_v33 = vsel %vm2143_vm11, %v2295_v61, %v4981_v21  ;;  %v5047_v37 = vsel %vm2143_vm11, %v2395_v8, %v4988_v24 }
 0x583   :  { %v2062_v57 = vor.u32 1.1754944e-38, %v2061_v39  ;;  %vm2060_vm15 = vcmp.eq.f32.partialorder %v2059_v34, 8.507059e+37  ;;  %v2213_v39 = vld [vmem:[#allocation2 + $0x32] sm:$0x1]  ;;  %v5051_v40 = vsel %vm2143_vm11, %v2445_v15, %v4991_v30  ;;  %v2320_v21 = vpack.c.bf16 %v2312_v25, %v2312_v25  ;;  %v2263_v34 = vld [vmem:[#allocation2 + $0x33] sm:$0x1] }
 0x584   :  { %v3586_v63 = vpop.eup %3585  ;;  %v2130_v46 = vunpack.c.l.b16 %v2114_v18  ;;  %v2286_v51 = vunpack.c.l.b16 %v2270_v31 }
 0x585   :  { %v4962_v9 = vadd.f32 1.0, %v3586_v63  ;;  %v2485_v63 = vunpack.c.l.b16 %v2469_v50  ;;  %v2413_v50 = vld [vmem:[#allocation2 + $0x36] sm:$0x1] }
 0x586   :  { %v2421_v61 = vpack.c.bf16 %v2413_v50, %v2413_v50  ;;  %v2297_v15 = vrot.slane %v2286_v51, 3 }
 0x587   :  { %v3588_v16 = vpop.eup %3587  ;;  %3589 = vrcp.f32 %v4962_v9  ;;  %v2085_v48 = vand.u32 2147483648, %v4962_v9  ;;  %v2083_v20 = vand.u32 2147483647, %v4962_v9  ;;  %vm2079_vm1 = vweird.f32 %v4962_v9 }
 0x588   :  { %v2051_v23 = vmul.f32 %v3588_v16, %v4946_v45  ;;  %vm2056_vm12 = vweird.f32 %v3588_v16  ;;  %v2162_v45 = vld [vmem:[#allocation2 + $0x29] sm:$0x1] }
 0x589   :  { %vm2057_vm14 = vmor %vm2055_vm13, %vm2056_vm12  ;;  %v2170_v19 = vpack.c.bf16 %v2162_v45, %v2162_v45  ;;  %v2086_v26 = vor.u32 1.1754944e-38, %v2085_v48  ;;  %vm2084_vm3 = vcmp.eq.f32.partialorder %v2083_v20, 8.507059e+37  ;;  %v2436_v45 = vunpack.c.l.b16 %v2420_v49 }
 0x58a   :  { %v2052_v36 = vsub.f32 1.0, %v2051_v23  ;;  %v2220_v23 = vpack.c.bf16 %v2212_v41, %v2212_v41 }
 0x58b   :  { %v2186_v24 = vunpack.c.l.b16 %v2170_v19 }
 0x58c   :  { %v2053_v43 = vmul.f32 %v3588_v16, %v2052_v36  ;;  %v5043_v36 = vsel %vm2143_vm11, %v2345_v3, %v4984_v22  ;;  %v2313_v22 = vld [vmem:[#allocation2 + $0x34] sm:$0x1]  ;;  %v2236_v47 = vunpack.c.l.b16 %v2220_v23 }
 0x58d   :  { %v4999_v44 = vpop.eup %3589 }
 0x58e   :  { %v2075_v52 = vmul.f32 %v4999_v44, %v4962_v9  ;;  %v2054_v53 = vadd.f32 %v3588_v16, %v2053_v43  ;;  %vm2080_vm0 = vweird.f32 %v4999_v44  ;;  %v5031_v9 = vsel %vm2143_vm11, %v2195_v55, %v4974_v1  ;;  %v2107_v1 = vld [vmem:[#allocation2 + $0x30] sm:$0x1] }
 0x58f   :  { %vm5022_vm2 = vmor %vm2079_vm1, %vm2080_vm0  ;;  %v2370_v43 = vpack.c.bf16 %v2362_v35, %v2362_v35  ;;  %v2171_v55 = vpack.c.bf16 %v2163_v38, %v2163_v38 }
 0x590   :  { %v2076_v28 = vsub.f32 1.0, %v2075_v52  ;;  %v2058_v59 = vsel %vm2057_vm14, %v3588_v16, %v2054_v53  ;;  %v2495_v16 = vrot.slane %v2485_v63, 4  ;;  %v2462_v52 = vld [vmem:[#allocation2 + $0x2f] sm:$0x1]  ;;  %v2115_v53 = vpack.c.bf16 %v2107_v1, %v2107_v1 }
 0x591   :  { %v2063_v0 = vsel %vm2060_vm15, %v2062_v57, %v2058_v59  ;;  %v2221_v57 = vpack.c.bf16 %v2213_v39, %v2213_v39  ;;  %v2386_v4 = vunpack.c.l.b16 %v2370_v43 }
 0x592   :  { %v2077_v5 = vmul.f32 %v4999_v44, %v2076_v28  ;;  %v2090_v6 = vmul.f32 %v2089_v54, %v2063_v0  ;;  %v5054_v42 = vsel %vm2143_vm11, %v2495_v16, %v2494_v7  ;;  %v2321_v28 = vpack.c.bf16 %v2313_v22, %v2313_v22 }
 0x593   :  { %v2336_v54 = vunpack.c.l.b16 %v2320_v21  ;;  %v2145_v0 = vrot.slane %v2130_v46, 3  ;;  %v2131_v48 = vunpack.c.l.b16 %v2115_v53  ;;  %v2471_v7 = vpack.c.bf16 %v2463_v10, %v2463_v10 }
 0x594   :  { %v2078_v13 = vadd.f32 %v4999_v44, %v2077_v5  ;;  %v2092_v14 = vadd.f32 %v2091_v58, %v2090_v6  ;;  %v2271_v58 = vpack.c.bf16 %v2263_v34, %v2263_v34  ;;  %v2470_v5 = vpack.c.bf16 %v2462_v52, %v2462_v52 }
 0x595   :  { %v2187_v6 = vunpack.c.l.b16 %v2171_v55  ;;  %v2237_v8 = vunpack.c.l.b16 %v2221_v57  ;;  %v2337_v20 = vunpack.c.l.b16 %v2321_v28  ;;  %v2437_v16 = vunpack.c.l.b16 %v2421_v61 }
 0x596   :  { %v2082_v27 = vsel %vm5022_vm2, %v4999_v44, %v2078_v13  ;;  %3591 = vtanh.f32 %v2092_v14  ;;  %v2363_v44 = vld [vmem:[#allocation2 + $0x35] sm:$0x1]  ;;  %v2287_v41 = vunpack.c.l.b16 %v2271_v58  ;;  %v2197_v13 = vrot.slane %v2186_v24, 3 }
 0x597   :  { %v2087_v2 = vsel %vm2084_vm3, %v2086_v26, %v2082_v27  ;;  %v2371_v59 = vpack.c.bf16 %v2363_v44, %v2363_v44  ;;  %v2247_v14 = vrot.slane %v2236_v47, 3  ;;  %v2347_v18 = vrot.slane %v2336_v54, 3 }
 0x598   :  { %v2094_v30 = vsub.f32 1.0, %v2087_v2  ;;  %v2096_v63 = vmul.f32 %v2087_v2, %v4914_v17  ;;  %v2397_v19 = vrot.slane %v2386_v4, 3  ;;  %v2447_v17 = vrot.slane %v2436_v45, 3 }
 0x599   :  { %v2387_v60 = vunpack.c.l.b16 %v2371_v59  ;;  %v5057_v11 = vunpack.c.l.b16 %v2470_v5  ;;  %v2148_v23 = vrot.slane %v2131_v48, 2  ;;  %v2199_v25 = vrot.slane %v2187_v6, 2 }
 0x59a   :  { %v5062_v35 = vunpack.c.l.b16 %v2471_v7  ;;  %v2249_v26 = vrot.slane %v2237_v8, 2  ;;  %v2299_v27 = vrot.slane %v2287_v41, 2  ;;  %v2349_v31 = vrot.slane %v2337_v20, 2 }
 0x59b   :  { %v2399_v32 = vrot.slane %v2387_v60, 2  ;;  %v2147_v1 = vsel %vm2146_vm4, %v2145_v0, %v5016_v12  ;;  %v2198_v38 = vsel %vm2146_vm4, %v2197_v13, %v5031_v9  ;;  %v2248_v39 = vsel %vm2146_vm4, %v2247_v14, %v5035_v29 }
 0x59c   :  { %v3592_v56 = vpop.eup %3591  ;;  %v2449_v2 = vrot.slane %v2437_v16, 2  ;;  %v2298_v21 = vsel %vm2146_vm4, %v2297_v15, %v5039_v33  ;;  %v2348_v43 = vsel %vm2146_vm4, %v2347_v18, %v5043_v36  ;;  %v2398_v34 = vsel %vm2146_vm4, %v2397_v19, %v5047_v37 }
 0x59d   :  { %v2095_v62 = vmul.f32 %v3592_v56, %v2094_v30  ;;  %v2497_v22 = vrot.slane %v5057_v11, 3  ;;  %v2448_v12 = vsel %vm2146_vm4, %v2447_v17, %v5051_v40  ;;  %v2150_v9 = vsel %vm2149_vm5, %v2148_v23, %v2147_v1 }
 0x59e   :  { %v2200_v44 = vsel %vm2149_vm5, %v2199_v25, %v2198_v38  ;;  %v2499_v29 = vrot.slane %v5062_v35, 2  ;;  %v2250_v46 = vsel %vm2149_vm5, %v2249_v26, %v2248_v39  ;;  %v2300_v33 = vsel %vm2149_vm5, %v2299_v27, %v2298_v21 }
 0x59f   :  { %v2097_v3 = vadd.f32 %v2096_v63, %v2095_v62  ;;  %v2350_v36 = vsel %vm2149_vm5, %v2349_v31, %v2348_v43  ;;  %v2400_v24 = vsel %vm2149_vm5, %v2399_v32, %v2398_v34  ;;  %v2450_v50 = vsel %vm2149_vm5, %v2449_v2, %v2448_v12 }
 0x5a0   :  { %v2498_v26 = vsel %vm2146_vm4, %v2497_v22, %v5054_v42 }
 0x5a1   :  { %2099 = vst [vmem:[#allocation2 + $0x38] sm:$0xff] %v2097_v3  ;;  %v2500_v32 = vsel %vm2149_vm5, %v2499_v29, %v2498_v26 }
 0x5a2   :  { %2100 = vst [vmem:[%s5126_s5] sm:$0xff] %v2097_v3 }
 0x5a8   :  { %v2108_v37 = vld [vmem:[#allocation2 + $0x38] sm:$0x1]  ;;  %v2164_v47 = vld [vmem:[#allocation2 + $0x39] sm:$0x1]  ;;  %v2214_v49 = vld [vmem:[#allocation2 + $0x3a] sm:$0x1] }
 0x5a9   :  { %v2116_v40 = vpack.c.bf16 %v2108_v37, %v2108_v37  ;;  %v2172_v51 = vpack.c.bf16 %v2164_v47, %v2164_v47  ;;  %v2222_v52 = vpack.c.bf16 %v2214_v49, %v2214_v49  ;;  %v2264_v53 = vld [vmem:[#allocation2 + $0x3b] sm:$0x1]  ;;  %v2314_v55 = vld [vmem:[#allocation2 + $0x3c] sm:$0x1]  ;;  %v2364_v30 = vld [vmem:[#allocation2 + $0x3d] sm:$0x1] }
 0x5aa   :  { %v2272_v56 = vpack.c.bf16 %v2264_v53, %v2264_v53  ;;  %v2322_v57 = vpack.c.bf16 %v2314_v55, %v2314_v55  ;;  %v2372_v58 = vpack.c.bf16 %v2364_v30, %v2364_v30  ;;  %v2414_v28 = vld [vmem:[#allocation2 + $0x3e] sm:$0x1]  ;;  %v2464_v59 = vld [vmem:[#allocation2 + $0x3f] sm:$0x1] }
 0x5ab   :  { %v2132_v10 = vunpack.c.l.b16 %v2116_v40  ;;  %v2188_v54 = vunpack.c.l.b16 %v2172_v51  ;;  %v2238_v61 = vunpack.c.l.b16 %v2222_v52  ;;  %v2422_v62 = vpack.c.bf16 %v2414_v28, %v2414_v28 }
 0x5ac   :  { %v2288_v63 = vunpack.c.l.b16 %v2272_v56  ;;  %v2338_v0 = vunpack.c.l.b16 %v2322_v57  ;;  %v2388_v4 = vunpack.c.l.b16 %v2372_v58  ;;  %v2472_v45 = vpack.c.bf16 %v2464_v59, %v2464_v59 }
 0x5ad   :  { %v2151_v5 = vrot.slane %v2132_v10, 1  ;;  %v2201_v48 = vrot.slane %v2188_v54, 1  ;;  %v2251_v6 = vrot.slane %v2238_v61, 1  ;;  %v2438_v7 = vunpack.c.l.b16 %v2422_v62 }
 0x5ae   :  { %v2301_v3 = vrot.slane %v2288_v63, 1  ;;  %v2351_v8 = vrot.slane %v2338_v0, 1  ;;  %v2401_v41 = vrot.slane %v2388_v4, 1  ;;  %v2488_v20 = vunpack.c.l.b16 %v2472_v45 }
 0x5af   :  { %v2153_v60 = vsel %vm2152_vm6, %v2151_v5, %v2150_v9  ;;  %v2202_v13 = vsel %vm2152_vm6, %v2201_v48, %v2200_v44  ;;  %v2252_v14 = vsel %vm2152_vm6, %v2251_v6, %v2250_v46  ;;  %v2451_v15 = vrot.slane %v2438_v7, 1 }
 0x5b0   :  { %v2154_v16 = vpack.c.b16 %v2153_v60, %v2153_v60  ;;  %v2203_v18 = vpack.c.b16 %v2202_v13, %v2202_v13  ;;  %v2253_v19 = vpack.c.b16 %v2252_v14, %v2252_v14  ;;  %v2302_v17 = vsel %vm2152_vm6, %v2301_v3, %v2300_v33 }
 0x5b1   :  { %v2303_v11 = vpack.c.b16 %v2302_v17, %v2302_v17  ;;  %v2352_v23 = vsel %vm2152_vm6, %v2351_v8, %v2350_v36  ;;  %v2402_v25 = vsel %vm2152_vm6, %v2401_v41, %v2400_v24  ;;  %v2452_v35 = vsel %vm2152_vm6, %v2451_v15, %v2450_v50 }
 0x5b2   :  { %2156 = vst [vmem:[%s5127_s4] sm:$0xf] %v2154_v16  ;;  %v2353_v27 = vpack.c.b16 %v2352_v23, %v2352_v23  ;;  %v2501_v31 = vrot.slane %v2488_v20, 1  ;;  %v2403_v1 = vpack.c.b16 %v2402_v25, %v2402_v25  ;;  %v2453_v38 = vpack.c.b16 %v2452_v35, %v2452_v35 }
 0x5b3   :  { %3313 = vst [vmem:[%s5127_s4 + $0x4] sm:$0xf] %v2203_v18 }
 0x5b4   :  { %3314 = vst [vmem:[%s5127_s4 + $0x8] sm:$0xf] %v2253_v19  ;;  %v2502_v42 = vsel %vm2152_vm6, %v2501_v31, %v2500_v32 }
 0x5b5   :  { %3315 = vst [vmem:[%s5127_s4 + $0xc] sm:$0xf] %v2303_v11  ;;  %v2503_v39 = vpack.c.b16 %v2502_v42, %v2502_v42 }
 0x5b6   :  { %3316 = vst [vmem:[%s5127_s4 + $0x10] sm:$0xf] %v2353_v27 }
 0x5b7   :  { %3317 = vst [vmem:[%s5127_s4 + $0x14] sm:$0xf] %v2403_v1 }
 0x5b8   :  { %3318 = vst [vmem:[%s5127_s4 + $0x18] sm:$0xf] %v2453_v38 }
 0x5b9   :  { %3319 = vst [vmem:[%s5127_s4 + $0x1c] sm:$0xf] %v2503_v39 }

</bundles_post_ra>
